<compile_context>
chip_gen: v7x
topology: tpu7x:2x2x1
jax: 0.10.0
libtpu: 0.0.40
codegen_flags: <defaults>
</compile_context>

<pallas_src>
import math
import functools

import jax
import jax.numpy as jnp
from jax.experimental import pallas as pl
from jax.experimental.pallas import tpu as pltpu

EPS = 1e-5  # torch.nn.LayerNorm default eps


# ---------------------------------------------------------------------------
# in-kernel helpers
# ---------------------------------------------------------------------------
def _layernorm(x, g, b):
    mu = jnp.mean(x, axis=-1, keepdims=True)
    var = jnp.mean(jnp.square(x - mu), axis=-1, keepdims=True)
    return (x - mu) * jax.lax.rsqrt(var + EPS) * g + b


def _dot(a, b):
    return jnp.dot(a, b, preferred_element_type=jnp.float32)


# ---------------------------------------------------------------------------
# fused kernel: encoders + all InteractionNetwork layers + decoder
# ---------------------------------------------------------------------------
def gns_fused_kernel(
    emb_ref, pos_ref, eattr_ref,                   # raw node / edge features
    src_oh_ref, dst_oh_ref, dst_ohT_ref,           # bf16 one-hot gather/scatter operators
    n_w1p_ref, n_encW_ref, n_encV_ref,             # node_in MLP (w1 pos-block, [w2,w3], [b1,b2,b3,g,beta])
    e_w1_ref, e_encW_ref, e_encV_ref,              # edge_in MLP
    dec_W_ref, dec_V_ref, dec_w3_ref, dec_b3_ref,  # node_out MLP (w3/b3 lane-padded)
    mpW_ref, mpV_ref,                              # this layer's stacked weights: [9,H,H], [10,1,H]
    out_ref,                                       # [N, 128] lane-dense padded output
    node_sc, edge_sc,                              # VMEM-resident state across layers
):
    l = pl.program_id(0)
    n_layers = pl.num_programs(0)

    # ---- encoders: run once, populate VMEM-resident node/edge state --------
    @pl.when(l == 0)
    def _encode():
        # node_in: (embed | pos) @ W1 + b1  ==  emb_contrib + pos @ W1_pos + b1
        h = jnp.maximum(_dot(pos_ref[...], n_w1p_ref[...]) + emb_ref[...] + n_encV_ref[0], 0.0)
        h = jnp.maximum(_dot(h, n_encW_ref[0]) + n_encV_ref[1], 0.0)
        h = _dot(h, n_encW_ref[1]) + n_encV_ref[2]
        node_sc[...] = _layernorm(h, n_encV_ref[3], n_encV_ref[4])

        e = jnp.maximum(_dot(eattr_ref[...], e_w1_ref[...]) + e_encV_ref[0], 0.0)
        e = jnp.maximum(_dot(e, e_encW_ref[0]) + e_encV_ref[1], 0.0)
        e = _dot(e, e_encW_ref[1]) + e_encV_ref[2]
        edge_sc[...] = _layernorm(e, e_encV_ref[3], e_encV_ref[4])

    # ---- InteractionNetwork layer `l` ---------------------------------------
    x = node_sc[...]                                    # [N, H] f32
    e = edge_sc[...]                                    # [E, H] f32
    xb = x.astype(jnp.bfloat16)

    x_j = _dot(src_oh_ref[...], xb)                     # node[src]  gather -> [E, H]
    x_i = _dot(dst_oh_ref[...], xb)                     # node[dst]  gather -> [E, H]

    # message MLP, concat-free (W1 split into x_i / x_j / edge row blocks)
    m = jnp.maximum(_dot(x_i, mpW_ref[0]) + _dot(x_j, mpW_ref[1]) + _dot(e, mpW_ref[2])
                    + mpV_ref[0], 0.0)
    m = jnp.maximum(_dot(m, mpW_ref[3]) + mpV_ref[1], 0.0)
    m = _layernorm(_dot(m, mpW_ref[4]) + mpV_ref[2], mpV_ref[3], mpV_ref[4])

    # scatter-sum to target nodes: plain dot with pre-transposed [N, E] one-hot
    aggr = _dot(dst_ohT_ref[...], m.astype(jnp.bfloat16))          # [N, H]

    # node-update MLP, concat-free (W1 split into x / aggr row blocks)
    u = jnp.maximum(_dot(x, mpW_ref[5]) + _dot(aggr, mpW_ref[6]) + mpV_ref[5], 0.0)
    u = jnp.maximum(_dot(u, mpW_ref[7]) + mpV_ref[6], 0.0)
    u = _layernorm(_dot(u, mpW_ref[8]) + mpV_ref[7], mpV_ref[8], mpV_ref[9])

    new_node = x + u                                    # residuals
    node_sc[...] = new_node
    edge_sc[...] = e + m

    # ---- decoder: run once on the final node state ---------------------------
    @pl.when(l == n_layers - 1)
    def _decode():
        h = jnp.maximum(_dot(new_node, dec_W_ref[0]) + dec_V_ref[0], 0.0)
        h = jnp.maximum(_dot(h, dec_W_ref[1]) + dec_V_ref[1], 0.0)
        out_ref[...] = _dot(h, dec_w3_ref[...]) + dec_b3_ref[...]   # lane-dense [N, 128]


# ---------------------------------------------------------------------------
# wrapper: weight packing + single pallas_call
# ---------------------------------------------------------------------------
def learned_simulator_forward(params, ptype, pos, edge_attr, src, dst):
    f32 = jnp.float32
    hp = jax.lax.Precision.HIGHEST

    N = ptype.shape[0]
    E = src.shape[0]
    P = pos.shape[1]
    EF = edge_attr.shape[1]
    type_dim = params["embed"].shape[1]
    H = params["node_in"]["w3"].shape[1]
    dim = params["node_out"]["w3"].shape[1]
    L = len(params["mp_layers"])
    assert L >= 1
    OUT_PAD = max(128, dim)

    ni, ei, no = params["node_in"], params["edge_in"], params["node_out"]

    # fold the type embedding into node_in's first Linear (per-type table) ----
    emb_tab = jnp.matmul(params["embed"], ni["w1"][:type_dim], precision=hp)   # [T, H]
    emb_contrib = emb_tab[ptype]                                               # [N, H]
    n_w1p = ni["w1"][type_dim:]                                                # [P, H]

    n_encW = jnp.stack([ni["w2"], ni["w3"]])                                   # [2, H, H]
    n_encV = jnp.stack([ni["b1"], ni["b2"], ni["b3"], ni["g"], ni["beta"]])    # [5, 1, H]
    e_w1 = ei["w1"]                                                            # [EF, H]
    e_encW = jnp.stack([ei["w2"], ei["w3"]])
    e_encV = jnp.stack([ei["b1"], ei["b2"], ei["b3"], ei["g"], ei["beta"]])

    dec_W = jnp.stack([no["w1"], no["w2"]])                                    # [2, H, H]
    dec_V = jnp.stack([no["b1"], no["b2"]])                                    # [2, 1, H]
    dec_w3 = jnp.zeros((H, OUT_PAD), f32).at[:, :dim].set(no["w3"])            # lane-dense pad
    dec_b3 = jnp.zeros((1, OUT_PAD), f32).at[:, :dim].set(no["b3"])

    # stacked per-layer weights: [L, 9, H, H] and [L, 10, 1, H] ---------------
    mpW = jnp.stack([
        jnp.stack([lp["edge"]["w1"][:H], lp["edge"]["w1"][H:2 * H], lp["edge"]["w1"][2 * H:],
                   lp["edge"]["w2"], lp["edge"]["w3"],
                   lp["node"]["w1"][:H], lp["node"]["w1"][H:],
                   lp["node"]["w2"], lp["node"]["w3"]])
        for lp in params["mp_layers"]])
    mpV = jnp.stack([
        jnp.stack([lp["edge"]["b1"], lp["edge"]["b2"], lp["edge"]["b3"],
                   lp["edge"]["g"], lp["edge"]["beta"],
                   lp["node"]["b1"], lp["node"]["b2"], lp["node"]["b3"],
                   lp["node"]["g"], lp["node"]["beta"]])
        for lp in params["mp_layers"]])

    # bf16 one-hot gather/scatter operators (built once, DMA'd once) ----------
    src_oh = jax.nn.one_hot(src, N, dtype=jnp.bfloat16)       # [E, N]
    dst_oh = jax.nn.one_hot(dst, N, dtype=jnp.bfloat16)       # [E, N]
    dst_ohT = dst_oh.T                                        # [N, E] pre-transposed

    c2 = lambda l: (0, 0)
    c3 = lambda l: (0, 0, 0)

    in_specs = [
        pl.BlockSpec((N, H), c2),                 # emb_contrib
        pl.BlockSpec((N, P), c2),                 # pos
        pl.BlockSpec((E, EF), c2),                # edge_attr
        pl.BlockSpec((E, N), c2),                 # src_oh
        pl.BlockSpec((E, N), c2),                 # dst_oh
        pl.BlockSpec((N, E), c2),                 # dst_ohT
        pl.BlockSpec((P, H), c2),                 # n_w1p
        pl.BlockSpec((2, H, H), c3),              # n_encW
        pl.BlockSpec((5, 1, H), c3),              # n_encV
        pl.BlockSpec((EF, H), c2),                # e_w1
        pl.BlockSpec((2, H, H), c3),              # e_encW
        pl.BlockSpec((5, 1, H), c3),              # e_encV
        pl.BlockSpec((2, H, H), c3),              # dec_W
        pl.BlockSpec((2, 1, H), c3),              # dec_V
        pl.BlockSpec((H, OUT_PAD), c2),           # dec_w3
        pl.BlockSpec((1, OUT_PAD), c2),           # dec_b3
        pl.BlockSpec((None, 9, H, H), lambda l: (l, 0, 0, 0)),    # mpW (streamed per layer)
        pl.BlockSpec((None, 10, 1, H), lambda l: (l, 0, 0, 0)),   # mpV (streamed per layer)
    ]
    out_spec = pl.BlockSpec((N, OUT_PAD), c2)

    out_padded = pl.pallas_call(
        gns_fused_kernel,
        out_shape=jax.ShapeDtypeStruct((N, OUT_PAD), f32),
        grid_spec=pltpu.PrefetchScalarGridSpec(
            num_scalar_prefetch=0,
            grid=(L,),
            in_specs=in_specs,
            out_specs=out_spec,
            scratch_shapes=[pltpu.VMEM((N, H), f32),     # node state
                            pltpu.VMEM((E, H), f32)]),   # edge state
        compiler_params=pltpu.CompilerParams(
            dimension_semantics=("arbitrary",),          # layers are sequential
            vmem_limit_bytes=48 * 1024 * 1024),
    )(emb_contrib, pos, edge_attr, src_oh, dst_oh, dst_ohT,
      n_w1p, n_encW, n_encV, e_w1, e_encW, e_encV,
      dec_W, dec_V, dec_w3, dec_b3, mpW, mpV)

    return out_padded[:, :dim]


# ---------------------------------------------------------------------------
# deterministic parameter init (matches MLP.reset_parameters / xavier embedding)
# ---------------------------------------------------------------------------
def _init_linear(key, fan_in, fan_out):
    w = jax.random.normal(key, (fan_in, fan_out), jnp.float32) / math.sqrt(fan_in)
    b = jnp.zeros((1, fan_out), jnp.float32)
    return w, b


def _init_mlp(key, din, hidden, dout, layernorm=True):
    k1, k2, k3 = jax.random.split(key, 3)
    p = {}
    p["w1"], p["b1"] = _init_linear(k1, din, hidden)
    p["w2"], p["b2"] = _init_linear(k2, hidden, hidden)
    p["w3"], p["b3"] = _init_linear(k3, hidden, dout)
    if layernorm and dout > 1:
        p["g"] = jnp.ones((1, dout), jnp.float32)
        p["beta"] = jnp.zeros((1, dout), jnp.float32)
    return p


def init_params(key, hidden, n_mp_layers, num_types, type_dim, dim, window):
    keys = jax.random.split(key, 4 + 2 * n_mp_layers)
    bound = math.sqrt(6.0 / (num_types + type_dim))  # xavier_uniform
    return {
        "embed": jax.random.uniform(keys[0], (num_types, type_dim), jnp.float32, -bound, bound),
        "node_in": _init_mlp(keys[1], type_dim + dim * (window + 2), hidden, hidden),
        "edge_in": _init_mlp(keys[2], dim + 1, hidden, hidden),
        "node_out": _init_mlp(keys[3], hidden, hidden, dim, layernorm=False),
        "mp_layers": [
            {"edge": _init_mlp(keys[4 + 2 * i], 3 * hidden, hidden, hidden),
             "node": _init_mlp(keys[5 + 2 * i], 2 * hidden, hidden, hidden)}
            for i in range(n_mp_layers)
        ],
    }


# ---------------------------------------------------------------------------
# pure-JAX reference (correctness check only)
# ---------------------------------------------------------------------------
def _ref_mlp(x, p, mm):
    h = jax.nn.relu(mm(x, p["w1"]) + p["b1"])
    h = jax.nn.relu(mm(h, p["w2"]) + p["b2"])
    h = mm(h, p["w3"]) + p["b3"]
    if "g" in p:
        mu = h.mean(-1, keepdims=True)
        var = jnp.square(h - mu).mean(-1, keepdims=True)
        h = (h - mu) * jax.lax.rsqrt(var + EPS) * p["g"] + p["beta"]
    return h


def reference_forward(params, ptype, pos, edge_attr, src, dst):
    mm = functools.partial(jnp.matmul, precision=jax.lax.Precision.HIGHEST)
    N = ptype.shape[0]
    node = jnp.concatenate([params["embed"][ptype], pos], axis=-1)
    node = _ref_mlp(node, params["node_in"], mm)
    edge = _ref_mlp(edge_attr, params["edge_in"], mm)
    for lp in params["mp_layers"]:
        x_i, x_j = node[dst], node[src]
        msg = _ref_mlp(jnp.concatenate([x_i, x_j, edge], axis=-1), lp["edge"], mm)
        aggr = jax.ops.segment_sum(msg, dst, num_segments=N)
        upd = _ref_mlp(jnp.concatenate([node, aggr], axis=-1), lp["node"], mm)
        node = node + upd
        edge = edge + msg
    return _ref_mlp(node, params["node_out"], mm)


# ---------------------------------------------------------------------------
if __name__ == "__main__":
    HIDDEN = 128      # hidden_size (module default)
    N_MP = 2          # n_mp_layers (kept small for this synthetic run)
    NUM_TYPES = 9
    TYPE_DIM = 16
    DIM = 2
    WINDOW = 5
    N = 64            # particles (nodes)
    E = 128           # edges

    root = jax.random.PRNGKey(0)
    kp, kt, kpos, ke, ks, kd = jax.random.split(root, 6)

    params = init_params(kp, HIDDEN, N_MP, NUM_TYPES, TYPE_DIM, DIM, WINDOW)

    ptype = jax.random.randint(kt, (N,), 0, NUM_TYPES, dtype=jnp.int32)     # data.x
    pos = jax.random.normal(kpos, (N, DIM * (WINDOW + 2)), jnp.float32)     # data.pos
    edge_attr = jax.random.normal(ke, (E, DIM + 1), jnp.float32)            # data.edge_attr
    src = jax.random.randint(ks, (E,), 0, N, dtype=jnp.int32)               # edge_index[0]
    dst = jax.random.randint(kd, (E,), 0, N, dtype=jnp.int32)               # edge_index[1]

    out = learned_simulator_forward(params, ptype, pos, edge_attr, src, dst)
    out = jax.block_until_ready(out)
    assert out.shape == (N, DIM) and out.dtype == jnp.float32

    ref = jax.block_until_ready(reference_forward(params, ptype, pos, edge_attr, src, dst))
    err_max = float(jnp.max(jnp.abs(out - ref)))
    err_rel = float(jnp.linalg.norm(out - ref) / (jnp.linalg.norm(ref) + 1e-12))
    assert jnp.isfinite(out).all()
    # tolerance reflects bf16 gather/scatter operands (f32 accumulation) vs HIGHEST-precision f32 reference
    assert err_max < 1e-1 and err_rel < 2e-2, f"mismatch vs reference: max={err_max} rel={err_rel}"

    print("KERNEL_OK")
</pallas_src>

<mosaic_0001>
module attributes {stable_mosaic.version = 11 : i64} {
  func.func @gns_fused_kernel(%arg0: i32, %arg1: memref<64x128xf32, #tpu.memory_space<vmem>>, %arg2: memref<64x14xf32, #tpu.memory_space<vmem>>, %arg3: memref<128x3xf32, #tpu.memory_space<vmem>>, %arg4: memref<128x64xbf16, #tpu.memory_space<vmem>>, %arg5: memref<128x64xbf16, #tpu.memory_space<vmem>>, %arg6: memref<64x128xbf16, #tpu.memory_space<vmem>>, %arg7: memref<14x128xf32, #tpu.memory_space<vmem>>, %arg8: memref<2x128x128xf32, #tpu.memory_space<vmem>>, %arg9: memref<5x1x128xf32, #tpu.memory_space<vmem>>, %arg10: memref<3x128xf32, #tpu.memory_space<vmem>>, %arg11: memref<2x128x128xf32, #tpu.memory_space<vmem>>, %arg12: memref<5x1x128xf32, #tpu.memory_space<vmem>>, %arg13: memref<2x128x128xf32, #tpu.memory_space<vmem>>, %arg14: memref<2x1x128xf32, #tpu.memory_space<vmem>>, %arg15: memref<128x128xf32, #tpu.memory_space<vmem>>, %arg16: memref<1x128xf32, #tpu.memory_space<vmem>>, %arg17: memref<1x9x128x128xf32, #tpu.memory_space<vmem>>, %arg18: memref<1x10x1x128xf32, #tpu.memory_space<vmem>>, %arg19: memref<64x128xf32, #tpu.memory_space<vmem>>, %arg20: memref<64x128xf32, #tpu.memory_space<vmem>>, %arg21: memref<128x128xf32, #tpu.memory_space<vmem>>) attributes {dimension_semantics = [#tpu.dimension_semantics<arbitrary>], iteration_bounds = array<i64: 2>, scalar_prefetch = 0 : i64, scratch_operands = 2 : i64, tpu.core_type = #tpu.core_type<tc>, window_params = [{pipeline_mode = #tpu.pipeline_mode<synchronous>, transform_indices = @transform_0, window_bounds = array<i64: 64, 128>}, {pipeline_mode = #tpu.pipeline_mode<synchronous>, transform_indices = @transform_1, window_bounds = array<i64: 64, 14>}, {pipeline_mode = #tpu.pipeline_mode<synchronous>, transform_indices = @transform_2, window_bounds = array<i64: 128, 3>}, {pipeline_mode = #tpu.pipeline_mode<synchronous>, transform_indices = @transform_3, window_bounds = array<i64: 128, 64>}, {pipeline_mode = #tpu.pipeline_mode<synchronous>, transform_indices = @transform_4, window_bounds = array<i64: 128, 64>}, {pipeline_mode = #tpu.pipeline_mode<synchronous>, transform_indices = @transform_5, window_bounds = array<i64: 64, 128>}, {pipeline_mode = #tpu.pipeline_mode<synchronous>, transform_indices = @transform_6, window_bounds = array<i64: 14, 128>}, {pipeline_mode = #tpu.pipeline_mode<synchronous>, transform_indices = @transform_7, window_bounds = array<i64: 2, 128, 128>}, {pipeline_mode = #tpu.pipeline_mode<synchronous>, transform_indices = @transform_8, window_bounds = array<i64: 5, 1, 128>}, {pipeline_mode = #tpu.pipeline_mode<synchronous>, transform_indices = @transform_9, window_bounds = array<i64: 3, 128>}, {pipeline_mode = #tpu.pipeline_mode<synchronous>, transform_indices = @transform_10, window_bounds = array<i64: 2, 128, 128>}, {pipeline_mode = #tpu.pipeline_mode<synchronous>, transform_indices = @transform_11, window_bounds = array<i64: 5, 1, 128>}, {pipeline_mode = #tpu.pipeline_mode<synchronous>, transform_indices = @transform_12, window_bounds = array<i64: 2, 128, 128>}, {pipeline_mode = #tpu.pipeline_mode<synchronous>, transform_indices = @transform_13, window_bounds = array<i64: 2, 1, 128>}, {pipeline_mode = #tpu.pipeline_mode<synchronous>, transform_indices = @transform_14, window_bounds = array<i64: 128, 128>}, {pipeline_mode = #tpu.pipeline_mode<synchronous>, transform_indices = @transform_15, window_bounds = array<i64: 1, 128>}, {transform_indices = @transform_16, window_bounds = array<i64: 1, 9, 128, 128>}, {transform_indices = @transform_17, window_bounds = array<i64: 1, 10, 1, 128>}, {pipeline_mode = #tpu.pipeline_mode<synchronous>, transform_indices = @transform_18, window_bounds = array<i64: 64, 128>}]} {
    %c0_i32 = arith.constant 0 : i32
    %0 = arith.cmpi eq, %arg0, %c0_i32 : i32
    %1 = arith.extui %0 : i1 to i32
    %c0_i32_0 = arith.constant 0 : i32
    %2 = arith.cmpi ne, %1, %c0_i32_0 : i32
    scf.if %2 {
      %c0_107 = arith.constant 0 : index
      %c0_108 = arith.constant 0 : index
      %134 = vector.load %arg2[%c0_107, %c0_108] : memref<64x14xf32, #tpu.memory_space<vmem>>, vector<64x14xf32>
      %c0_109 = arith.constant 0 : index
      %c0_110 = arith.constant 0 : index
      %135 = vector.load %arg7[%c0_109, %c0_110] : memref<14x128xf32, #tpu.memory_space<vmem>>, vector<14x128xf32>
      %cst_111 = arith.constant dense<0.000000e+00> : vector<64x128xf32>
      %136 = tpu.matmul %134, %135, %cst_111 {dimension_numbers = #tpu.dot_dimension_numbers<[1], [0], [0], [1], [0, 0, 1, 1], [], []>} : vector<64x14xf32>, vector<14x128xf32>, vector<64x128xf32> -> vector<64x128xf32>
      %c0_112 = arith.constant 0 : index
      %c0_113 = arith.constant 0 : index
      %137 = vector.load %arg1[%c0_112, %c0_113] : memref<64x128xf32, #tpu.memory_space<vmem>>, vector<64x128xf32>
      %138 = arith.addf %136, %137 : vector<64x128xf32>
      %c0_114 = arith.constant 0 : index
      %c0_115 = arith.constant 0 : index
      %c0_116 = arith.constant 0 : index
      %139 = vector.load %arg9[%c0_114, %c0_115, %c0_116] : memref<5x1x128xf32, #tpu.memory_space<vmem>>, vector<1x1x128xf32>
      %140 = vector.shape_cast %139 : vector<1x1x128xf32> to vector<1x128xf32>
      %141 = vector.broadcast %140 : vector<1x128xf32> to vector<64x128xf32>
      %142 = arith.addf %138, %141 : vector<64x128xf32>
      %cst_117 = arith.constant 0.000000e+00 : f32
      %143 = vector.broadcast %cst_117 : f32 to vector<64x128xf32>
      %144 = arith.maximumf %142, %143 : vector<64x128xf32>
      %c0_118 = arith.constant 0 : index
      %c0_119 = arith.constant 0 : index
      %c0_120 = arith.constant 0 : index
      %145 = vector.load %arg8[%c0_118, %c0_119, %c0_120] : memref<2x128x128xf32, #tpu.memory_space<vmem>>, vector<1x128x128xf32>
      %146 = vector.shape_cast %145 : vector<1x128x128xf32> to vector<128x128xf32>
      %cst_121 = arith.constant dense<0.000000e+00> : vector<64x128xf32>
      %147 = tpu.matmul %144, %146, %cst_121 {dimension_numbers = #tpu.dot_dimension_numbers<[1], [0], [0], [1], [0, 0, 1, 1], [], []>} : vector<64x128xf32>, vector<128x128xf32>, vector<64x128xf32> -> vector<64x128xf32>
      %c1_122 = arith.constant 1 : index
      %c0_123 = arith.constant 0 : index
      %c0_124 = arith.constant 0 : index
      %148 = vector.load %arg9[%c1_122, %c0_123, %c0_124] : memref<5x1x128xf32, #tpu.memory_space<vmem>>, vector<1x1x128xf32>
      %149 = vector.shape_cast %148 : vector<1x1x128xf32> to vector<1x128xf32>
      %150 = vector.broadcast %149 : vector<1x128xf32> to vector<64x128xf32>
      %151 = arith.addf %147, %150 : vector<64x128xf32>
      %cst_125 = arith.constant 0.000000e+00 : f32
      %152 = vector.broadcast %cst_125 : f32 to vector<64x128xf32>
      %153 = arith.maximumf %151, %152 : vector<64x128xf32>
      %c1_126 = arith.constant 1 : index
      %c0_127 = arith.constant 0 : index
      %c0_128 = arith.constant 0 : index
      %154 = vector.load %arg8[%c1_126, %c0_127, %c0_128] : memref<2x128x128xf32, #tpu.memory_space<vmem>>, vector<1x128x128xf32>
      %155 = vector.shape_cast %154 : vector<1x128x128xf32> to vector<128x128xf32>
      %cst_129 = arith.constant dense<0.000000e+00> : vector<64x128xf32>
      %156 = tpu.matmul %153, %155, %cst_129 {dimension_numbers = #tpu.dot_dimension_numbers<[1], [0], [0], [1], [0, 0, 1, 1], [], []>} : vector<64x128xf32>, vector<128x128xf32>, vector<64x128xf32> -> vector<64x128xf32>
      %c2_130 = arith.constant 2 : index
      %c0_131 = arith.constant 0 : index
      %c0_132 = arith.constant 0 : index
      %157 = vector.load %arg9[%c2_130, %c0_131, %c0_132] : memref<5x1x128xf32, #tpu.memory_space<vmem>>, vector<1x1x128xf32>
      %158 = vector.shape_cast %157 : vector<1x1x128xf32> to vector<1x128xf32>
      %159 = vector.broadcast %158 : vector<1x128xf32> to vector<64x128xf32>
      %160 = arith.addf %156, %159 : vector<64x128xf32>
      %c3_133 = arith.constant 3 : index
      %c0_134 = arith.constant 0 : index
      %c0_135 = arith.constant 0 : index
      %161 = vector.load %arg9[%c3_133, %c0_134, %c0_135] : memref<5x1x128xf32, #tpu.memory_space<vmem>>, vector<1x1x128xf32>
      %162 = vector.shape_cast %161 : vector<1x1x128xf32> to vector<1x128xf32>
      %c4_136 = arith.constant 4 : index
      %c0_137 = arith.constant 0 : index
      %c0_138 = arith.constant 0 : index
      %163 = vector.load %arg9[%c4_136, %c0_137, %c0_138] : memref<5x1x128xf32, #tpu.memory_space<vmem>>, vector<1x1x128xf32>
      %164 = vector.shape_cast %163 : vector<1x1x128xf32> to vector<1x128xf32>
      %cst_139 = arith.constant dense<0.000000e+00> : vector<64xf32>
      %165 = vector.multi_reduction <add>, %160, %cst_139 [1] : vector<64x128xf32> to vector<64xf32>
      %166 = vector.shape_cast %165 : vector<64xf32> to vector<64x1xf32>
      %cst_140 = arith.constant 1.280000e+02 : f32
      %167 = vector.broadcast %cst_140 : f32 to vector<64x1xf32>
      %168 = arith.divf %166, %167 : vector<64x1xf32>
      %169 = vector.broadcast %168 : vector<64x1xf32> to vector<64x128xf32>
      %170 = arith.subf %160, %169 : vector<64x128xf32>
      %171 = arith.mulf %170, %170 : vector<64x128xf32>
      %cst_141 = arith.constant dense<0.000000e+00> : vector<64xf32>
      %172 = vector.multi_reduction <add>, %171, %cst_141 [1] : vector<64x128xf32> to vector<64xf32>
      %173 = vector.shape_cast %172 : vector<64xf32> to vector<64x1xf32>
      %cst_142 = arith.constant 1.280000e+02 : f32
      %174 = vector.broadcast %cst_142 : f32 to vector<64x1xf32>
      %175 = arith.divf %173, %174 : vector<64x1xf32>
      %176 = vector.broadcast %168 : vector<64x1xf32> to vector<64x128xf32>
      %177 = arith.subf %160, %176 : vector<64x128xf32>
      %cst_143 = arith.constant 9.99999974E-6 : f32
      %178 = vector.broadcast %cst_143 : f32 to vector<64x1xf32>
      %179 = arith.addf %175, %178 : vector<64x1xf32>
      %180 = math.rsqrt %179 : vector<64x1xf32>
      %181 = vector.broadcast %180 : vector<64x1xf32> to vector<64x128xf32>
      %182 = arith.mulf %177, %181 : vector<64x128xf32>
      %183 = vector.broadcast %162 : vector<1x128xf32> to vector<64x128xf32>
      %184 = arith.mulf %182, %183 : vector<64x128xf32>
      %185 = vector.broadcast %164 : vector<1x128xf32> to vector<64x128xf32>
      %186 = arith.addf %184, %185 : vector<64x128xf32>
      %c0_144 = arith.constant 0 : index
      %c0_145 = arith.constant 0 : index
      %187 = vector.load %arg20[%c0_144, %c0_145] : memref<64x128xf32, #tpu.memory_space<vmem>>, vector<64x128xf32>
      tpu.vector_store %arg20[%c0_144, %c0_145], %186 {strides = array<i32>} : memref<64x128xf32, #tpu.memory_space<vmem>>, vector<64x128xf32>,
      %c0_146 = arith.constant 0 : index
      %c0_147 = arith.constant 0 : index
      %188 = vector.load %arg3[%c0_146, %c0_147] : memref<128x3xf32, #tpu.memory_space<vmem>>, vector<128x3xf32>
      %c0_148 = arith.constant 0 : index
      %c0_149 = arith.constant 0 : index
      %189 = vector.load %arg10[%c0_148, %c0_149] : memref<3x128xf32, #tpu.memory_space<vmem>>, vector<3x128xf32>
      %cst_150 = arith.constant dense<0.000000e+00> : vector<128x128xf32>
      %190 = tpu.matmul %188, %189, %cst_150 {dimension_numbers = #tpu.dot_dimension_numbers<[1], [0], [0], [1], [0, 0, 1, 1], [], []>} : vector<128x3xf32>, vector<3x128xf32>, vector<128x128xf32> -> vector<128x128xf32>
      %c0_151 = arith.constant 0 : index
      %c0_152 = arith.constant 0 : index
      %c0_153 = arith.constant 0 : index
      %191 = vector.load %arg12[%c0_151, %c0_152, %c0_153] : memref<5x1x128xf32, #tpu.memory_space<vmem>>, vector<1x1x128xf32>
      %192 = vector.shape_cast %191 : vector<1x1x128xf32> to vector<1x128xf32>
      %193 = vector.broadcast %192 : vector<1x128xf32> to vector<128x128xf32>
      %194 = arith.addf %190, %193 : vector<128x128xf32>
      %cst_154 = arith.constant 0.000000e+00 : f32
      %195 = vector.broadcast %cst_154 : f32 to vector<128x128xf32>
      %196 = arith.maximumf %194, %195 : vector<128x128xf32>
      %c0_155 = arith.constant 0 : index
      %c0_156 = arith.constant 0 : index
      %c0_157 = arith.constant 0 : index
      %197 = vector.load %arg11[%c0_155, %c0_156, %c0_157] : memref<2x128x128xf32, #tpu.memory_space<vmem>>, vector<1x128x128xf32>
      %198 = vector.shape_cast %197 : vector<1x128x128xf32> to vector<128x128xf32>
      %cst_158 = arith.constant dense<0.000000e+00> : vector<128x128xf32>
      %199 = tpu.matmul %196, %198, %cst_158 {dimension_numbers = #tpu.dot_dimension_numbers<[1], [0], [0], [1], [0, 0, 1, 1], [], []>} : vector<128x128xf32>, vector<128x128xf32>, vector<128x128xf32> -> vector<128x128xf32>
      %c1_159 = arith.constant 1 : index
      %c0_160 = arith.constant 0 : index
      %c0_161 = arith.constant 0 : index
      %200 = vector.load %arg12[%c1_159, %c0_160, %c0_161] : memref<5x1x128xf32, #tpu.memory_space<vmem>>, vector<1x1x128xf32>
      %201 = vector.shape_cast %200 : vector<1x1x128xf32> to vector<1x128xf32>
      %202 = vector.broadcast %201 : vector<1x128xf32> to vector<128x128xf32>
      %203 = arith.addf %199, %202 : vector<128x128xf32>
      %cst_162 = arith.constant 0.000000e+00 : f32
      %204 = vector.broadcast %cst_162 : f32 to vector<128x128xf32>
      %205 = arith.maximumf %203, %204 : vector<128x128xf32>
      %c1_163 = arith.constant 1 : index
      %c0_164 = arith.constant 0 : index
      %c0_165 = arith.constant 0 : index
      %206 = vector.load %arg11[%c1_163, %c0_164, %c0_165] : memref<2x128x128xf32, #tpu.memory_space<vmem>>, vector<1x128x128xf32>
      %207 = vector.shape_cast %206 : vector<1x128x128xf32> to vector<128x128xf32>
      %cst_166 = arith.constant dense<0.000000e+00> : vector<128x128xf32>
      %208 = tpu.matmul %205, %207, %cst_166 {dimension_numbers = #tpu.dot_dimension_numbers<[1], [0], [0], [1], [0, 0, 1, 1], [], []>} : vector<128x128xf32>, vector<128x128xf32>, vector<128x128xf32> -> vector<128x128xf32>
      %c2_167 = arith.constant 2 : index
      %c0_168 = arith.constant 0 : index
      %c0_169 = arith.constant 0 : index
      %209 = vector.load %arg12[%c2_167, %c0_168, %c0_169] : memref<5x1x128xf32, #tpu.memory_space<vmem>>, vector<1x1x128xf32>
      %210 = vector.shape_cast %209 : vector<1x1x128xf32> to vector<1x128xf32>
      %211 = vector.broadcast %210 : vector<1x128xf32> to vector<128x128xf32>
      %212 = arith.addf %208, %211 : vector<128x128xf32>
      %c3_170 = arith.constant 3 : index
      %c0_171 = arith.constant 0 : index
      %c0_172 = arith.constant 0 : index
      %213 = vector.load %arg12[%c3_170, %c0_171, %c0_172] : memref<5x1x128xf32, #tpu.memory_space<vmem>>, vector<1x1x128xf32>
      %214 = vector.shape_cast %213 : vector<1x1x128xf32> to vector<1x128xf32>
      %c4_173 = arith.constant 4 : index
      %c0_174 = arith.constant 0 : index
      %c0_175 = arith.constant 0 : index
      %215 = vector.load %arg12[%c4_173, %c0_174, %c0_175] : memref<5x1x128xf32, #tpu.memory_space<vmem>>, vector<1x1x128xf32>
      %216 = vector.shape_cast %215 : vector<1x1x128xf32> to vector<1x128xf32>
      %cst_176 = arith.constant dense<0.000000e+00> : vector<128xf32>
      %217 = vector.multi_reduction <add>, %212, %cst_176 [1] : vector<128x128xf32> to vector<128xf32>
      %218 = vector.shape_cast %217 : vector<128xf32> to vector<128x1xf32>
      %cst_177 = arith.constant 1.280000e+02 : f32
      %219 = vector.broadcast %cst_177 : f32 to vector<128x1xf32>
      %220 = arith.divf %218, %219 : vector<128x1xf32>
      %221 = vector.broadcast %220 : vector<128x1xf32> to vector<128x128xf32>
      %222 = arith.subf %212, %221 : vector<128x128xf32>
      %223 = arith.mulf %222, %222 : vector<128x128xf32>
      %cst_178 = arith.constant dense<0.000000e+00> : vector<128xf32>
      %224 = vector.multi_reduction <add>, %223, %cst_178 [1] : vector<128x128xf32> to vector<128xf32>
      %225 = vector.shape_cast %224 : vector<128xf32> to vector<128x1xf32>
      %cst_179 = arith.constant 1.280000e+02 : f32
      %226 = vector.broadcast %cst_179 : f32 to vector<128x1xf32>
      %227 = arith.divf %225, %226 : vector<128x1xf32>
      %228 = vector.broadcast %220 : vector<128x1xf32> to vector<128x128xf32>
      %229 = arith.subf %212, %228 : vector<128x128xf32>
      %cst_180 = arith.constant 9.99999974E-6 : f32
      %230 = vector.broadcast %cst_180 : f32 to vector<128x1xf32>
      %231 = arith.addf %227, %230 : vector<128x1xf32>
      %232 = math.rsqrt %231 : vector<128x1xf32>
      %233 = vector.broadcast %232 : vector<128x1xf32> to vector<128x128xf32>
      %234 = arith.mulf %229, %233 : vector<128x128xf32>
      %235 = vector.broadcast %214 : vector<1x128xf32> to vector<128x128xf32>
      %236 = arith.mulf %234, %235 : vector<128x128xf32>
      %237 = vector.broadcast %216 : vector<1x128xf32> to vector<128x128xf32>
      %238 = arith.addf %236, %237 : vector<128x128xf32>
      %c0_181 = arith.constant 0 : index
      %c0_182 = arith.constant 0 : index
      %239 = vector.load %arg21[%c0_181, %c0_182] : memref<128x128xf32, #tpu.memory_space<vmem>>, vector<128x128xf32>
      tpu.vector_store %arg21[%c0_181, %c0_182], %238 {strides = array<i32>} : memref<128x128xf32, #tpu.memory_space<vmem>>, vector<128x128xf32>,
    } else {
    }
    %c0 = arith.constant 0 : index
    %c0_1 = arith.constant 0 : index
    %3 = vector.load %arg20[%c0, %c0_1] : memref<64x128xf32, #tpu.memory_space<vmem>>, vector<64x128xf32>
    %c0_2 = arith.constant 0 : index
    %c0_3 = arith.constant 0 : index
    %4 = vector.load %arg21[%c0_2, %c0_3] : memref<128x128xf32, #tpu.memory_space<vmem>>, vector<128x128xf32>
    %5 = arith.truncf %3 : vector<64x128xf32> to vector<64x128xbf16>
    %c0_4 = arith.constant 0 : index
    %c0_5 = arith.constant 0 : index
    %6 = vector.load %arg4[%c0_4, %c0_5] : memref<128x64xbf16, #tpu.memory_space<vmem>>, vector<128x64xbf16>
    %cst = arith.constant dense<0.000000e+00> : vector<128x128xf32>
    %7 = tpu.matmul %6, %5, %cst {dimension_numbers = #tpu.dot_dimension_numbers<[1], [0], [0], [1], [0, 0, 1, 1], [], []>} : vector<128x64xbf16>, vector<64x128xbf16>, vector<128x128xf32> -> vector<128x128xf32>
    %c0_6 = arith.constant 0 : index
    %c0_7 = arith.constant 0 : index
    %8 = vector.load %arg5[%c0_6, %c0_7] : memref<128x64xbf16, #tpu.memory_space<vmem>>, vector<128x64xbf16>
    %cst_8 = arith.constant dense<0.000000e+00> : vector<128x128xf32>
    %9 = tpu.matmul %8, %5, %cst_8 {dimension_numbers = #tpu.dot_dimension_numbers<[1], [0], [0], [1], [0, 0, 1, 1], [], []>} : vector<128x64xbf16>, vector<64x128xbf16>, vector<128x128xf32> -> vector<128x128xf32>
    %c0_9 = arith.constant 0 : index
    %c0_10 = arith.constant 0 : index
    %c0_11 = arith.constant 0 : index
    %c0_12 = arith.constant 0 : index
    %10 = vector.load %arg17[%c0_9, %c0_10, %c0_11, %c0_12] : memref<1x9x128x128xf32, #tpu.memory_space<vmem>>, vector<1x1x128x128xf32>
    %11 = vector.shape_cast %10 : vector<1x1x128x128xf32> to vector<128x128xf32>
    %cst_13 = arith.constant dense<0.000000e+00> : vector<128x128xf32>
    %12 = tpu.matmul %9, %11, %cst_13 {dimension_numbers = #tpu.dot_dimension_numbers<[1], [0], [0], [1], [0, 0, 1, 1], [], []>} : vector<128x128xf32>, vector<128x128xf32>, vector<128x128xf32> -> vector<128x128xf32>
    %c0_14 = arith.constant 0 : index
    %c1 = arith.constant 1 : index
    %c0_15 = arith.constant 0 : index
    %c0_16 = arith.constant 0 : index
    %13 = vector.load %arg17[%c0_14, %c1, %c0_15, %c0_16] : memref<1x9x128x128xf32, #tpu.memory_space<vmem>>, vector<1x1x128x128xf32>
    %14 = vector.shape_cast %13 : vector<1x1x128x128xf32> to vector<128x128xf32>
    %cst_17 = arith.constant dense<0.000000e+00> : vector<128x128xf32>
    %15 = tpu.matmul %7, %14, %cst_17 {dimension_numbers = #tpu.dot_dimension_numbers<[1], [0], [0], [1], [0, 0, 1, 1], [], []>} : vector<128x128xf32>, vector<128x128xf32>, vector<128x128xf32> -> vector<128x128xf32>
    %16 = arith.addf %12, %15 : vector<128x128xf32>
    %c0_18 = arith.constant 0 : index
    %c2 = arith.constant 2 : index
    %c0_19 = arith.constant 0 : index
    %c0_20 = arith.constant 0 : index
    %17 = vector.load %arg17[%c0_18, %c2, %c0_19, %c0_20] : memref<1x9x128x128xf32, #tpu.memory_space<vmem>>, vector<1x1x128x128xf32>
    %18 = vector.shape_cast %17 : vector<1x1x128x128xf32> to vector<128x128xf32>
    %cst_21 = arith.constant dense<0.000000e+00> : vector<128x128xf32>
    %19 = tpu.matmul %4, %18, %cst_21 {dimension_numbers = #tpu.dot_dimension_numbers<[1], [0], [0], [1], [0, 0, 1, 1], [], []>} : vector<128x128xf32>, vector<128x128xf32>, vector<128x128xf32> -> vector<128x128xf32>
    %20 = arith.addf %16, %19 : vector<128x128xf32>
    %c0_22 = arith.constant 0 : index
    %c0_23 = arith.constant 0 : index
    %c0_24 = arith.constant 0 : index
    %c0_25 = arith.constant 0 : index
    %21 = vector.load %arg18[%c0_22, %c0_23, %c0_24, %c0_25] : memref<1x10x1x128xf32, #tpu.memory_space<vmem>>, vector<1x1x1x128xf32>
    %22 = vector.shape_cast %21 : vector<1x1x1x128xf32> to vector<1x128xf32>
    %23 = vector.broadcast %22 : vector<1x128xf32> to vector<128x128xf32>
    %24 = arith.addf %20, %23 : vector<128x128xf32>
    %cst_26 = arith.constant 0.000000e+00 : f32
    %25 = vector.broadcast %cst_26 : f32 to vector<128x128xf32>
    %26 = arith.maximumf %24, %25 : vector<128x128xf32>
    %c0_27 = arith.constant 0 : index
    %c3 = arith.constant 3 : index
    %c0_28 = arith.constant 0 : index
    %c0_29 = arith.constant 0 : index
    %27 = vector.load %arg17[%c0_27, %c3, %c0_28, %c0_29] : memref<1x9x128x128xf32, #tpu.memory_space<vmem>>, vector<1x1x128x128xf32>
    %28 = vector.shape_cast %27 : vector<1x1x128x128xf32> to vector<128x128xf32>
    %cst_30 = arith.constant dense<0.000000e+00> : vector<128x128xf32>
    %29 = tpu.matmul %26, %28, %cst_30 {dimension_numbers = #tpu.dot_dimension_numbers<[1], [0], [0], [1], [0, 0, 1, 1], [], []>} : vector<128x128xf32>, vector<128x128xf32>, vector<128x128xf32> -> vector<128x128xf32>
    %c0_31 = arith.constant 0 : index
    %c1_32 = arith.constant 1 : index
    %c0_33 = arith.constant 0 : index
    %c0_34 = arith.constant 0 : index
    %30 = vector.load %arg18[%c0_31, %c1_32, %c0_33, %c0_34] : memref<1x10x1x128xf32, #tpu.memory_space<vmem>>, vector<1x1x1x128xf32>
    %31 = vector.shape_cast %30 : vector<1x1x1x128xf32> to vector<1x128xf32>
    %32 = vector.broadcast %31 : vector<1x128xf32> to vector<128x128xf32>
    %33 = arith.addf %29, %32 : vector<128x128xf32>
    %cst_35 = arith.constant 0.000000e+00 : f32
    %34 = vector.broadcast %cst_35 : f32 to vector<128x128xf32>
    %35 = arith.maximumf %33, %34 : vector<128x128xf32>
    %c0_36 = arith.constant 0 : index
    %c4 = arith.constant 4 : index
    %c0_37 = arith.constant 0 : index
    %c0_38 = arith.constant 0 : index
    %36 = vector.load %arg17[%c0_36, %c4, %c0_37, %c0_38] : memref<1x9x128x128xf32, #tpu.memory_space<vmem>>, vector<1x1x128x128xf32>
    %37 = vector.shape_cast %36 : vector<1x1x128x128xf32> to vector<128x128xf32>
    %cst_39 = arith.constant dense<0.000000e+00> : vector<128x128xf32>
    %38 = tpu.matmul %35, %37, %cst_39 {dimension_numbers = #tpu.dot_dimension_numbers<[1], [0], [0], [1], [0, 0, 1, 1], [], []>} : vector<128x128xf32>, vector<128x128xf32>, vector<128x128xf32> -> vector<128x128xf32>
    %c0_40 = arith.constant 0 : index
    %c2_41 = arith.constant 2 : index
    %c0_42 = arith.constant 0 : index
    %c0_43 = arith.constant 0 : index
    %39 = vector.load %arg18[%c0_40, %c2_41, %c0_42, %c0_43] : memref<1x10x1x128xf32, #tpu.memory_space<vmem>>, vector<1x1x1x128xf32>
    %40 = vector.shape_cast %39 : vector<1x1x1x128xf32> to vector<1x128xf32>
    %41 = vector.broadcast %40 : vector<1x128xf32> to vector<128x128xf32>
    %42 = arith.addf %38, %41 : vector<128x128xf32>
    %c0_44 = arith.constant 0 : index
    %c3_45 = arith.constant 3 : index
    %c0_46 = arith.constant 0 : index
    %c0_47 = arith.constant 0 : index
    %43 = vector.load %arg18[%c0_44, %c3_45, %c0_46, %c0_47] : memref<1x10x1x128xf32, #tpu.memory_space<vmem>>, vector<1x1x1x128xf32>
    %44 = vector.shape_cast %43 : vector<1x1x1x128xf32> to vector<1x128xf32>
    %c0_48 = arith.constant 0 : index
    %c4_49 = arith.constant 4 : index
    %c0_50 = arith.constant 0 : index
    %c0_51 = arith.constant 0 : index
    %45 = vector.load %arg18[%c0_48, %c4_49, %c0_50, %c0_51] : memref<1x10x1x128xf32, #tpu.memory_space<vmem>>, vector<1x1x1x128xf32>
    %46 = vector.shape_cast %45 : vector<1x1x1x128xf32> to vector<1x128xf32>
    %cst_52 = arith.constant dense<0.000000e+00> : vector<128xf32>
    %47 = vector.multi_reduction <add>, %42, %cst_52 [1] : vector<128x128xf32> to vector<128xf32>
    %48 = vector.shape_cast %47 : vector<128xf32> to vector<128x1xf32>
    %cst_53 = arith.constant 1.280000e+02 : f32
    %49 = vector.broadcast %cst_53 : f32 to vector<128x1xf32>
    %50 = arith.divf %48, %49 : vector<128x1xf32>
    %51 = vector.broadcast %50 : vector<128x1xf32> to vector<128x128xf32>
    %52 = arith.subf %42, %51 : vector<128x128xf32>
    %53 = arith.mulf %52, %52 : vector<128x128xf32>
    %cst_54 = arith.constant dense<0.000000e+00> : vector<128xf32>
    %54 = vector.multi_reduction <add>, %53, %cst_54 [1] : vector<128x128xf32> to vector<128xf32>
    %55 = vector.shape_cast %54 : vector<128xf32> to vector<128x1xf32>
    %cst_55 = arith.constant 1.280000e+02 : f32
    %56 = vector.broadcast %cst_55 : f32 to vector<128x1xf32>
    %57 = arith.divf %55, %56 : vector<128x1xf32>
    %58 = vector.broadcast %50 : vector<128x1xf32> to vector<128x128xf32>
    %59 = arith.subf %42, %58 : vector<128x128xf32>
    %cst_56 = arith.constant 9.99999974E-6 : f32
    %60 = vector.broadcast %cst_56 : f32 to vector<128x1xf32>
    %61 = arith.addf %57, %60 : vector<128x1xf32>
    %62 = math.rsqrt %61 : vector<128x1xf32>
    %63 = vector.broadcast %62 : vector<128x1xf32> to vector<128x128xf32>
    %64 = arith.mulf %59, %63 : vector<128x128xf32>
    %65 = vector.broadcast %44 : vector<1x128xf32> to vector<128x128xf32>
    %66 = arith.mulf %64, %65 : vector<128x128xf32>
    %67 = vector.broadcast %46 : vector<1x128xf32> to vector<128x128xf32>
    %68 = arith.addf %66, %67 : vector<128x128xf32>
    %c0_57 = arith.constant 0 : index
    %c0_58 = arith.constant 0 : index
    %69 = vector.load %arg6[%c0_57, %c0_58] : memref<64x128xbf16, #tpu.memory_space<vmem>>, vector<64x128xbf16>
    %70 = arith.truncf %68 : vector<128x128xf32> to vector<128x128xbf16>
    %cst_59 = arith.constant dense<0.000000e+00> : vector<64x128xf32>
    %71 = tpu.matmul %69, %70, %cst_59 {dimension_numbers = #tpu.dot_dimension_numbers<[1], [0], [0], [1], [0, 0, 1, 1], [], []>} : vector<64x128xbf16>, vector<128x128xbf16>, vector<64x128xf32> -> vector<64x128xf32>
    %c0_60 = arith.constant 0 : index
    %c5 = arith.constant 5 : index
    %c0_61 = arith.constant 0 : index
    %c0_62 = arith.constant 0 : index
    %72 = vector.load %arg17[%c0_60, %c5, %c0_61, %c0_62] : memref<1x9x128x128xf32, #tpu.memory_space<vmem>>, vector<1x1x128x128xf32>
    %73 = vector.shape_cast %72 : vector<1x1x128x128xf32> to vector<128x128xf32>
    %cst_63 = arith.constant dense<0.000000e+00> : vector<64x128xf32>
    %74 = tpu.matmul %3, %73, %cst_63 {dimension_numbers = #tpu.dot_dimension_numbers<[1], [0], [0], [1], [0, 0, 1, 1], [], []>} : vector<64x128xf32>, vector<128x128xf32>, vector<64x128xf32> -> vector<64x128xf32>
    %c0_64 = arith.constant 0 : index
    %c6 = arith.constant 6 : index
    %c0_65 = arith.constant 0 : index
    %c0_66 = arith.constant 0 : index
    %75 = vector.load %arg17[%c0_64, %c6, %c0_65, %c0_66] : memref<1x9x128x128xf32, #tpu.memory_space<vmem>>, vector<1x1x128x128xf32>
    %76 = vector.shape_cast %75 : vector<1x1x128x128xf32> to vector<128x128xf32>
    %cst_67 = arith.constant dense<0.000000e+00> : vector<64x128xf32>
    %77 = tpu.matmul %71, %76, %cst_67 {dimension_numbers = #tpu.dot_dimension_numbers<[1], [0], [0], [1], [0, 0, 1, 1], [], []>} : vector<64x128xf32>, vector<128x128xf32>, vector<64x128xf32> -> vector<64x128xf32>
    %78 = arith.addf %74, %77 : vector<64x128xf32>
    %c0_68 = arith.constant 0 : index
    %c5_69 = arith.constant 5 : index
    %c0_70 = arith.constant 0 : index
    %c0_71 = arith.constant 0 : index
    %79 = vector.load %arg18[%c0_68, %c5_69, %c0_70, %c0_71] : memref<1x10x1x128xf32, #tpu.memory_space<vmem>>, vector<1x1x1x128xf32>
    %80 = vector.shape_cast %79 : vector<1x1x1x128xf32> to vector<1x128xf32>
    %81 = vector.broadcast %80 : vector<1x128xf32> to vector<64x128xf32>
    %82 = arith.addf %78, %81 : vector<64x128xf32>
    %cst_72 = arith.constant 0.000000e+00 : f32
    %83 = vector.broadcast %cst_72 : f32 to vector<64x128xf32>
    %84 = arith.maximumf %82, %83 : vector<64x128xf32>
    %c0_73 = arith.constant 0 : index
    %c7 = arith.constant 7 : index
    %c0_74 = arith.constant 0 : index
    %c0_75 = arith.constant 0 : index
    %85 = vector.load %arg17[%c0_73, %c7, %c0_74, %c0_75] : memref<1x9x128x128xf32, #tpu.memory_space<vmem>>, vector<1x1x128x128xf32>
    %86 = vector.shape_cast %85 : vector<1x1x128x128xf32> to vector<128x128xf32>
    %cst_76 = arith.constant dense<0.000000e+00> : vector<64x128xf32>
    %87 = tpu.matmul %84, %86, %cst_76 {dimension_numbers = #tpu.dot_dimension_numbers<[1], [0], [0], [1], [0, 0, 1, 1], [], []>} : vector<64x128xf32>, vector<128x128xf32>, vector<64x128xf32> -> vector<64x128xf32>
    %c0_77 = arith.constant 0 : index
    %c6_78 = arith.constant 6 : index
    %c0_79 = arith.constant 0 : index
    %c0_80 = arith.constant 0 : index
    %88 = vector.load %arg18[%c0_77, %c6_78, %c0_79, %c0_80] : memref<1x10x1x128xf32, #tpu.memory_space<vmem>>, vector<1x1x1x128xf32>
    %89 = vector.shape_cast %88 : vector<1x1x1x128xf32> to vector<1x128xf32>
    %90 = vector.broadcast %89 : vector<1x128xf32> to vector<64x128xf32>
    %91 = arith.addf %87, %90 : vector<64x128xf32>
    %cst_81 = arith.constant 0.000000e+00 : f32
    %92 = vector.broadcast %cst_81 : f32 to vector<64x128xf32>
    %93 = arith.maximumf %91, %92 : vector<64x128xf32>
    %c0_82 = arith.constant 0 : index
    %c8 = arith.constant 8 : index
    %c0_83 = arith.constant 0 : index
    %c0_84 = arith.constant 0 : index
    %94 = vector.load %arg17[%c0_82, %c8, %c0_83, %c0_84] : memref<1x9x128x128xf32, #tpu.memory_space<vmem>>, vector<1x1x128x128xf32>
    %95 = vector.shape_cast %94 : vector<1x1x128x128xf32> to vector<128x128xf32>
    %cst_85 = arith.constant dense<0.000000e+00> : vector<64x128xf32>
    %96 = tpu.matmul %93, %95, %cst_85 {dimension_numbers = #tpu.dot_dimension_numbers<[1], [0], [0], [1], [0, 0, 1, 1], [], []>} : vector<64x128xf32>, vector<128x128xf32>, vector<64x128xf32> -> vector<64x128xf32>
    %c0_86 = arith.constant 0 : index
    %c7_87 = arith.constant 7 : index
    %c0_88 = arith.constant 0 : index
    %c0_89 = arith.constant 0 : index
    %97 = vector.load %arg18[%c0_86, %c7_87, %c0_88, %c0_89] : memref<1x10x1x128xf32, #tpu.memory_space<vmem>>, vector<1x1x1x128xf32>
    %98 = vector.shape_cast %97 : vector<1x1x1x128xf32> to vector<1x128xf32>
    %99 = vector.broadcast %98 : vector<1x128xf32> to vector<64x128xf32>
    %100 = arith.addf %96, %99 : vector<64x128xf32>
    %c0_90 = arith.constant 0 : index
    %c8_91 = arith.constant 8 : index
    %c0_92 = arith.constant 0 : index
    %c0_93 = arith.constant 0 : index
    %101 = vector.load %arg18[%c0_90, %c8_91, %c0_92, %c0_93] : memref<1x10x1x128xf32, #tpu.memory_space<vmem>>, vector<1x1x1x128xf32>
    %102 = vector.shape_cast %101 : vector<1x1x1x128xf32> to vector<1x128xf32>
    %c0_94 = arith.constant 0 : index
    %c9 = arith.constant 9 : index
    %c0_95 = arith.constant 0 : index
    %c0_96 = arith.constant 0 : index
    %103 = vector.load %arg18[%c0_94, %c9, %c0_95, %c0_96] : memref<1x10x1x128xf32, #tpu.memory_space<vmem>>, vector<1x1x1x128xf32>
    %104 = vector.shape_cast %103 : vector<1x1x1x128xf32> to vector<1x128xf32>
    %cst_97 = arith.constant dense<0.000000e+00> : vector<64xf32>
    %105 = vector.multi_reduction <add>, %100, %cst_97 [1] : vector<64x128xf32> to vector<64xf32>
    %106 = vector.shape_cast %105 : vector<64xf32> to vector<64x1xf32>
    %cst_98 = arith.constant 1.280000e+02 : f32
    %107 = vector.broadcast %cst_98 : f32 to vector<64x1xf32>
    %108 = arith.divf %106, %107 : vector<64x1xf32>
    %109 = vector.broadcast %108 : vector<64x1xf32> to vector<64x128xf32>
    %110 = arith.subf %100, %109 : vector<64x128xf32>
    %111 = arith.mulf %110, %110 : vector<64x128xf32>
    %cst_99 = arith.constant dense<0.000000e+00> : vector<64xf32>
    %112 = vector.multi_reduction <add>, %111, %cst_99 [1] : vector<64x128xf32> to vector<64xf32>
    %113 = vector.shape_cast %112 : vector<64xf32> to vector<64x1xf32>
    %cst_100 = arith.constant 1.280000e+02 : f32
    %114 = vector.broadcast %cst_100 : f32 to vector<64x1xf32>
    %115 = arith.divf %113, %114 : vector<64x1xf32>
    %116 = vector.broadcast %108 : vector<64x1xf32> to vector<64x128xf32>
    %117 = arith.subf %100, %116 : vector<64x128xf32>
    %cst_101 = arith.constant 9.99999974E-6 : f32
    %118 = vector.broadcast %cst_101 : f32 to vector<64x1xf32>
    %119 = arith.addf %115, %118 : vector<64x1xf32>
    %120 = math.rsqrt %119 : vector<64x1xf32>
    %121 = vector.broadcast %120 : vector<64x1xf32> to vector<64x128xf32>
    %122 = arith.mulf %117, %121 : vector<64x128xf32>
    %123 = vector.broadcast %102 : vector<1x128xf32> to vector<64x128xf32>
    %124 = arith.mulf %122, %123 : vector<64x128xf32>
    %125 = vector.broadcast %104 : vector<1x128xf32> to vector<64x128xf32>
    %126 = arith.addf %124, %125 : vector<64x128xf32>
    %127 = arith.addf %3, %126 : vector<64x128xf32>
    %c0_102 = arith.constant 0 : index
    %c0_103 = arith.constant 0 : index
    %128 = vector.load %arg20[%c0_102, %c0_103] : memref<64x128xf32, #tpu.memory_space<vmem>>, vector<64x128xf32>
    tpu.vector_store %arg20[%c0_102, %c0_103], %127 {strides = array<i32>} : memref<64x128xf32, #tpu.memory_space<vmem>>, vector<64x128xf32>,
    %129 = arith.addf %4, %68 : vector<128x128xf32>
    %c0_104 = arith.constant 0 : index
    %c0_105 = arith.constant 0 : index
    %130 = vector.load %arg21[%c0_104, %c0_105] : memref<128x128xf32, #tpu.memory_space<vmem>>, vector<128x128xf32>
    tpu.vector_store %arg21[%c0_104, %c0_105], %129 {strides = array<i32>} : memref<128x128xf32, #tpu.memory_space<vmem>>, vector<128x128xf32>,
    %c1_i32 = arith.constant 1 : i32
    %131 = arith.cmpi eq, %arg0, %c1_i32 : i32
    %132 = arith.extui %131 : i1 to i32
    %c0_i32_106 = arith.constant 0 : i32
    %133 = arith.cmpi ne, %132, %c0_i32_106 : i32
    scf.if %133 {
      %c0_107 = arith.constant 0 : index
      %c0_108 = arith.constant 0 : index
      %c0_109 = arith.constant 0 : index
      %134 = vector.load %arg13[%c0_107, %c0_108, %c0_109] : memref<2x128x128xf32, #tpu.memory_space<vmem>>, vector<1x128x128xf32>
      %135 = vector.shape_cast %134 : vector<1x128x128xf32> to vector<128x128xf32>
      %cst_110 = arith.constant dense<0.000000e+00> : vector<64x128xf32>
      %136 = tpu.matmul %127, %135, %cst_110 {dimension_numbers = #tpu.dot_dimension_numbers<[1], [0], [0], [1], [0, 0, 1, 1], [], []>} : vector<64x128xf32>, vector<128x128xf32>, vector<64x128xf32> -> vector<64x128xf32>
      %c0_111 = arith.constant 0 : index
      %c0_112 = arith.constant 0 : index
      %c0_113 = arith.constant 0 : index
      %137 = vector.load %arg14[%c0_111, %c0_112, %c0_113] : memref<2x1x128xf32, #tpu.memory_space<vmem>>, vector<1x1x128xf32>
      %138 = vector.shape_cast %137 : vector<1x1x128xf32> to vector<1x128xf32>
      %139 = vector.broadcast %138 : vector<1x128xf32> to vector<64x128xf32>
      %140 = arith.addf %136, %139 : vector<64x128xf32>
      %cst_114 = arith.constant 0.000000e+00 : f32
      %141 = vector.broadcast %cst_114 : f32 to vector<64x128xf32>
      %142 = arith.maximumf %140, %141 : vector<64x128xf32>
      %c1_115 = arith.constant 1 : index
      %c0_116 = arith.constant 0 : index
      %c0_117 = arith.constant 0 : index
      %143 = vector.load %arg13[%c1_115, %c0_116, %c0_117] : memref<2x128x128xf32, #tpu.memory_space<vmem>>, vector<1x128x128xf32>
      %144 = vector.shape_cast %143 : vector<1x128x128xf32> to vector<128x128xf32>
      %cst_118 = arith.constant dense<0.000000e+00> : vector<64x128xf32>
      %145 = tpu.matmul %142, %144, %cst_118 {dimension_numbers = #tpu.dot_dimension_numbers<[1], [0], [0], [1], [0, 0, 1, 1], [], []>} : vector<64x128xf32>, vector<128x128xf32>, vector<64x128xf32> -> vector<64x128xf32>
      %c1_119 = arith.constant 1 : index
      %c0_120 = arith.constant 0 : index
      %c0_121 = arith.constant 0 : index
      %146 = vector.load %arg14[%c1_119, %c0_120, %c0_121] : memref<2x1x128xf32, #tpu.memory_space<vmem>>, vector<1x1x128xf32>
      %147 = vector.shape_cast %146 : vector<1x1x128xf32> to vector<1x128xf32>
      %148 = vector.broadcast %147 : vector<1x128xf32> to vector<64x128xf32>
      %149 = arith.addf %145, %148 : vector<64x128xf32>
      %cst_122 = arith.constant 0.000000e+00 : f32
      %150 = vector.broadcast %cst_122 : f32 to vector<64x128xf32>
      %151 = arith.maximumf %149, %150 : vector<64x128xf32>
      %c0_123 = arith.constant 0 : index
      %c0_124 = arith.constant 0 : index
      %152 = vector.load %arg15[%c0_123, %c0_124] : memref<128x128xf32, #tpu.memory_space<vmem>>, vector<128x128xf32>
      %cst_125 = arith.constant dense<0.000000e+00> : vector<64x128xf32>
      %153 = tpu.matmul %151, %152, %cst_125 {dimension_numbers = #tpu.dot_dimension_numbers<[1], [0], [0], [1], [0, 0, 1, 1], [], []>} : vector<64x128xf32>, vector<128x128xf32>, vector<64x128xf32> -> vector<64x128xf32>
      %c0_126 = arith.constant 0 : index
      %c0_127 = arith.constant 0 : index
      %154 = vector.load %arg16[%c0_126, %c0_127] : memref<1x128xf32, #tpu.memory_space<vmem>>, vector<1x128xf32>
      %155 = vector.broadcast %154 : vector<1x128xf32> to vector<64x128xf32>
      %156 = arith.addf %153, %155 : vector<64x128xf32>
      %c0_128 = arith.constant 0 : index
      %c0_129 = arith.constant 0 : index
      %157 = vector.load %arg19[%c0_128, %c0_129] : memref<64x128xf32, #tpu.memory_space<vmem>>, vector<64x128xf32>
      tpu.vector_store %arg19[%c0_128, %c0_129], %156 {strides = array<i32>} : memref<64x128xf32, #tpu.memory_space<vmem>>, vector<64x128xf32>,
    } else {
    }
    return
  }
  func.func @transform_0(%arg0: i32) -> (i32, i32) {
    %c0_i32 = arith.constant 0 : i32
    %c0_i32_0 = arith.constant 0 : i32
    %c0_i32_1 = arith.constant 0 : i32
    return %c0_i32, %c0_i32_0 : i32, i32
  }
  func.func @transform_1(%arg0: i32) -> (i32, i32) {
    %c0_i32 = arith.constant 0 : i32
    %c0_i32_0 = arith.constant 0 : i32
    %c0_i32_1 = arith.constant 0 : i32
    return %c0_i32, %c0_i32_0 : i32, i32
  }
  func.func @transform_2(%arg0: i32) -> (i32, i32) {
    %c0_i32 = arith.constant 0 : i32
    %c0_i32_0 = arith.constant 0 : i32
    %c0_i32_1 = arith.constant 0 : i32
    return %c0_i32, %c0_i32_0 : i32, i32
  }
  func.func @transform_3(%arg0: i32) -> (i32, i32) {
    %c0_i32 = arith.constant 0 : i32
    %c0_i32_0 = arith.constant 0 : i32
    %c0_i32_1 = arith.constant 0 : i32
    return %c0_i32, %c0_i32_0 : i32, i32
  }
  func.func @transform_4(%arg0: i32) -> (i32, i32) {
    %c0_i32 = arith.constant 0 : i32
    %c0_i32_0 = arith.constant 0 : i32
    %c0_i32_1 = arith.constant 0 : i32
    return %c0_i32, %c0_i32_0 : i32, i32
  }
  func.func @transform_5(%arg0: i32) -> (i32, i32) {
    %c0_i32 = arith.constant 0 : i32
    %c0_i32_0 = arith.constant 0 : i32
    %c0_i32_1 = arith.constant 0 : i32
    return %c0_i32, %c0_i32_0 : i32, i32
  }
  func.func @transform_6(%arg0: i32) -> (i32, i32) {
    %c0_i32 = arith.constant 0 : i32
    %c0_i32_0 = arith.constant 0 : i32
    %c0_i32_1 = arith.constant 0 : i32
    return %c0_i32, %c0_i32_0 : i32, i32
  }
  func.func @transform_7(%arg0: i32) -> (i32, i32, i32) {
    %c0_i32 = arith.constant 0 : i32
    %c0_i32_0 = arith.constant 0 : i32
    %c0_i32_1 = arith.constant 0 : i32
    %c0_i32_2 = arith.constant 0 : i32
    return %c0_i32, %c0_i32_0, %c0_i32_1 : i32, i32, i32
  }
  func.func @transform_8(%arg0: i32) -> (i32, i32, i32) {
    %c0_i32 = arith.constant 0 : i32
    %c0_i32_0 = arith.constant 0 : i32
    %c0_i32_1 = arith.constant 0 : i32
    %c0_i32_2 = arith.constant 0 : i32
    return %c0_i32, %c0_i32_0, %c0_i32_1 : i32, i32, i32
  }
  func.func @transform_9(%arg0: i32) -> (i32, i32) {
    %c0_i32 = arith.constant 0 : i32
    %c0_i32_0 = arith.constant 0 : i32
    %c0_i32_1 = arith.constant 0 : i32
    return %c0_i32, %c0_i32_0 : i32, i32
  }
  func.func @transform_10(%arg0: i32) -> (i32, i32, i32) {
    %c0_i32 = arith.constant 0 : i32
    %c0_i32_0 = arith.constant 0 : i32
    %c0_i32_1 = arith.constant 0 : i32
    %c0_i32_2 = arith.constant 0 : i32
    return %c0_i32, %c0_i32_0, %c0_i32_1 : i32, i32, i32
  }
  func.func @transform_11(%arg0: i32) -> (i32, i32, i32) {
    %c0_i32 = arith.constant 0 : i32
    %c0_i32_0 = arith.constant 0 : i32
    %c0_i32_1 = arith.constant 0 : i32
    %c0_i32_2 = arith.constant 0 : i32
    return %c0_i32, %c0_i32_0, %c0_i32_1 : i32, i32, i32
  }
  func.func @transform_12(%arg0: i32) -> (i32, i32, i32) {
    %c0_i32 = arith.constant 0 : i32
    %c0_i32_0 = arith.constant 0 : i32
    %c0_i32_1 = arith.constant 0 : i32
    %c0_i32_2 = arith.constant 0 : i32
    return %c0_i32, %c0_i32_0, %c0_i32_1 : i32, i32, i32
  }
  func.func @transform_13(%arg0: i32) -> (i32, i32, i32) {
    %c0_i32 = arith.constant 0 : i32
    %c0_i32_0 = arith.constant 0 : i32
    %c0_i32_1 = arith.constant 0 : i32
    %c0_i32_2 = arith.constant 0 : i32
    return %c0_i32, %c0_i32_0, %c0_i32_1 : i32, i32, i32
  }
  func.func @transform_14(%arg0: i32) -> (i32, i32) {
    %c0_i32 = arith.constant 0 : i32
    %c0_i32_0 = arith.constant 0 : i32
    %c0_i32_1 = arith.constant 0 : i32
    return %c0_i32, %c0_i32_0 : i32, i32
  }
  func.func @transform_15(%arg0: i32) -> (i32, i32) {
    %c0_i32 = arith.constant 0 : i32
    %c0_i32_0 = arith.constant 0 : i32
    %c0_i32_1 = arith.constant 0 : i32
    return %c0_i32, %c0_i32_0 : i32, i32
  }
  func.func @transform_16(%arg0: i32) -> (i32, i32, i32, i32) {
    %c0_i32 = arith.constant 0 : i32
    %c0_i32_0 = arith.constant 0 : i32
    %c0_i32_1 = arith.constant 0 : i32
    %c0_i32_2 = arith.constant 0 : i32
    return %arg0, %c0_i32, %c0_i32_0, %c0_i32_1 : i32, i32, i32, i32
  }
  func.func @transform_17(%arg0: i32) -> (i32, i32, i32, i32) {
    %c0_i32 = arith.constant 0 : i32
    %c0_i32_0 = arith.constant 0 : i32
    %c0_i32_1 = arith.constant 0 : i32
    %c0_i32_2 = arith.constant 0 : i32
    return %arg0, %c0_i32, %c0_i32_0, %c0_i32_1 : i32, i32, i32, i32
  }
  func.func @transform_18(%arg0: i32) -> (i32, i32) {
    %c0_i32 = arith.constant 0 : i32
    %c0_i32_0 = arith.constant 0 : i32
    %c0_i32_1 = arith.constant 0 : i32
    return %c0_i32, %c0_i32_0 : i32, i32
  }
}

</mosaic_0001>

<bundles_post_ra>
// kernel: tpu_custom_call.1
= control target key start
LH: loop header
LB: loop body
LE: loop exit
PB: predicated region body
PF: predicated region fallthrough
CT: control target
= control target key end

     0   :  { %s9725_s0 = inlined_call_operand.hbm [shape: f32[64,128], index: 0, kind: input, shape index: {}]   ;;  %s9726_s1 = inlined_call_operand.vmem [shape: f32[64,14], index: 1, kind: input, shape index: {}]   ;;  %s9727_s2 = inlined_call_operand.vmem [shape: f32[128,3], index: 2, kind: input, shape index: {}]   ;;  %s9728_s3 = inlined_call_operand.vmem [shape: bf16[128,64], index: 3, kind: input, shape index: {}]   ;;  %s9729_s4 = inlined_call_operand.vmem [shape: bf16[128,64], index: 4, kind: input, shape index: {}]   ;;  %s9730_s5 = inlined_call_operand.hbm [shape: bf16[64,128], index: 5, kind: input, shape index: {}]   ;;  %s9731_s6 = inlined_call_operand.hbm [shape: f32[14,128], index: 6, kind: input, shape index: {}]   ;;  %s9732_s7 = inlined_call_operand.hbm [shape: f32[2,128,128], index: 7, kind: input, shape index: {}]   ;;  %s9733_s8 = inlined_call_operand.hbm [shape: f32[5,1,128], index: 8, kind: input, shape index: {}]   ;;  %s9734_s9 = inlined_call_operand.hbm [shape: f32[3,128], index: 9, kind: input, shape index: {}]   ;;  %s9735_s10 = inlined_call_operand.hbm [shape: f32[2,128,128], index: 10, kind: input, shape index: {}]   ;;  %s9736_s11 = inlined_call_operand.hbm [shape: f32[5,1,128], index: 11, kind: input, shape index: {}]   ;;  %s9737_s12 = inlined_call_operand.hbm [shape: f32[2,128,128], index: 12, kind: input, shape index: {}]   ;;  %s9738_s13 = inlined_call_operand.hbm [shape: f32[2,1,128], index: 13, kind: input, shape index: {}]   ;;  %s9739_s14 = inlined_call_operand.hbm [shape: f32[128,128], index: 14, kind: input, shape index: {}]   ;;  %s9740_s15 = inlined_call_operand.hbm [shape: f32[1,128], index: 15, kind: input, shape index: {}]   ;;  %s9741_s16 = inlined_call_operand.hbm [shape: f32[2,9,128,128], index: 16, kind: input, shape index: {}]   ;;  %s9742_s17 = inlined_call_operand.hbm [shape: f32[2,10,1,128], index: 17, kind: input, shape index: {}]   ;;  %s9743_s18 = inlined_call_operand.hbm [shape: f32[64,128], index: 18, kind: output, shape index: {}]  }
   0x1   :  { %9774 = sst [smem:[#allocation37_spill]] %s9725_s0 }
   0x2   :  { %9775 = sst [smem:[#allocation38_spill]] %s9726_s1 }
   0x3   :  { %9776 = sst [smem:[#allocation39_spill]] %s9727_s2 }
   0x4   :  { %9777 = sst [smem:[#allocation40_spill]] %s9728_s3 }
   0x5   :  { %9778 = sst [smem:[#allocation41_spill]] %s9729_s4 }
   0x6   :  { %9779 = sst [smem:[#allocation42_spill]] %s9730_s5 }
   0x7   :  { %9780 = sst [smem:[#allocation43_spill]] %s9731_s6 }
   0x8   :  { %9781 = sst [smem:[#allocation44_spill]] %s9732_s7 }
   0x9   :  { %9782 = sst [smem:[#allocation45_spill]] %s9733_s8 }
   0xa   :  { %9783 = sst [smem:[#allocation46_spill]] %s9734_s9 }
   0xb   :  { %9784 = sst [smem:[#allocation47_spill]] %s9735_s10 }
   0xc   :  { %9785 = sst [smem:[#allocation48_spill]] %s9736_s11 }
   0xd   :  { %9786 = sst [smem:[#allocation49_spill]] %s9737_s12 }
   0xe   :  { %9787 = sst [smem:[#allocation50_spill]] %s9738_s13 }
   0xf   :  { %9788 = sst [smem:[#allocation51_spill]] %s9739_s14 }
  0x10   :  { %9789 = sst [smem:[#allocation52_spill]] %s9740_s15 }
  0x11   :  { %9790 = sst [smem:[#allocation53_spill]] %s9742_s17 }
  0x12   :  { %9791 = sst [smem:[#allocation54_spill]] %s9743_s18 }
  0x13   :  { %23 = vsyncpa [#allocation5], 0 }
  0x14   :  { %24 = vsyncpa [#allocation8], 0 }
  0x15   :  { %25 = vsyncpa [#allocation11], 0 }
  0x16   :  { %26 = vsyncpa [#allocation14], 0 }
  0x17   :  { %27 = vsyncpa [#allocation17], 0 }
  0x18   :  { %28 = vsyncpa [#allocation20], 0 }
  0x19   :  { %29 = vsyncpa [#allocation23], 0 }
  0x1a   :  { %30 = vsyncpa [#allocation6], 0  ;;  %s8295_s27 = smov 0   ;;  %s8297_s28 = smov 0  }
  0x1b   :  { %s8299_s29 = smov 0   ;;  %s8301_s30 = smov 0  }
  0x1c LB: > { %s8176_s0 = smov [#allocation4]   ;;  %s8316_s1 = sadd.s32 4294967295, %s8174_s30   ;;  %s8174_s30 = sphi %s8301_s30, %s9847_s30   ;;  %s8170_s29 = sphi %s8299_s29, %s9846_s29   ;;  %s8166_s28 = sphi %s8297_s28, %s9845_s28   ;;  %s8162_s27 = sphi %s8295_s27, %s9844_s27  }
  0x1d   : > { %s462_s19 = sshll.u32 %s8176_s0, 4  ;;  %p5117_p0 = scmp.ge.s32.totalorder %s8174_s30, 1  ;;  %s8322_s19 = int_to_ptr.vmem [resolvable:$true] %s462_s19 }
  0x1e   : > { %p9757_p1 = scmp.eq.s32.totalorder %s8316_s1, 0  ;;  %p450_p2 = scmp.lt.s32.totalorder %s8174_s30, 3 }
  0x1f   : > { %s8177_s21 = smov [#allocation7]   ;;  %s8178_s23 = smov [#allocation10]  }
  0x20   : > { %p8324_p4 = pnand %p5117_p0, %p450_p2  ;;  %s487_s22 = sshll.u32 %s8177_s21, 4  ;;  %s8336_s22 = int_to_ptr.vmem [resolvable:$true] %s487_s22 }
  0x21   : > { %s8338_s24 = sshll.u32 %s8178_s23, 4  ;;  %s9795_s0 = sld [smem:[#allocation37_spill]]  ;;  %s514_s24 = int_to_ptr.vmem [resolvable:$true] %s8338_s24 }
  0x22   : > { %s9792_s20 = scalar_select %p8324_p4, 1, 0 }
  0x23   : > { %p7431_p5 = pneg %p8324_p4 }
  0x24   : > { %9793 = sst [smem:[#allocation36_spill]] %s9792_s20 }
  0x25   : > { %p8332_p6 = pnand %p7431_p5, %p9757_p1 }
  0x27   : > { %s9794_s2 = scalar_select %p8332_p6, 1, 0 }
  0x28   : > { %s7686_s18 = scalar_lea.hbm %s9795_s0, 1024  ;;  %p8348_p8 = pneg %p8332_p6 }
  0x29   : > { %p7687_p7 = scmp.ne.s32.totalorder %s9795_s0, %s7686_s18  ;;  %p7693_p11 = scmp.lt.u32.totalorder %s7686_s18, %s9795_s0 }
  0x2b   : > { %p7689_p9 = pnand %p8348_p8, %p7687_p7 }
  0x2d   : > { %p7690_p10 = pneg %p7689_p9 }
  0x2f   : > { %p7695_p12 = pnand %p7693_p11, %p7690_p10 }
  0x31   : > { %7698 = shalt.err (!%p7695_p12)
}
  0x32   : > { %s7699_s3 = scalar_lea.vmem %s8322_s19, 1024  ;;  %p7707_p5 = scmp.lt.s32.totalorder %s8322_s19, %s8322_s19 }
  0x33   : > { %p7700_p13 = scmp.ne.s32.totalorder %s8322_s19, %s7699_s3  ;;  %p7708_p3 = scmp.lt.s32.totalorder %s7699_s3, %s7699_s3 }
  0x35   : > { %p7702_p0 = pnand %p7700_p13, %p8348_p8  ;;  %p7709_p7 = por %p7708_p3, %p7707_p5 }
  0x37   : > { %p7703_p2 = pneg %p7702_p0 }
  0x39   : > { %p7710_p9 = pnand %p7709_p7, %p7703_p2 }
  0x3b   : > { %7713 = shalt.err (!%p7710_p9)
}
  0x3c   : > { %s9755_s4 = smov 128   ;;  %s9759_s18 = smov 8  }
  0x3d   : > { %7434 = dma.hbm_to_vmem [thread:$0]  (!%p8332_p6), %s9795_s0, 1024, %s8322_s19, [#allocation5], %s9755_s4, %s9755_s4, %s9759_s18  }
  0x3e   : > { %s9797_s5 = sld [smem:[#allocation42_spill]] }
  0x44   : > { %s7714_s3 = scalar_lea.hbm %s9797_s5, 512 }
  0x45   : > { %p7715_p3 = scmp.ne.s32.totalorder %s9797_s5, %s7714_s3  ;;  %p7721_p12 = scmp.lt.u32.totalorder %s7714_s3, %s9797_s5 }
  0x47   : > { %p7717_p10 = pnand %p7715_p3, %p8348_p8 }
  0x49   : > { %p7718_p11 = pneg %p7717_p10 }
  0x4b   : > { %p7723_p13 = pnand %p7721_p12, %p7718_p11 }
  0x4d   : > { %7726 = shalt.err (!%p7723_p13)
}
  0x4e   : > { %s7727_s19 = scalar_lea.vmem %s8336_s22, 512  ;;  %p7735_p7 = scmp.lt.s32.totalorder %s8336_s22, %s8336_s22 }
  0x4f   : > { %p7728_p0 = scmp.ne.s32.totalorder %s8336_s22, %s7727_s19  ;;  %p7736_p9 = scmp.lt.s32.totalorder %s7727_s19, %s7727_s19 }
  0x51   : > { %p7730_p2 = pnand %p7728_p0, %p8348_p8  ;;  %p7737_p3 = por %p7736_p9, %p7735_p7 }
  0x53   : > { %p7731_p5 = pneg %p7730_p2 }
  0x55   : > { %p7738_p10 = pnand %p7737_p3, %p7731_p5 }
  0x57   : > { %7741 = shalt.err (!%p7738_p10)
}
  0x58   : > { %s8181_s15 = smov 64   ;;  %s8182_s12 = smov 4  }
  0x59   : > { %7437 = dma.hbm_to_vmem [thread:$0]  (!%p8332_p6), %s9797_s5, 512, %s8336_s22, [#allocation8], %s8181_s15, %s8181_s15, %s8182_s12  }
  0x5a   : > { %s9798_s7 = sld [smem:[#allocation44_spill]] }
  0x60   : > { %s7742_s26 = scalar_lea.hbm %s9798_s7, 4096 }
  0x61   : > { %p7743_p11 = scmp.ne.s32.totalorder %s9798_s7, %s7742_s26  ;;  %p7749_p0 = scmp.lt.u32.totalorder %s7742_s26, %s9798_s7 }
  0x63   : > { %p7745_p12 = pnand %p7743_p11, %p8348_p8 }
  0x65   : > { %p7746_p13 = pneg %p7745_p12 }
  0x67   : > { %p7751_p2 = pnand %p7749_p0, %p7746_p13 }
  0x69   : > { %7754 = shalt.err (!%p7751_p2)
}
  0x6a   : > { %s7755_s14 = scalar_lea.vmem %s514_s24, 4096  ;;  %p7763_p3 = scmp.lt.s32.totalorder %s514_s24, %s514_s24 }
  0x6b   : > { %p7756_p5 = scmp.ne.s32.totalorder %s514_s24, %s7755_s14  ;;  %p7764_p10 = scmp.lt.s32.totalorder %s7755_s14, %s7755_s14 }
  0x6d   : > { %p7758_p7 = pnand %p7756_p5, %p8348_p8  ;;  %p7765_p1 = por %p7764_p10, %p7763_p3 }
  0x6f   : > { %p7759_p9 = pneg %p7758_p7 }
  0x71   : > { %p7766_p4 = pnand %p7765_p1, %p7759_p9 }
  0x73   : > { %7769 = shalt.err (!%p7766_p4)
}
  0x74   : > { %s9799_s22 = smov 128   ;;  %s8183_s12 = smov [#allocation13]  }
  0x75   : > { %7443 = dma.hbm_to_vmem [thread:$0]  (!%p8332_p6), %s9798_s7, 4096, %s514_s24, [#allocation11], %s9799_s22, %s9799_s22, %s9759_s18  }
  0x76   : > { %s540_s17 = sshll.u32 %s8183_s12, 4  ;;  %s9800_s9 = sld [smem:[#allocation46_spill]]  ;;  %s541_s17 = int_to_ptr.vmem [resolvable:$true] %s540_s17 }
  0x7c   : > { %s7770_s26 = scalar_lea.hbm %s9800_s9, 64 }
  0x7d   : > { %p7771_p1 = scmp.ne.s32.totalorder %s9800_s9, %s7770_s26  ;;  %p7777_p12 = scmp.lt.u32.totalorder %s7770_s26, %s9800_s9 }
  0x7f   : > { %p7773_p4 = pnand %p7771_p1, %p8348_p8 }
  0x81   : > { %p7774_p11 = pneg %p7773_p4 }
  0x83   : > { %p7779_p13 = pnand %p7777_p12, %p7774_p11 }
  0x85   : > { %7782 = shalt.err (!%p7779_p13)
}
  0x86   : > { %s7783_s24 = scalar_lea.vmem %s541_s17, 64  ;;  %p7791_p7 = scmp.lt.s32.totalorder %s541_s17, %s541_s17 }
  0x87   : > { %p7784_p0 = scmp.ne.s32.totalorder %s541_s17, %s7783_s24  ;;  %p7792_p9 = scmp.lt.s32.totalorder %s7783_s24, %s7783_s24 }
  0x89   : > { %p7786_p2 = pnand %p7784_p0, %p8348_p8  ;;  %p7793_p3 = por %p7792_p9, %p7791_p7 }
  0x8b   : > { %p7787_p5 = pneg %p7786_p2 }
  0x8d   : > { %p7794_p10 = pnand %p7793_p3, %p7787_p5 }
  0x8f   : > { %7797 = shalt.err (!%p7794_p10)
}
  0x90   : > { %7449 = dma.hbm_to_vmem [thread:$0]  (!%p8332_p6), %s9800_s9, 64, %s541_s17, [#allocation14]  }
  0x91   : > { %s8184_s12 = smov [#allocation16]   ;;  %s8185_s25 = smov [#allocation19]  }
  0x92   : > { %s563_s20 = sshll.u32 %s8184_s12, 4  ;;  %s589_s26 = sshll.u32 %s8185_s25, 4  ;;  %s564_s20 = int_to_ptr.vmem [resolvable:$true] %s563_s20  ;;  %s8435_s26 = int_to_ptr.vmem [resolvable:$true] %s589_s26 }
  0x93   : > { %s9801_s11 = sld [smem:[#allocation48_spill]] }
  0x99   : > { %s7798_s19 = scalar_lea.hbm %s9801_s11, 80 }
  0x9a   : > { %p7799_p1 = scmp.ne.s32.totalorder %s9801_s11, %s7798_s19  ;;  %p7805_p12 = scmp.lt.u32.totalorder %s7798_s19, %s9801_s11 }
  0x9c   : > { %p7801_p4 = pnand %p7799_p1, %p8348_p8 }
  0x9e   : > { %p7802_p11 = pneg %p7801_p4 }
  0xa0   : > { %p7807_p13 = pnand %p7805_p12, %p7802_p11 }
  0xa2   : > { %7810 = shalt.err (!%p7807_p13)
}
  0xa3   : > { %s7811_s15 = scalar_lea.vmem %s564_s20, 80  ;;  %s7818_s12 = scalar_lea.vmem %s564_s20, 96 }
  0xa4   : > { %p7812_p0 = scmp.ne.s32.totalorder %s564_s20, %s7811_s15  ;;  %p7819_p7 = scmp.lt.s32.totalorder %s564_s20, %s564_s20 }
  0xa5   : > { %p7820_p9 = scmp.lt.s32.totalorder %s7818_s12, %s7811_s15 }
  0xa6   : > { %p7814_p2 = pnand %p7812_p0, %p8348_p8 }
  0xa7   : > { %p7821_p3 = por %p7820_p9, %p7819_p7 }
  0xa8   : > { %p7815_p5 = pneg %p7814_p2 }
  0xaa   : > { %p7822_p10 = pnand %p7821_p3, %p7815_p5 }
  0xac   : > { %7825 = shalt.err (!%p7822_p10)
}
  0xad   : > { %s9761_s25 = smov 16   ;;  %s9764_s23 = smov 1  }
  0xae   : > { %7455 = dma.hbm_to_vmem [thread:$0]  (!%p8332_p6), %s9801_s11, 80, %s564_s20, [#allocation17], %s9761_s25, %s9761_s25, %s9764_s23  }
  0xaf   : > { %s9802_s13 = sld [smem:[#allocation50_spill]] }
  0xb5   : > { %s7826_s4 = scalar_lea.hbm %s9802_s13, 32 }
  0xb6   : > { %p7827_p1 = scmp.ne.s32.totalorder %s9802_s13, %s7826_s4  ;;  %p7833_p12 = scmp.lt.u32.totalorder %s7826_s4, %s9802_s13 }
  0xb8   : > { %p7829_p4 = pnand %p7827_p1, %p8348_p8 }
  0xba   : > { %p7830_p11 = pneg %p7829_p4 }
  0xbc   : > { %p7835_p13 = pnand %p7833_p12, %p7830_p11 }
  0xbe   : > { %7838 = shalt.err (!%p7835_p13)
}
  0xbf   : > { %s7839_s20 = scalar_lea.vmem %s8435_s26, 32  ;;  %p7847_p7 = scmp.lt.s32.totalorder %s8435_s26, %s8435_s26 }
  0xc0   : > { %p7840_p0 = scmp.ne.s32.totalorder %s8435_s26, %s7839_s20  ;;  %p7848_p9 = scmp.lt.s32.totalorder %s7839_s20, %s7839_s20 }
  0xc2   : > { %p7842_p2 = pnand %p7840_p0, %p8348_p8  ;;  %p7849_p3 = por %p7848_p9, %p7847_p7 }
  0xc4   : > { %p7843_p5 = pneg %p7842_p2 }
  0xc6   : > { %p7850_p10 = pnand %p7849_p3, %p7843_p5 }
  0xc8   : > { %7853 = shalt.err (!%p7850_p10)
}
  0xc9   : > { %7461 = dma.hbm_to_vmem [thread:$0]  (!%p8332_p6), %s9802_s13, 32, %s8435_s26, [#allocation20], %s9761_s25, %s9761_s25, %s9764_s23  }
  0xca   : > { %s8485_s19 = sadd.s32 1, %s8174_s30   ;;  %s379_s14 = sadd.s32 1, %s8170_s29 }
  0xcb   : > { %s376_s24 = ssub.s32 %s8174_s30, %s8485_s19  ;;  %p386_p1 = scmp.ne.s32.totalorder %s8170_s29, %s8166_s28 }
  0xcc   : > { %p377_p4 = scmp.eq.s32.totalorder %s376_s24, 0  ;;  %p387_p11 = scmp.eq.s32.totalorder %s8174_s30, 0 }
  0xcd   : > { %p392_p12 = scmp.ne.s32.totalorder %s8166_s28, %s8162_s27  ;;  %p7487_p13 = scmp.lt.s32.totalorder %s8174_s30, 2 }
  0xce   : > { %s8497_s4 = scalar_select %p377_p4, %s8170_s29, %s379_s14  }
  0xcf   : > { %p388_p0 = por %p387_p11, %p386_p1  ;;  %p9803_p2 = scmp.eq.s32.totalorder %s8316_s1, 0 }
  0xd0   : > { %s627_s15 = sand.u32 1, %s8174_s30   ;;  %s9763_s26 = sand.u32 1, %s8170_s29  }
  0xd1   : > { %p8501_p5 = por %p9803_p2, %p392_p12  ;;  %s7369_s12 = smul.u32 1152, %s9763_s26 }
  0xd2   : > { %s7370_s20 = smul.u32 18432, %s8174_s30  ;;  %p8510_p7 = pnand %p7487_p13, %p388_p0 }
  0xd3   : > { %s9804_s17 = scalar_select %p8501_p5, 1, 0 }
  0xd4   : > { %s9805_s18 = scalar_select %p8510_p7, 1, 0 }
  0xd5   : > { %s8517_s14 = scalar_lea.hbm %s9741_s16, %s7370_s20  ;;  %s631_s24 = scalar_lea.vmem [#allocation24], %s7369_s12 }
  0xd6   : > { %s638_s25 = sshll.u32 %s631_s24, 4  ;;  %s8521_s26 = scalar_lea.sflag [#allocation5], %s627_s15  ;;  %s8519_s25 = int_to_ptr.vmem [resolvable:$true] %s638_s25 }
  0xd7   : > { %s7854_s23 = scalar_lea.hbm %s8517_s14, 18432  ;;  %p9770_p3 = pneg %p8510_p7 }
  0xd8   : > { %p7855_p9 = scmp.ne.s32.totalorder %s8517_s14, %s7854_s23  ;;  %s7859_s27 = scalar_lea.hbm %s9741_s16, 36864 }
  0xd9   : > { %p7860_p4 = scmp.lt.u32.totalorder %s8517_s14, %s9741_s16  ;;  %p7861_p11 = scmp.lt.u32.totalorder %s7859_s27, %s7854_s23 }
  0xda   : > { %p7857_p10 = pnand %p9770_p3, %p7855_p9  ;;  %p7863_p13 = scmp.lt.u32.totalorder %s7854_s23, %s8517_s14 }
  0xdb   : > { %p7862_p12 = por %p7861_p11, %p7860_p4 }
  0xdc   : > { %p7858_p1 = pneg %p7857_p10 }
  0xdd   : > { %p7864_p0 = por %p7863_p13, %p7862_p12 }
  0xdf   : > { %p7865_p2 = pnand %p7864_p0, %p7858_p1 }
  0xe1   : > { %7868 = shalt.err (!%p7865_p2)
}
  0xe2   : > { %s7869_s15 = scalar_lea.vmem %s8519_s25, 18432  ;;  %s8188_s12 = smov [#allocation24]  }
  0xe3   : > { %p7870_p9 = scmp.ne.s32.totalorder %s8519_s25, %s7869_s15  ;;  %s7874_s24 = sshll.u32 %s8188_s12, 4  ;;  %s7875_s24 = int_to_ptr.vmem [resolvable:$false] %s7874_s24 }
  0xe4   : > { %s7876_s5 = scalar_lea.vmem %s7875_s24, 36864  ;;  %p7877_p6 = scmp.lt.s32.totalorder %s8519_s25, %s7875_s24 }
  0xe5   : > { %p7872_p10 = pnand %p7870_p9, %p9770_p3  ;;  %p7878_p4 = scmp.lt.s32.totalorder %s7876_s5, %s7869_s15 }
  0xe7   : > { %p7873_p5 = pneg %p7872_p10  ;;  %p7879_p11 = por %p7878_p4, %p7877_p6 }
  0xe9   : > { %p7880_p12 = pnand %p7879_p11, %p7873_p5 }
  0xeb   : > { %7883 = shalt.err (!%p7880_p12)
}
  0xec   : > { %s9806_s0 = smov 8   ;;  %s8189_s23 = smov [#allocation9]  }
  0xed   : > { %7471 = dma.hbm_to_vmem [thread:$0]  (!%p8510_p7), %s8517_s14, 18432, %s8519_s25, %s8521_s26, %s9799_s22, %s9799_s22, %s9806_s0  }
  0xee   : > { %s500_s20 = sshll.u32 %s8189_s23, 4  ;;  %s8190_s3 = smov [#allocation12]   ;;  %s501_s20 = int_to_ptr.vmem [resolvable:$true] %s500_s20 }
  0xef   : > { %s526_s27 = sshll.u32 %s8190_s3, 4  ;;  %s9807_s6 = sld [smem:[#allocation43_spill]]  ;;  %s527_s27 = int_to_ptr.vmem [resolvable:$true] %s526_s27 }
  0xf5   : > { %s7884_s24 = scalar_lea.hbm %s9807_s6, 256 }
  0xf6   : > { %p7885_p6 = scmp.ne.s32.totalorder %s9807_s6, %s7884_s24  ;;  %p7891_p13 = scmp.lt.u32.totalorder %s7884_s24, %s9807_s6 }
  0xf8   : > { %p7887_p5 = pnand %p7885_p6, %p8348_p8 }
  0xfa   : > { %p7888_p1 = pneg %p7887_p5 }
  0xfc   : > { %p7893_p0 = pnand %p7891_p13, %p7888_p1 }
  0xfe   : > { %7896 = shalt.err (!%p7893_p0)
}
  0xff   : > { %s7897_s25 = scalar_lea.vmem %s501_s20, 256  ;;  %p7905_p4 = scmp.lt.s32.totalorder %s501_s20, %s501_s20 }
 0x100   : > { %p7898_p2 = scmp.ne.s32.totalorder %s501_s20, %s7897_s25  ;;  %p7906_p11 = scmp.lt.s32.totalorder %s7897_s25, %s7897_s25 }
 0x102   : > { %p7900_p9 = pnand %p7898_p2, %p8348_p8  ;;  %p7907_p12 = por %p7906_p11, %p7905_p4 }
 0x104   : > { %p7901_p10 = pneg %p7900_p9 }
 0x106   : > { %p7908_p3 = pnand %p7907_p12, %p7901_p10 }
 0x108   : > { %7911 = shalt.err (!%p7908_p3)
}
 0x109   : > { %p9808_p6 = scmp.ne.s32.totalorder %s9794_s2, 0  ;;  %s9809_s8 = sld [smem:[#allocation45_spill]] }
 0x10b   : > { %7440 = dma.hbm_to_vmem [thread:$0]  (!%p9808_p6), %s9807_s6, 256, %s501_s20, [#allocation8], %s9799_s22, %s9799_s22, %s9806_s0  }
 0x10f   : > { %s7912_s23 = scalar_lea.hbm %s9809_s8, 80 }
 0x110   : > { %p7913_p5 = scmp.ne.s32.totalorder %s9809_s8, %s7912_s23  ;;  %p7919_p13 = scmp.lt.u32.totalorder %s7912_s23, %s9809_s8 }
 0x112   : > { %p7915_p3 = pnand %p7913_p5, %p8348_p8 }
 0x114   : > { %p7916_p1 = pneg %p7915_p3 }
 0x116   : > { %p7921_p0 = pnand %p7919_p13, %p7916_p1 }
 0x118   : > { %7924 = shalt.err (!%p7921_p0)
}
 0x119   : > { %s7925_s5 = scalar_lea.vmem %s527_s27, 80  ;;  %s7932_s20 = scalar_lea.vmem %s527_s27, 96 }
 0x11a   : > { %p7926_p2 = scmp.ne.s32.totalorder %s527_s27, %s7925_s5  ;;  %p7933_p4 = scmp.lt.s32.totalorder %s527_s27, %s527_s27 }
 0x11b   : > { %p7934_p11 = scmp.lt.s32.totalorder %s7932_s20, %s7925_s5 }
 0x11c   : > { %p7928_p9 = pnand %p7926_p2, %p8348_p8 }
 0x11d   : > { %p7935_p12 = por %p7934_p11, %p7933_p4 }
 0x11e   : > { %p7929_p10 = pneg %p7928_p9 }
 0x120   : > { %p7936_p7 = pnand %p7935_p12, %p7929_p10 }
 0x122   : > { %7939 = shalt.err (!%p7936_p7)
}
 0x123   : > { %s9810_s25 = smov 1   ;;  %s9811_s7 = smov 16  }
 0x124   : > { %7446 = dma.hbm_to_vmem [thread:$0]  (!%p9808_p6), %s9809_s8, 80, %s527_s27, [#allocation11], %s9811_s7, %s9811_s7, %s9810_s25  }
 0x125   : > { %s8191_s14 = smov [#allocation15]   ;;  %s8192_s3 = smov [#allocation18]  }
 0x126   : > { %s550_s23 = sshll.u32 %s8191_s14, 4  ;;  %s576_s12 = sshll.u32 %s8192_s3, 4  ;;  %s551_s23 = int_to_ptr.vmem [resolvable:$true] %s550_s23  ;;  %s577_s12 = int_to_ptr.vmem [resolvable:$true] %s576_s12 }
 0x127   : > { %s9812_s10 = sld [smem:[#allocation47_spill]] }
 0x12d   : > { %s7940_s5 = scalar_lea.hbm %s9812_s10, 4096 }
 0x12e   : > { %p7941_p7 = scmp.ne.s32.totalorder %s9812_s10, %s7940_s5  ;;  %p7947_p1 = scmp.lt.u32.totalorder %s7940_s5, %s9812_s10 }
 0x130   : > { %p7943_p5 = pnand %p7941_p7, %p8348_p8 }
 0x132   : > { %p7944_p3 = pneg %p7943_p5 }
 0x134   : > { %p7949_p13 = pnand %p7947_p1, %p7944_p3 }
 0x136   : > { %7952 = shalt.err (!%p7949_p13)
}
 0x137   : > { %s7953_s27 = scalar_lea.vmem %s551_s23, 4096  ;;  %p7961_p10 = scmp.lt.s32.totalorder %s551_s23, %s551_s23 }
 0x138   : > { %p7954_p0 = scmp.ne.s32.totalorder %s551_s23, %s7953_s27  ;;  %p7962_p4 = scmp.lt.s32.totalorder %s7953_s27, %s7953_s27 }
 0x13a   : > { %p7956_p2 = pnand %p7954_p0, %p8348_p8  ;;  %p7963_p11 = por %p7962_p4, %p7961_p10 }
 0x13c   : > { %p7957_p9 = pneg %p7956_p2 }
 0x13e   : > { %p7964_p12 = pnand %p7963_p11, %p7957_p9 }
 0x140   : > { %7967 = shalt.err (!%p7964_p12)
}
 0x141   : > { %7452 = dma.hbm_to_vmem [thread:$0]  (!%p9808_p6), %s9812_s10, 4096, %s551_s23, [#allocation14], %s9799_s22, %s9799_s22, %s9806_s0  }
 0x142   : > { %s9813_s3 = sld [smem:[#allocation49_spill]] }
 0x148   : > { %s7968_s15 = scalar_lea.hbm %s9813_s3, 4096 }
 0x149   : > { %p7969_p7 = scmp.ne.s32.totalorder %s9813_s3, %s7968_s15  ;;  %p7975_p1 = scmp.lt.u32.totalorder %s7968_s15, %s9813_s3 }
 0x14b   : > { %p7971_p5 = pnand %p7969_p7, %p8348_p8 }
 0x14d   : > { %p7972_p3 = pneg %p7971_p5 }
 0x14f   : > { %p7977_p13 = pnand %p7975_p1, %p7972_p3 }
 0x151   : > { %7980 = shalt.err (!%p7977_p13)
}
 0x152   : > { %s7981_s27 = scalar_lea.vmem %s577_s12, 4096  ;;  %p7989_p10 = scmp.lt.s32.totalorder %s577_s12, %s577_s12 }
 0x153   : > { %p7982_p0 = scmp.ne.s32.totalorder %s577_s12, %s7981_s27  ;;  %p7990_p4 = scmp.lt.s32.totalorder %s7981_s27, %s7981_s27 }
 0x155   : > { %p7984_p2 = pnand %p7982_p0, %p8348_p8  ;;  %p7991_p11 = por %p7990_p4, %p7989_p10 }
 0x157   : > { %p7985_p9 = pneg %p7984_p2 }
 0x159   : > { %p7992_p12 = pnand %p7991_p11, %p7985_p9 }
 0x15b   : > { %7995 = shalt.err (!%p7992_p12)
}
 0x15c   : > { %7458 = dma.hbm_to_vmem [thread:$0]  (!%p9808_p6), %s9813_s3, 4096, %s577_s12, [#allocation17], %s9799_s22, %s9799_s22, %s9806_s0  }
 0x15d   : > { %s8193_s13 = smov [#allocation21]   ;;  %s8194_s14 = smov [#allocation22]  }
 0x15e   : > { %s602_s11 = sshll.u32 %s8193_s13, 4  ;;  %s616_s15 = sshll.u32 %s8194_s14, 4  ;;  %s603_s11 = int_to_ptr.vmem [resolvable:$true] %s602_s11  ;;  %s617_s15 = int_to_ptr.vmem [resolvable:$true] %s616_s15 }
 0x15f   : > { %s9814_s20 = sld [smem:[#allocation51_spill]] }
 0x165   : > { %s7996_s9 = scalar_lea.hbm %s9814_s20, 2048 }
 0x166   : > { %p7997_p7 = scmp.ne.s32.totalorder %s9814_s20, %s7996_s9  ;;  %p8003_p1 = scmp.lt.u32.totalorder %s7996_s9, %s9814_s20 }
 0x168   : > { %p7999_p5 = pnand %p7997_p7, %p8348_p8 }
 0x16a   : > { %p8000_p3 = pneg %p7999_p5 }
 0x16c   : > { %p8005_p13 = pnand %p8003_p1, %p8000_p3 }
 0x16e   : > { %8008 = shalt.err (!%p8005_p13)
}
 0x16f   : > { %s8009_s12 = scalar_lea.vmem %s603_s11, 2048  ;;  %p8017_p10 = scmp.lt.s32.totalorder %s603_s11, %s603_s11 }
 0x170   : > { %p8010_p0 = scmp.ne.s32.totalorder %s603_s11, %s8009_s12  ;;  %p8018_p4 = scmp.lt.s32.totalorder %s8009_s12, %s8009_s12 }
 0x172   : > { %p8012_p2 = pnand %p8010_p0, %p8348_p8  ;;  %p8019_p11 = por %p8018_p4, %p8017_p10 }
 0x174   : > { %p8013_p9 = pneg %p8012_p2 }
 0x176   : > { %p8020_p12 = pnand %p8019_p11, %p8013_p9 }
 0x178   : > { %8023 = shalt.err (!%p8020_p12)
}
 0x179   : > { %7464 = dma.hbm_to_vmem [thread:$0]  (!%p9808_p6), %s9814_s20, 2048, %s603_s11, [#allocation20], %s9799_s22, %s9799_s22, %s9806_s0  }
 0x17a   : > { %s9815_s6 = sand.u32 1, %s8170_s29   ;;  %s9816_s5 = sld [smem:[#allocation52_spill]] }
 0x17b   : > { %s7371_s13 = smul.u32 10, %s9815_s6 }
 0x180   : > { %s8024_s9 = scalar_lea.hbm %s9816_s5, 16 }
 0x181   : > { %p8025_p7 = scmp.ne.s32.totalorder %s9816_s5, %s8024_s9  ;;  %p8031_p1 = scmp.lt.u32.totalorder %s8024_s9, %s9816_s5 }
 0x183   : > { %p8027_p5 = pnand %p8025_p7, %p8348_p8 }
 0x185   : > { %p8028_p3 = pneg %p8027_p5 }
 0x187   : > { %p8033_p13 = pnand %p8031_p1, %p8028_p3 }
 0x189   : > { %8036 = shalt.err (!%p8033_p13)
}
 0x18a   : > { %s8037_s22 = scalar_lea.vmem %s617_s15, 16  ;;  %s8044_s0 = scalar_lea.vmem %s617_s15, 32 }
 0x18b   : > { %p8038_p0 = scmp.ne.s32.totalorder %s617_s15, %s8037_s22  ;;  %p8045_p10 = scmp.lt.s32.totalorder %s617_s15, %s617_s15 }
 0x18c   : > { %p8046_p4 = scmp.lt.s32.totalorder %s8044_s0, %s8037_s22 }
 0x18d   : > { %p8040_p2 = pnand %p8038_p0, %p8348_p8 }
 0x18e   : > { %p8047_p11 = por %p8046_p4, %p8045_p10 }
 0x18f   : > { %p8041_p9 = pneg %p8040_p2 }
 0x191   : > { %p8048_p12 = pnand %p8047_p11, %p8041_p9 }
 0x193   : > { %8051 = shalt.err (!%p8048_p12)
}
 0x194   : > { %7467 = dma.hbm_to_vmem [thread:$0]  (!%p9808_p6), %s9816_s5, 16, %s617_s15, [#allocation23]  }
 0x195   : > { %s7372_s3 = smul.u32 160, %s8174_s30  ;;  %s652_s10 = scalar_lea.vmem [#allocation25], %s7371_s13 }
 0x196   : > { %s659_s6 = sshll.u32 %s652_s10, 4  ;;  %s9817_s24 = sld [smem:[#allocation53_spill]]  ;;  %s8683_s6 = int_to_ptr.vmem [resolvable:$true] %s659_s6 }
 0x197   : > { %p9818_p7 = scmp.ne.s32.totalorder %s9805_s18, 0 }
 0x199   : > { %p9819_p5 = pneg %p9818_p7 }
 0x19c   : > { %s8681_s9 = scalar_lea.hbm %s9817_s24, %s7372_s3  ;;  %s8057_s13 = scalar_lea.hbm %s9817_s24, 320 }
 0x19d   : > { %s8052_s2 = scalar_lea.hbm %s8681_s9, 160  ;;  %p8058_p1 = scmp.lt.u32.totalorder %s8681_s9, %s9817_s24 }
 0x19e   : > { %p8053_p8 = scmp.ne.s32.totalorder %s8681_s9, %s8052_s2  ;;  %p8059_p13 = scmp.lt.u32.totalorder %s8057_s13, %s8052_s2 }
 0x19f   : > { %p8061_p2 = scmp.lt.u32.totalorder %s8052_s2, %s8681_s9 }
 0x1a0   : > { %p8055_p3 = pnand %p8053_p8, %p9819_p5  ;;  %p8060_p0 = por %p8059_p13, %p8058_p1 }
 0x1a2   : > { %p8056_p6 = pneg %p8055_p3  ;;  %p8062_p9 = por %p8061_p2, %p8060_p0 }
 0x1a4   : > { %p8063_p10 = pnand %p8062_p9, %p8056_p6 }
 0x1a6   : > { %8066 = shalt.err (!%p8063_p10)
}
 0x1a7   : > { %s8067_s12 = scalar_lea.vmem %s8683_s6, 160  ;;  %p9820_p11 = pmov %p9819_p5 }
 0x1a8   : > { %p8068_p4 = scmp.ne.s32.totalorder %s8683_s6, %s8067_s12  ;;  %s8195_s22 = smov [#allocation25]  }
 0x1a9   : > { %s8072_s0 = sshll.u32 %s8195_s22, 4  ;;  %s8073_s0 = int_to_ptr.vmem [resolvable:$false] %s8072_s0 }
 0x1aa   : > { %p8070_p12 = pnand %p8068_p4, %p9820_p11  ;;  %s8074_s11 = scalar_lea.vmem %s8073_s0, 320 }
 0x1ab   : > { %p8075_p5 = scmp.lt.s32.totalorder %s8683_s6, %s8073_s0  ;;  %p8076_p3 = scmp.lt.s32.totalorder %s8074_s11, %s8067_s12 }
 0x1ac   : > { %p8071_p8 = pneg %p8070_p12 }
 0x1ad   : > { %p8077_p1 = por %p8076_p3, %p8075_p5 }
 0x1af   : > { %p8078_p13 = pnand %p8077_p1, %p8071_p8 }
 0x1b1   : > { %8081 = shalt.err (!%p8078_p13)
}
 0x1b2   : > { %7474 = dma.hbm_to_vmem [thread:$0]  (!%p9818_p7), %s8681_s9, 160, %s8683_s6, %s8521_s26, %s9811_s7, %s9811_s7, %s9810_s25  }
 0x1b3   : > { %s9821_s8 = sld [smem:[#allocation36_spill]] }
 0x1b9   : > { %p9822_p6 = scmp.ne.s32.totalorder %s9821_s8, 0 }
 0x1ba   : > { %p9823_p0 = scmp.eq.s32.totalorder (!%p9822_p6), %s8316_s1, 0 }
 0x1bb   : > { %671 = sbr.rel (%p9822_p6) target bundleno = 4972 (0x136c), region = 92 }
 0x1c2   : > { %8125 = dma.done.wait (%p9823_p0), [#allocation5], 1024   ;;  %p9824_p2 = pmov %p9823_p0 }
 0x1c3   : > { %p9825_p9 = pmov %p9823_p0 }
 0x1c4   : > { %8127 = vsyncadd (%p9824_p2), [#allocation5], 4294966272 }
 0x1c5   : > { %8129 = dma.done.wait (%p9825_p9), [#allocation8], 768   ;;  %p9826_p10 = pmov %p9823_p0 }
 0x1c6   : > { %p9827_p4 = pmov %p9823_p0 }
 0x1c7   : > { %8131 = vsyncadd (%p9826_p10), [#allocation8], 4294966528 }
 0x1c8   : > { %8133 = dma.done.wait (%p9827_p4), [#allocation11], 4176   ;;  %p9828_p7 = pmov %p9823_p0 }
 0x1c9   : > { %p9829_p11 = pmov %p9823_p0 }
 0x1ca   : > { %8135 = vsyncadd (%p9828_p7), [#allocation11], 4294963120 }
 0x1cb   : > { %8137 = dma.done.wait (%p9829_p11), [#allocation14], 4160   ;;  %p9830_p12 = pmov %p9823_p0 }
 0x1cc   : > { %p9831_p8 = pmov %p9823_p0 }
 0x1cd   : > { %8139 = vsyncadd (%p9830_p12), [#allocation14], 4294963136 }
 0x1ce   : > { %8141 = dma.done.wait (%p9831_p8), [#allocation17], 4176   ;;  %p9832_p5 = pmov %p9823_p0 }
 0x1cf   : > { %p9833_p3 = pmov %p9823_p0 }
 0x1d0   : > { %8143 = vsyncadd (%p9832_p5), [#allocation17], 4294963120 }
 0x1d1   : > { %8145 = dma.done.wait (%p9833_p3), [#allocation20], 2080   ;;  %p9834_p1 = pmov %p9823_p0 }
 0x1d2   : > { %p9835_p13 = pmov %p9823_p0 }
 0x1d3   : > { %8147 = vsyncadd (%p9834_p1), [#allocation20], 4294965216 }
 0x1d4   : > { %8149 = dma.done.wait (%p9835_p13), [#allocation23], 16   ;;  %p9836_p6 = pmov %p9823_p0 }
 0x1d5   : > { %s721_s26 = sand.u32 1, %s8316_s1   ;;  %s723_s18 = sand.u32 1, %s8166_s28  }
 0x1d6   : > { %8151 = vsyncadd (%p9836_p6), [#allocation23], 4294967280  ;;  %s7373_s25 = smul.u32 1152, %s723_s18  ;;  %s722_s7 = scalar_lea.sflag [#allocation5], %s721_s26 }
 0x1d7   : > { %p9837_p0 = scmp.ne.s32.totalorder %s9804_s17, 0 }
 0x1d8   : > { %s8744_s3 = scalar_lea.vmem [#allocation24], %s7373_s25 }
 0x1d9   : > { %8153 = dma.done.wait (%p9837_p0), %s722_s7, 18592  }
 0x1da   : > { %8155 = vsyncadd (%p9837_p0), %s722_s7, 4294948704  ;;  %s7374_s10 = smul.u32 10, %s723_s18  ;;  %p9838_p2 = scmp.ne.s32.totalorder %s8316_s1, 0 }
 0x1db   : > { %v800_v0 = vld [vmem:[#allocation9] sm:$0xff] (!%p9838_p2)  ;;  %v801_v1 = vld [vmem:[#allocation9 + $0x8] sm:$0x3f] (!%p9838_p2)  ;;  %vm835_vm0 = vcmask (!%p9838_p2), 1045504   ;;  %s9839_s9 = sld [smem:[#allocation38_spill]] (!%p9838_p2)  ;;  %vm8196_vm1 = vmmov (!%p9838_p2), 1  }
 0x1dc   : > { %s8750_s6 = scalar_lea.vmem [#allocation25], %s7374_s10  ;;  %791 = sbr.rel (%p9838_p2) target bundleno = 1726 (0x6be), region = 152  ;;  %v6779_v3 = vpack.c.bf16 (!%p9838_p2), %v801_v1, %v800_v0  ;;  %vm6780_vm2 = vmpackc.low (!%p9838_p2), %vm835_vm0, %vm8196_vm1  ;;  %vm810_vm3 = vcmask (!%p9838_p2), 113664   ;;  %v967_v5 = vld [vmem:[#allocation10] sm:$0xff] (!%p9838_p2)  ;;  %v968_v6 = vld [vmem:[#allocation10 + $0x8] sm:$0xff] (!%p9838_p2)  ;;  %vm1436_vm4 = vcmask (!%p9838_p2), 1042432  }
 0x1dd   : > { %v969_v7 = vld [vmem:[#allocation10 + $0x10] sm:$0xff] (!%p9838_p2)  ;;  %v970_v8 = vld [vmem:[#allocation10 + $0x18] sm:$0xff] (!%p9838_p2)  ;;  %v6785_v10 = vpack.c.bf16 (!%p9838_p2), %v968_v6, %v967_v5  ;;  %v971_v12 = vld [vmem:[#allocation10 + $0x20] sm:$0xff] (!%p9838_p2)  ;;  %s9840_s10 = sld [smem:[#allocation39_spill]] (!%p9838_p2)  ;;  %vm1387_vm5 = vcmask (!%p9838_p2), 23552  }
 0x1de   : > { %6781 = vmatprep.subr.msk.bf16.mxu0 (!%p9838_p2), %vm6780_vm2, %v6779_v3  ;;  %v6789_v11 = vpack.c.bf16 (!%p9838_p2), %v970_v8, %v969_v7  ;;  %v972_v13 = vld [vmem:[#allocation10 + $0x28] sm:$0xff] (!%p9838_p2)  ;;  %v973_v17 = vld [vmem:[#allocation10 + $0x30] sm:$0xff] (!%p9838_p2)  ;;  %v974_v18 = vld [vmem:[#allocation10 + $0x38] sm:$0xff] (!%p9838_p2) }
 0x1df   : > { %6784 = vmatpush3.bf16.msk.msra.mxu0 (!%p9838_p2), %vm6780_vm2, %v6779_v3  ;;  %6786 = vmatprep.subr.bf16.mxu1 (!%p9838_p2), %v6785_v10  ;;  %v6793_v16 = vpack.c.bf16 (!%p9838_p2), %v972_v13, %v971_v12  ;;  %v6797_v21 = vpack.c.bf16 (!%p9838_p2), %v974_v18, %v973_v17  ;;  %v975_v22 = vld [vmem:[#allocation10 + $0x40] sm:$0xff] (!%p9838_p2)  ;;  %v976_v23 = vld [vmem:[#allocation10 + $0x48] sm:$0xff] (!%p9838_p2)  ;;  %v977_v26 = vld [vmem:[#allocation10 + $0x50] sm:$0xff] (!%p9838_p2) }
 0x1e0   : > { %6788 = vmatpush3.bf16.msra.mxu1 (!%p9838_p2), %v6785_v10  ;;  %v6801_v25 = vpack.c.bf16 (!%p9838_p2), %v976_v23, %v975_v22  ;;  %v978_v27 = vld [vmem:[#allocation10 + $0x58] sm:$0xff] (!%p9838_p2)  ;;  %v979_v29 = vld [vmem:[#allocation10 + $0x60] sm:$0xff] (!%p9838_p2)  ;;  %v980_v30 = vld [vmem:[#allocation10 + $0x68] sm:$0xff] (!%p9838_p2) }
 0x1e1   : > { %v792_v2 = vld [vmem:[%s9839_s9] sm:$0xff] (!%p9838_p2)  ;;  %v793_v4 = vld [vmem:[%s9839_s9 + $0x8] sm:$0xff] (!%p9838_p2)  ;;  %v794_v9 = vld [vmem:[%s9839_s9 + $0x10] sm:$0xff] (!%p9838_p2)  ;;  %6790 = vmatprep.subr.bf16.mxu1 (!%p9838_p2), %v6789_v11  ;;  %v6805_v28 = vpack.c.bf16 (!%p9838_p2), %v978_v27, %v977_v26  ;;  %v6809_v31 = vpack.c.bf16 (!%p9838_p2), %v980_v30, %v979_v29 }
 0x1e2   : > { %5881 = vmatprep.mubr.msk.f32.mxu0 (!%p9838_p2), %vm810_vm3, %v792_v2  ;;  %v795_v14 = vld [vmem:[%s9839_s9 + $0x18] sm:$0xff] (!%p9838_p2)  ;;  %v796_v15 = vld [vmem:[%s9839_s9 + $0x20] sm:$0xff] (!%p9838_p2)  ;;  %v797_v19 = vld [vmem:[%s9839_s9 + $0x28] sm:$0xff] (!%p9838_p2) }
 0x1e3   : > { %5882 = vmatmul.mubr.msk.f32.vlgmr.msra.gmra.mrb[0].mxu0 %vm810_vm3, %v793_v4  ;;  %v798_v20 = vld [vmem:[%s9839_s9 + $0x30] sm:$0xff]  ;;  %v799_v24 = vld [vmem:[%s9839_s9 + $0x38] sm:$0xff]  ;;  %v981_v32 = vld [vmem:[#allocation10 + $0x70] sm:$0xff] }
 0x1e4   : > { %5884 = vmatprep.mubr.msk.f32.mxu0 %vm810_vm3, %v794_v9  ;;  %6792 = vmatpush3.bf16.msra.mxu1 %v6789_v11  ;;  %v982_v33 = vld [vmem:[#allocation10 + $0x78] sm:$0xff]  ;;  %v8786_v35 = vld [vmem:[#allocation13] sm:$0x7]  ;;  %v1107_v38 = vld [vmem:[#allocation10 + $0x90] sm:$0xff] }
 0x1e5   : > { %6794 = vmatprep.subr.bf16.mxu1 %v6793_v16  ;;  %v6813_v34 = vpack.c.bf16 %v982_v33, %v981_v32  ;;  %v1105_v36 = vld [vmem:[#allocation10 + $0x80] sm:$0xff]  ;;  %v1106_v37 = vld [vmem:[#allocation10 + $0x88] sm:$0xff]  ;;  %v1108_v40 = vld [vmem:[#allocation10 + $0x98] sm:$0xff] }
 0x1e6   : > { %v6817_v39 = vpack.c.bf16 %v1106_v37, %v1105_v36  ;;  %v6821_v41 = vpack.c.bf16 %v1108_v40, %v1107_v38  ;;  %v1109_v42 = vld [vmem:[#allocation10 + $0xa0] sm:$0xff]  ;;  %v1110_v43 = vld [vmem:[#allocation10 + $0xa8] sm:$0xff]  ;;  %v1111_v45 = vld [vmem:[#allocation10 + $0xb0] sm:$0xff] }
 0x1e7   : > { %5885 = vmatmul.mubr.msk.f32.gmra.mrb[2].mxu0 %vm810_vm3, %v795_v14  ;;  %v6825_v44 = vpack.c.bf16 %v1110_v43, %v1109_v42  ;;  %v1112_v46 = vld [vmem:[#allocation10 + $0xb8] sm:$0xff]  ;;  %v1113_v48 = vld [vmem:[#allocation10 + $0xc0] sm:$0xff]  ;;  %v1114_v49 = vld [vmem:[#allocation10 + $0xc8] sm:$0xff] }
 0x1e8   : > { %5887 = vmatprep.mubr.msk.f32.mxu0 %vm810_vm3, %v796_v15  ;;  %6796 = vmatpush3.bf16.msra.mxu1 %v6793_v16  ;;  %v6829_v47 = vpack.c.bf16 %v1112_v46, %v1111_v45  ;;  %v6833_v50 = vpack.c.bf16 %v1114_v49, %v1113_v48  ;;  %v1115_v51 = vld [vmem:[#allocation10 + $0xd0] sm:$0xff]  ;;  %v1116_v52 = vld [vmem:[#allocation10 + $0xd8] sm:$0xff]  ;;  %v1117_v54 = vld [vmem:[#allocation10 + $0xe0] sm:$0xff] }
 0x1e9   : > { %6798 = vmatprep.subr.bf16.mxu1 %v6797_v21  ;;  %6818 = vmatprep.subr.bf16.mxu0 %v6817_v39  ;;  %v6837_v53 = vpack.c.bf16 %v1116_v52, %v1115_v51  ;;  %v1118_v55 = vld [vmem:[#allocation10 + $0xe8] sm:$0xff]  ;;  %v803_v57 = vld [vmem:[#allocation4 + $0x8] sm:$0xff]  ;;  %v802_v58 = vld [vmem:[#allocation4] sm:$0xff] }
 0x1ea   : > { %6820 = vmatpush3.bf16.msra.mxu0 %v6817_v39  ;;  %v6841_v56 = vpack.c.bf16 %v1118_v55, %v1117_v54  ;;  %v5156_v60 = vld [vmem:[#allocation12] ss:$0 sm:$0xff]  ;;  %v805_v0 = vld [vmem:[#allocation4 + $0x18] sm:$0xff]  ;;  %v807_v8 = vld [vmem:[#allocation4 + $0x28] sm:$0xff] }
 0x1eb   : > { %5888 = vmatmul.mubr.msk.f32.gmra.mrb[4].mxu0 %vm810_vm3, %v797_v19  ;;  %6822 = vmatprep.subr.bf16.mxu0 %v6821_v41  ;;  %v804_v2 = vld [vmem:[#allocation4 + $0x10] sm:$0xff]  ;;  %v806_v12 = vld [vmem:[#allocation4 + $0x20] sm:$0xff]  ;;  %v1366_v37 = vld [vmem:[%s9840_s10 + $0x18] sm:$0xff] }
 0x1ec   : > { %5890 = vmatprep.mubr.msk.f32.mxu0 %vm810_vm3, %v798_v20  ;;  %6800 = vmatpush3.bf16.msra.mxu1 %v6797_v21  ;;  %v809_v20 = vld [vmem:[#allocation4 + $0x38] sm:$0xff]  ;;  %v808_v22 = vld [vmem:[#allocation4 + $0x30] sm:$0xff]  ;;  %v1367_v38 = vld [vmem:[%s9840_s10 + $0x20] sm:$0xff] }
 0x1ed   : > { %6802 = vmatprep.subr.bf16.mxu1 %v6801_v25  ;;  %v1365_v36 = vld [vmem:[%s9840_s10 + $0x10] sm:$0xff]  ;;  %v1368_v39 = vld [vmem:[%s9840_s10 + $0x28] sm:$0xff]  ;;  %v1371_v42 = vld [vmem:[%s9840_s10 + $0x40] sm:$0xff] }
 0x1ee   : > { %6824 = vmatpush3.bf16.msra.mxu0 %v6821_v41  ;;  %v1369_v40 = vld [vmem:[%s9840_s10 + $0x30] sm:$0xff]  ;;  %v1370_v41 = vld [vmem:[%s9840_s10 + $0x38] sm:$0xff]  ;;  %v1372_v43 = vld [vmem:[%s9840_s10 + $0x48] sm:$0xff] }
 0x1ef   : > { %5891 = vmatmul.mubr.msk.f32.gmra.mrb[6].mxu0 %vm810_vm3, %v799_v24  ;;  %6826 = vmatprep.subr.bf16.mxu0 %v6825_v44  ;;  %v1374_v45 = vld [vmem:[%s9840_s10 + $0x58] sm:$0xff]  ;;  %v1375_v46 = vld [vmem:[%s9840_s10 + $0x60] sm:$0xff]  ;;  %v1377_v48 = vld [vmem:[%s9840_s10 + $0x70] sm:$0xff] }
 0x1f0   : > { %6804 = vmatpush3.bf16.msra.mxu1 %v6801_v25  ;;  %v1378_v49 = vld [vmem:[%s9840_s10 + $0x78] sm:$0xff]  ;;  %v1120_v51 = vld [vmem:[#allocation10 + $0xf8] sm:$0xff] }
 0x1f1   : > { %6806 = vmatprep.subr.bf16.mxu1 %v6805_v28  ;;  %v1602_v54 = vld [vmem:[#allocation15 + $0x8] sm:$0xff] }
 0x1f2   : > { %6828 = vmatpush3.bf16.msra.mxu0 %v6825_v44  ;;  %v1373_v44 = vld [vmem:[%s9840_s10 + $0x50] sm:$0xff] }
 0x1f3   : > { %6830 = vmatprep.subr.bf16.mxu0 %v6829_v47 }
 0x1f4   : > { %6808 = vmatpush3.bf16.msra.mxu1 %v6805_v28 }
 0x1f5   : > { %6810 = vmatprep.subr.bf16.mxu1 %v6809_v31 }
 0x1f6   : > { %6832 = vmatpush3.bf16.msra.mxu0 %v6829_v47  ;;  %v1376_v47 = vld [vmem:[%s9840_s10 + $0x68] sm:$0xff] }
 0x1f7   : > { %6834 = vmatprep.subr.bf16.mxu0 %v6833_v50 }
 0x1f8   : > { %6812 = vmatpush3.bf16.msra.mxu1 %v6809_v31 }
 0x1f9   : > { %6814 = vmatprep.subr.bf16.mxu1 %v6813_v34 }
 0x1fa   : > { %6836 = vmatpush3.bf16.msra.mxu0 %v6833_v50  ;;  %v1119_v50 = vld [vmem:[#allocation10 + $0xf0] sm:$0xff] }
 0x1fb   : > { %6838 = vmatprep.subr.bf16.mxu0 %v6837_v53  ;;  %v6845_v52 = vpack.c.bf16 %v1120_v51, %v1119_v50 }
 0x1fc   : > { %6816 = vmatpush3.bf16.msra.mxu1 %v6813_v34  ;;  %v1363_v34 = vld [vmem:[%s9840_s10] sm:$0xff] }
 0x1fd   : > { %5981 = vmatprep.subr.msk.mxu1 %vm1436_vm4, %v8786_v35 }
 0x1fe   : > { %6840 = vmatpush3.bf16.msra.mxu0 %v6837_v53  ;;  %v1601_v53 = vld [vmem:[#allocation15] sm:$0xff] }
 0x1ff   : > { %6842 = vmatprep.subr.bf16.mxu0 %v6841_v56  ;;  %v6849_v55 = vpack.c.bf16 %v1602_v54, %v1601_v53 }
 0x202   : > { %6844 = vmatpush3.bf16.msra.mxu0 %v6841_v56  ;;  %v5157_v56 = vld [vmem:[#allocation12 + $0x1] ss:$0 sm:$0xff] }
 0x203   : > { %6846 = vmatprep.subr.bf16.mxu0 %v6845_v52 }
 0x206   : > { %6848 = vmatpush3.bf16.msra.mxu0 %v6845_v52 }
 0x207   : > { %6850 = vmatprep.subr.bf16.mxu0 %v6849_v55 }
 0x2b6   : > { %v5883_v59 = vpop.f32.mrb[0].mxu0 }
 0x2b7   : > { %v911_v61 = vadd.f32 %v5883_v59, %v803_v57  ;;  %v905_v62 = vpop.f32.mrb[1].mxu0 }
 0x2b8   : > { %v906_v63 = vadd.f32 %v905_v62, %v802_v58  ;;  %v1604_v62 = vld [vmem:[#allocation15 + $0x18] sm:$0xff] }
 0x2b9   : > { %v952_v1 = vadd.f32 %v5156_v60, %v911_v61  ;;  %v1603_v61 = vld [vmem:[#allocation15 + $0x10] sm:$0xff] }
 0x2ba   : > { %v5886_v3 = vpop.f32.mrb[2].mxu0  ;;  %v951_v4 = vadd.f32 %v5156_v60, %v906_v63 }
 0x2bb   : > { %v921_v5 = vadd.f32 %v5886_v3, %v805_v0  ;;  %v915_v6 = vpop.f32.mrb[3].mxu0  ;;  %v960_v10 = vmax.f32 %v952_v1, 0.0 }
 0x2bc   : > { %v916_v7 = vadd.f32 %v915_v6, %v804_v2  ;;  %v959_v9 = vmax.f32 %v951_v4, 0.0  ;;  %v6853_v4 = vpack.c.bf16 %v1604_v62, %v1603_v61  ;;  %v1605_v6 = vld [vmem:[#allocation15 + $0x20] sm:$0xff] }
 0x2bd   : > { %v954_v11 = vadd.f32 %v5156_v60, %v921_v5 }
 0x2be   : > { %v953_v13 = vadd.f32 %v5156_v60, %v916_v7  ;;  %v5889_v14 = vpop.f32.mrb[4].mxu0  ;;  %5925 = vmatprep.mubr.f32.mxu1 %v959_v9  ;;  %v1606_v7 = vld [vmem:[#allocation15 + $0x28] sm:$0xff] }
 0x2bf   : > { %v962_v15 = vmax.f32 %v954_v11, 0.0  ;;  %v931_v16 = vadd.f32 %v5889_v14, %v807_v8  ;;  %v925_v17 = vpop.f32.mrb[5].mxu0  ;;  %5926 = vmatmul.mubr.f32.vlgmr.msra.gmra.mrb[0].mxu1 %v960_v10 }
 0x2c0   : > { %v961_v18 = vmax.f32 %v953_v13, 0.0  ;;  %v926_v19 = vadd.f32 %v925_v17, %v806_v12  ;;  %5982 = vmatpush3.msk.msra.mxu1 %vm1436_vm4, %v8786_v35  ;;  %v1364_v35 = vld [vmem:[%s9840_s10 + $0x8] sm:$0xff]  ;;  %v6857_v13 = vpack.c.bf16 %v1606_v7, %v1605_v6 }
 0x2c1   : > { %v956_v21 = vadd.f32 %v5156_v60, %v931_v16  ;;  %v1608_v16 = vld [vmem:[#allocation15 + $0x38] sm:$0xff] }
 0x2c2   : > { %v955_v23 = vadd.f32 %v5156_v60, %v926_v19  ;;  %v5892_v24 = vpop.f32.mrb[6].mxu0  ;;  %5928 = vmatprep.mubr.f32.mxu1 %v961_v18 }
 0x2c3   : > { %v964_v25 = vmax.f32 %v956_v21, 0.0  ;;  %v941_v26 = vadd.f32 %v5892_v24, %v809_v20  ;;  %v935_v27 = vpop.f32.mrb[7].mxu0  ;;  %5929 = vmatmul.mubr.f32.gmra.mrb[2].mxu1 %v962_v15  ;;  %v1607_v15 = vld [vmem:[#allocation15 + $0x30] sm:$0xff]  ;;  %v1609_v24 = vld [vmem:[#allocation15 + $0x40] sm:$0xff] }
 0x2c4   : > { %v963_v28 = vmax.f32 %v955_v23, 0.0  ;;  %v936_v29 = vadd.f32 %v935_v27, %v808_v22  ;;  %v6861_v22 = vpack.c.bf16 %v1608_v16, %v1607_v15  ;;  %v8856_v27 = vld [vmem:[#allocation16] ss:$0 sm:$0xff] }
 0x2c5   : > { %v958_v30 = vadd.f32 %v5156_v60, %v941_v26 }
 0x2c6   : > { %v957_v31 = vadd.f32 %v5156_v60, %v936_v29  ;;  %5931 = vmatprep.mubr.f32.mxu1 %v963_v28 }
 0x2c7   : > { %v966_v32 = vmax.f32 %v958_v30, 0.0  ;;  %5932 = vmatmul.mubr.f32.gmra.mrb[4].mxu1 %v964_v25  ;;  %v1610_v25 = vld [vmem:[#allocation15 + $0x48] sm:$0xff] }
 0x2c8   : > { %v965_v33 = vmax.f32 %v957_v31, 0.0  ;;  %v6865_v30 = vpack.c.bf16 %v1610_v25, %v1609_v24  ;;  %v1788_v24 = vld [vmem:[#allocation15 + $0x88] sm:$0xff] }
 0x2ca   : > { %5934 = vmatprep.mubr.f32.mxu1 %v965_v33  ;;  %v1612_v33 = vld [vmem:[#allocation15 + $0x58] sm:$0xff] }
 0x2cb   : > { %5935 = vmatmul.mubr.f32.gmra.mrb[6].mxu1 %v966_v32  ;;  %v1611_v32 = vld [vmem:[#allocation15 + $0x50] sm:$0xff] }
 0x2cc   : > { %5983 = vmatprep.mubr.msk.f32.mxu1 %vm1387_vm5, %v1363_v34 }
 0x2cf   : > { %5984 = vmatmul.mubr.msk.f32.vlgmr.msra.gmra.mrb[8].mxu1 %vm1387_vm5, %v1364_v35 }
 0x2d0   : > { %5986 = vmatprep.mubr.msk.f32.mxu1 %vm1387_vm5, %v1365_v36 }
 0x2d3   : > { %5987 = vmatmul.mubr.msk.f32.gmra.mrb[10].mxu1 %vm1387_vm5, %v1366_v37  ;;  %v6869_v37 = vpack.c.bf16 %v1612_v33, %v1611_v32  ;;  %v1793_v32 = vld [vmem:[#allocation15 + $0xb0] sm:$0xff]  ;;  %v1794_v33 = vld [vmem:[#allocation15 + $0xb8] sm:$0xff] }
 0x2d4   : > { %5989 = vmatprep.mubr.msk.f32.mxu1 %vm1387_vm5, %v1367_v38 }
 0x2d7   : > { %5990 = vmatmul.mubr.msk.f32.gmra.mrb[12].mxu1 %vm1387_vm5, %v1368_v39  ;;  %v1613_v39 = vld [vmem:[#allocation15 + $0x60] sm:$0xff] }
 0x2d8   : > { %5992 = vmatprep.mubr.msk.f32.mxu1 %vm1387_vm5, %v1369_v40  ;;  %v1614_v40 = vld [vmem:[#allocation15 + $0x68] sm:$0xff] }
 0x2db   : > { %5993 = vmatmul.mubr.msk.f32.gmra.mrb[14].mxu1 %vm1387_vm5, %v1370_v41 }
 0x2dc   : > { %5995 = vmatprep.mubr.msk.f32.mxu1 %vm1387_vm5, %v1371_v42  ;;  %v6873_v42 = vpack.c.bf16 %v1614_v40, %v1613_v39  ;;  %v1798_v39 = vld [vmem:[#allocation15 + $0xd8] sm:$0xff] }
 0x2df   : > { %5996 = vmatmul.mubr.msk.f32.gmra.mrb[16].mxu1 %vm1387_vm5, %v1372_v43 }
 0x2e0   : > { %5998 = vmatprep.mubr.msk.f32.mxu1 %vm1387_vm5, %v1373_v44  ;;  %v1615_v44 = vld [vmem:[#allocation15 + $0x70] sm:$0xff] }
 0x2e3   : > { %5999 = vmatmul.mubr.msk.f32.gmra.mrb[18].mxu1 %vm1387_vm5, %v1374_v45  ;;  %v1616_v45 = vld [vmem:[#allocation15 + $0x78] sm:$0xff] }
 0x2e4   : > { %6001 = vmatprep.mubr.msk.f32.mxu1 %vm1387_vm5, %v1375_v46 }
 0x2e7   : > { %6002 = vmatmul.mubr.msk.f32.gmra.mrb[20].mxu1 %vm1387_vm5, %v1376_v47  ;;  %v6877_v47 = vpack.c.bf16 %v1616_v45, %v1615_v44  ;;  %v1801_v44 = vld [vmem:[#allocation15 + $0xf0] sm:$0xff]  ;;  %v1802_v45 = vld [vmem:[#allocation15 + $0xf8] sm:$0xff] }
 0x2e8   : > { %6004 = vmatprep.mubr.msk.f32.mxu1 %vm1387_vm5, %v1377_v48 }
 0x2eb   : > { %6005 = vmatmul.mubr.msk.f32.gmra.mrb[22].mxu1 %vm1387_vm5, %v1378_v49 }
 0x392   : > { %v5927_v57 = vpop.f32.mrb[0].mxu1 }
 0x393   : > { %v1063_v58 = vadd.f32 %v5927_v57, %v5157_v56  ;;  %v1057_v59 = vpop.f32.mrb[1].mxu1 }
 0x394   : > { %v1058_v60 = vadd.f32 %v5157_v56, %v1057_v59 }
 0x395   : > { %v1097_v1 = vmax.f32 %v1063_v58, 0.0 }
 0x396   : > { %v1096_v63 = vmax.f32 %v1058_v60, 0.0  ;;  %v5930_v0 = vpop.f32.mrb[2].mxu1 }
 0x397   : > { %v1073_v2 = vadd.f32 %v5930_v0, %v5157_v56  ;;  %v1067_v3 = vpop.f32.mrb[3].mxu1 }
 0x398   : > { %v1068_v5 = vadd.f32 %v5157_v56, %v1067_v3  ;;  %5969 = vmatprep.mubr.f32.mxu0 %v1096_v63 }
 0x399   : > { %v1099_v8 = vmax.f32 %v1073_v2, 0.0  ;;  %5970 = vmatmul.mubr.f32.vlgmr.msra.gmra.mrb[8].mxu0 %v1097_v1 }
 0x39a   : > { %v1098_v9 = vmax.f32 %v1068_v5, 0.0  ;;  %6852 = vmatpush3.bf16.msra.mxu0 %v6849_v55  ;;  %v5933_v10 = vpop.f32.mrb[4].mxu1 }
 0x39b   : > { %v1083_v11 = vadd.f32 %v5933_v10, %v5157_v56  ;;  %v1077_v12 = vpop.f32.mrb[5].mxu1  ;;  %6854 = vmatprep.subr.bf16.mxu0 %v6853_v4 }
 0x39c   : > { %v1078_v14 = vadd.f32 %v5157_v56, %v1077_v12  ;;  %5972 = vmatprep.mubr.f32.mxu0 %v1098_v9 }
 0x39d   : > { %v1101_v17 = vmax.f32 %v1083_v11, 0.0  ;;  %5973 = vmatmul.mubr.f32.gmra.mrb[10].mxu0 %v1099_v8 }
 0x39e   : > { %v1100_v18 = vmax.f32 %v1078_v14, 0.0  ;;  %6856 = vmatpush3.bf16.msra.mxu0 %v6853_v4  ;;  %v5936_v19 = vpop.f32.mrb[6].mxu1 }
 0x39f   : > { %v1093_v20 = vadd.f32 %v5936_v19, %v5157_v56  ;;  %v1087_v21 = vpop.f32.mrb[7].mxu1  ;;  %6858 = vmatprep.subr.bf16.mxu0 %v6857_v13 }
 0x3a0   : > { %v1088_v23 = vadd.f32 %v5157_v56, %v1087_v21  ;;  %5975 = vmatprep.mubr.f32.mxu0 %v1100_v18 }
 0x3a1   : > { %v1103_v26 = vmax.f32 %v1093_v20, 0.0  ;;  %5976 = vmatmul.mubr.f32.gmra.mrb[12].mxu0 %v1101_v17 }
 0x3a2   : > { %v1102_v28 = vmax.f32 %v1088_v23, 0.0  ;;  %6860 = vmatpush3.bf16.msra.mxu0 %v6857_v13  ;;  %v5985_v29 = vpop.f32.mrb[8].mxu1  ;;  %v1787_v23 = vld [vmem:[#allocation15 + $0x80] sm:$0xff] }
 0x3a3   : > { %6862 = vmatprep.subr.bf16.mxu0 %v6861_v22  ;;  %v1506_v31 = vpop.f32.mrb[9].mxu1  ;;  %v1512_v51 = vadd.f32 %v5985_v29, %v8856_v27  ;;  %v6881_v25 = vpack.c.bf16 %v1788_v24, %v1787_v23 }
 0x3a4   : > { %5978 = vmatprep.mubr.f32.mxu0 %v1102_v28  ;;  %v1507_v34 = vadd.f32 %v8856_v27, %v1506_v31  ;;  %v1790_v28 = vld [vmem:[#allocation15 + $0x98] sm:$0xff]  ;;  %v1792_v31 = vld [vmem:[#allocation15 + $0xa8] sm:$0xff] }
 0x3a5   : > { %5979 = vmatmul.mubr.f32.gmra.mrb[14].mxu0 %v1103_v26  ;;  %v1586_v56 = vmax.f32 %v1512_v51, 0.0  ;;  %7297 = vmatprep.subr.bf16.mxu1 %v6881_v25  ;;  %v1789_v26 = vld [vmem:[#allocation15 + $0x90] sm:$0xff] }
 0x3a6   : > { %6864 = vmatpush3.bf16.msra.mxu0 %v6861_v22  ;;  %v1585_v35 = vmax.f32 %v1507_v34, 0.0  ;;  %v5988_v36 = vpop.f32.mrb[10].mxu1  ;;  %7305 = vmatpush3.bf16.msra.mxu1 %v6881_v25  ;;  %v6885_v29 = vpack.c.bf16 %v1790_v28, %v1789_v26  ;;  %v6893_v34 = vpack.c.bf16 %v1794_v33, %v1793_v32 }
 0x3a7   : > { %6866 = vmatprep.subr.bf16.mxu0 %v6865_v30  ;;  %v1516_v38 = vpop.f32.mrb[11].mxu1  ;;  %v1522_v57 = vadd.f32 %v5988_v36, %v8856_v27  ;;  %v1796_v36 = vld [vmem:[#allocation15 + $0xc8] sm:$0xff] }
 0x3a8   : > { %6039 = vmatprep.mubr.f32.mxu0 %v1585_v35  ;;  %v1517_v49 = vadd.f32 %v8856_v27, %v1516_v38  ;;  %7298 = vmatprep.subr.bf16.mxu1 %v6885_v29  ;;  %v1795_v35 = vld [vmem:[#allocation15 + $0xc0] sm:$0xff] }
 0x3a9   : > { %v1588_v62 = vmax.f32 %v1522_v57, 0.0  ;;  %v6897_v38 = vpack.c.bf16 %v1796_v36, %v1795_v35 }
 0x3aa   : > { %6868 = vmatpush3.bf16.msra.mxu0 %v6865_v30  ;;  %v5991_v41 = vpop.f32.mrb[12].mxu1  ;;  %v1587_v53 = vmax.f32 %v1517_v49, 0.0  ;;  %v1791_v30 = vld [vmem:[#allocation15 + $0xa0] sm:$0xff]  ;;  %7306 = vmatpush3.bf16.msra.mxu1 %v6885_v29 }
 0x3ab   : > { %6870 = vmatprep.subr.bf16.mxu0 %v6869_v37  ;;  %v1526_v43 = vpop.f32.mrb[13].mxu1  ;;  %v1532_v63 = vadd.f32 %v5991_v41, %v8856_v27  ;;  %v1799_v41 = vld [vmem:[#allocation15 + $0xe0] sm:$0xff] }
 0x3ac   : > { %v1527_v54 = vadd.f32 %v8856_v27, %v1526_v43 }
 0x3ad   : > { %v1590_v4 = vmax.f32 %v1532_v63, 0.0 }
 0x3ae   : > { %6872 = vmatpush3.bf16.msra.mxu0 %v6869_v37  ;;  %v5994_v46 = vpop.f32.mrb[14].mxu1  ;;  %v1589_v59 = vmax.f32 %v1527_v54, 0.0  ;;  %v1797_v37 = vld [vmem:[#allocation15 + $0xd0] sm:$0xff] }
 0x3af   : > { %6874 = vmatprep.subr.bf16.mxu0 %v6873_v42  ;;  %v1536_v48 = vpop.f32.mrb[15].mxu1  ;;  %v1542_v5 = vadd.f32 %v5994_v46, %v8856_v27  ;;  %v6901_v40 = vpack.c.bf16 %v1798_v39, %v1797_v37  ;;  %v6909_v46 = vpack.c.bf16 %v1802_v45, %v1801_v44 }
 0x3b0   : > { %v1537_v60 = vadd.f32 %v8856_v27, %v1536_v48 }
 0x3b1   : > { %v1592_v9 = vmax.f32 %v1542_v5, 0.0 }
 0x3b2   : > { %6876 = vmatpush3.bf16.msra.mxu0 %v6873_v42  ;;  %v5997_v50 = vpop.f32.mrb[16].mxu1  ;;  %v1591_v1 = vmax.f32 %v1537_v60, 0.0  ;;  %v1800_v42 = vld [vmem:[#allocation15 + $0xe8] sm:$0xff] }
 0x3b3   : > { %6878 = vmatprep.subr.bf16.mxu0 %v6877_v47  ;;  %v1546_v52 = vpop.f32.mrb[17].mxu1  ;;  %v1552_v10 = vadd.f32 %v5997_v50, %v8856_v27  ;;  %v6905_v43 = vpack.c.bf16 %v1800_v42, %v1799_v41 }
 0x3b4   : > { %v1547_v2 = vadd.f32 %v8856_v27, %v1546_v52 }
 0x3b5   : > { %v1594_v13 = vmax.f32 %v1552_v10, 0.0 }
 0x3b6   : > { %6880 = vmatpush3.bf16.msra.mxu0 %v6877_v47  ;;  %v6000_v55 = vpop.f32.mrb[18].mxu1  ;;  %v1593_v7 = vmax.f32 %v1547_v2, 0.0  ;;  %v5158_v47 = vld [vmem:[#allocation12 + $0x2] ss:$0 sm:$0xff] }
 0x3b7   : > { %v1556_v58 = vpop.f32.mrb[19].mxu1  ;;  %v1562_v14 = vadd.f32 %v6000_v55, %v8856_v27  ;;  %6882 = vmatprep.subr.bf16.mxu0 %v6881_v25 }
 0x3b8   : > { %v1557_v8 = vadd.f32 %v8856_v27, %v1556_v58 }
 0x3b9   : > { %6040 = vmatmul.mubr.f32.vlgmr.msra.gmra.mrb[16].mxu0 %v1586_v56  ;;  %v1596_v17 = vmax.f32 %v1562_v14, 0.0 }
 0x3ba   : > { %6042 = vmatprep.mubr.f32.mxu0 %v1587_v53  ;;  %v6003_v61 = vpop.f32.mrb[20].mxu1  ;;  %v1595_v11 = vmax.f32 %v1557_v8, 0.0  ;;  %6884 = vmatpush3.bf16.msra.mxu0 %v6881_v25 }
 0x3bb   : > { %v1566_v0 = vpop.f32.mrb[21].mxu1  ;;  %v1572_v18 = vadd.f32 %v6003_v61, %v8856_v27  ;;  %6886 = vmatprep.subr.bf16.mxu0 %v6885_v29 }
 0x3bc   : > { %v1567_v12 = vadd.f32 %v8856_v27, %v1566_v0  ;;  %v5179_v0 = vld [vmem:[#allocation16 + $0x1] ss:$0 sm:$0xff] }
 0x3bd   : > { %6043 = vmatmul.mubr.f32.gmra.mrb[18].mxu0 %v1588_v62  ;;  %v1598_v20 = vmax.f32 %v1572_v18, 0.0 }
 0x3be   : > { %6045 = vmatprep.mubr.f32.mxu0 %v1589_v59  ;;  %v6006_v3 = vpop.f32.mrb[22].mxu1  ;;  %v1597_v15 = vmax.f32 %v1567_v12, 0.0  ;;  %6888 = vmatpush3.bf16.msra.mxu0 %v6885_v29 }
 0x3bf   : > { %v1576_v6 = vpop.f32.mrb[23].mxu1  ;;  %v1582_v21 = vadd.f32 %v6006_v3, %v8856_v27 }
 0x3c0   : > { %v1577_v16 = vadd.f32 %v8856_v27, %v1576_v6  ;;  %v6889_v27 = vpack.c.bf16 %v1792_v31, %v1791_v30 }
 0x3c1   : > { %6046 = vmatmul.mubr.f32.gmra.mrb[20].mxu0 %v1590_v4  ;;  %v1600_v22 = vmax.f32 %v1582_v21, 0.0 }
 0x3c2   : > { %6048 = vmatprep.mubr.f32.mxu0 %v1591_v1  ;;  %v1599_v19 = vmax.f32 %v1577_v16, 0.0  ;;  %6890 = vmatprep.subr.bf16.mxu0 %v6889_v27 }
 0x3c3   : > { %7299 = vmatprep.subr.bf16.mxu1 %v6889_v27  ;;  %6892 = vmatpush3.bf16.msra.mxu0 %v6889_v27 }
 0x3c4   : > { %7307 = vmatpush3.bf16.msra.mxu1 %v6889_v27  ;;  %6894 = vmatprep.subr.bf16.mxu0 %v6893_v34 }
 0x3c5   : > { %6049 = vmatmul.mubr.f32.gmra.mrb[22].mxu0 %v1592_v9  ;;  %7300 = vmatprep.subr.bf16.mxu1 %v6893_v34 }
 0x3c6   : > { %6051 = vmatprep.mubr.f32.mxu0 %v1593_v7 }
 0x3c7   : > { %6896 = vmatpush3.bf16.msra.mxu0 %v6893_v34 }
 0x3c8   : > { %7308 = vmatpush3.bf16.msra.mxu1 %v6893_v34  ;;  %6898 = vmatprep.subr.bf16.mxu0 %v6897_v38 }
 0x3c9   : > { %6052 = vmatmul.mubr.f32.gmra.mrb[24].mxu0 %v1594_v13  ;;  %7301 = vmatprep.subr.bf16.mxu1 %v6897_v38 }
 0x3ca   : > { %6054 = vmatprep.mubr.f32.mxu0 %v1595_v11 }
 0x3cb   : > { %6900 = vmatpush3.bf16.msra.mxu0 %v6897_v38 }
 0x3cc   : > { %7309 = vmatpush3.bf16.msra.mxu1 %v6897_v38  ;;  %6902 = vmatprep.subr.bf16.mxu0 %v6901_v40 }
 0x3cd   : > { %6055 = vmatmul.mubr.f32.gmra.mrb[26].mxu0 %v1596_v17  ;;  %7302 = vmatprep.subr.bf16.mxu1 %v6901_v40 }
 0x3ce   : > { %6057 = vmatprep.mubr.f32.mxu0 %v1597_v15 }
 0x3cf   : > { %6904 = vmatpush3.bf16.msra.mxu0 %v6901_v40 }
 0x3d0   : > { %7310 = vmatpush3.bf16.msra.mxu1 %v6901_v40  ;;  %6906 = vmatprep.subr.bf16.mxu0 %v6905_v43 }
 0x3d1   : > { %6058 = vmatmul.mubr.f32.gmra.mrb[28].mxu0 %v1598_v20  ;;  %7303 = vmatprep.subr.bf16.mxu1 %v6905_v43 }
 0x3d2   : > { %6060 = vmatprep.mubr.f32.mxu0 %v1599_v19 }
 0x3d3   : > { %6908 = vmatpush3.bf16.msra.mxu0 %v6905_v43 }
 0x3d4   : > { %7311 = vmatpush3.bf16.msra.mxu1 %v6905_v43  ;;  %6910 = vmatprep.subr.bf16.mxu0 %v6909_v46 }
 0x3d5   : > { %6061 = vmatmul.mubr.f32.gmra.mrb[30].mxu0 %v1600_v22  ;;  %7304 = vmatprep.subr.bf16.mxu1 %v6909_v46 }
 0x3d7   : > { %6912 = vmatpush3.bf16.msra.mxu0 %v6909_v46 }
 0x3d8   : > { %7312 = vmatpush3.bf16.msra.mxu1 %v6909_v46 }
 0x46c   : > { %v5971_v48 = vpop.f32.mrb[8].mxu0 }
 0x46d   : > { %v8874_v49 = vadd.f32 %v5971_v48, %v5158_v47  ;;  %v1195_v50 = vpop.f32.mrb[9].mxu0 }
 0x46e   : > { %v8877_v52 = vadd.f32 %v5158_v47, %v1195_v50  ;;  %v5180_v50 = vld [vmem:[#allocation16 + $0x2] ss:$0 sm:$0xff] }
 0x46f   : > { %1240 = vadd.xlane.f32.xlu0 %v8874_v49 }
 0x470   : > { %v5974_v51 = vpop.f32.mrb[10].mxu0 }
 0x471   : > { %v8879_v53 = vadd.f32 %v5974_v51, %v5158_v47  ;;  %v1205_v54 = vpop.f32.mrb[11].mxu0 }
 0x472   : > { %v8882_v55 = vadd.f32 %v5158_v47, %v1205_v54 }
 0x473   : > { %1244 = vadd.xlane.f32.xlu1 %v8879_v53  ;;  %1238 = vadd.xlane.f32.xlu0 %v8877_v52 }
 0x474   : > { %v5977_v56 = vpop.f32.mrb[12].mxu0 }
 0x475   : > { %v1215_v57 = vpop.f32.mrb[13].mxu0  ;;  %v8887_v59 = vadd.f32 %v5977_v56, %v5158_v47 }
 0x476   : > { %v8885_v58 = vadd.f32 %v5158_v47, %v1215_v57 }
 0x477   : > { %1242 = vadd.xlane.f32.xlu1 %v8882_v55 }
 0x478   : > { %v5980_v60 = vpop.f32.mrb[14].mxu0  ;;  %1246 = vadd.xlane.f32.xlu0 %v8885_v58 }
 0x479   : > { %v1225_v61 = vpop.f32.mrb[15].mxu0  ;;  %v8893_v63 = vadd.f32 %v5980_v60, %v5158_v47 }
 0x47a   : > { %v8891_v62 = vadd.f32 %v5158_v47, %v1225_v61 }
 0x47b   : > { %1248 = vadd.xlane.f32.xlu1 %v8887_v59 }
 0x47c   : > { %1250 = vadd.xlane.f32.xlu0 %v8891_v62 }
 0x47f   : > { %1252 = vadd.xlane.f32.xlu1 %v8893_v63 }
 0x48c   : > { %v6041_v1 = vpop.f32.mrb[16].mxu0 }
 0x48d   : > { %v1697_v2 = vadd.f32 %v6041_v1, %v5179_v0  ;;  %v1691_v3 = vpop.f32.mrb[17].mxu0 }
 0x48e   : > { %v1692_v4 = vadd.f32 %v5179_v0, %v1691_v3 }
 0x48f   : > { %v1771_v7 = vmax.f32 %v1697_v2, 0.0 }
 0x490   : > { %v1770_v5 = vmax.f32 %v1692_v4, 0.0  ;;  %v6044_v6 = vpop.f32.mrb[18].mxu0 }
 0x491   : > { %v1707_v8 = vadd.f32 %v6044_v6, %v5179_v0  ;;  %v1701_v9 = vpop.f32.mrb[19].mxu0 }
 0x492   : > { %v1702_v10 = vadd.f32 %v5179_v0, %v1701_v9  ;;  %6095 = vmatprep.mubr.f32.mxu0 %v1770_v5 }
 0x493   : > { %6096 = vmatmul.mubr.f32.vlgmr.msra.gmra.mrb[32].mxu0 %v1771_v7  ;;  %v1773_v13 = vmax.f32 %v1707_v8, 0.0 }
 0x494   : > { %v1772_v11 = vmax.f32 %v1702_v10, 0.0  ;;  %v6047_v12 = vpop.f32.mrb[20].mxu0 }
 0x495   : > { %v1717_v14 = vadd.f32 %v6047_v12, %v5179_v0  ;;  %v1711_v15 = vpop.f32.mrb[21].mxu0 }
 0x496   : > { %v1712_v16 = vadd.f32 %v5179_v0, %v1711_v15  ;;  %6098 = vmatprep.mubr.f32.mxu1 %v1772_v11 }
 0x497   : > { %6099 = vmatmul.mubr.f32.vlgmr.msra.gmra.mrb[24].mxu1 %v1773_v13  ;;  %v1775_v19 = vmax.f32 %v1717_v14, 0.0 }
 0x498   : > { %v1774_v17 = vmax.f32 %v1712_v16, 0.0  ;;  %v6050_v18 = vpop.f32.mrb[22].mxu0 }
 0x499   : > { %v1727_v20 = vadd.f32 %v6050_v18, %v5179_v0  ;;  %v1721_v21 = vpop.f32.mrb[23].mxu0 }
 0x49a   : > { %v1722_v22 = vadd.f32 %v5179_v0, %v1721_v21  ;;  %6101 = vmatprep.mubr.f32.mxu1 %v1774_v17 }
 0x49b   : > { %6102 = vmatmul.mubr.f32.gmra.mrb[26].mxu1 %v1775_v19  ;;  %v1777_v25 = vmax.f32 %v1727_v20, 0.0 }
 0x49c   : > { %v1776_v23 = vmax.f32 %v1722_v22, 0.0  ;;  %v6053_v24 = vpop.f32.mrb[24].mxu0 }
 0x49d   : > { %v1737_v26 = vadd.f32 %v6053_v24, %v5179_v0  ;;  %v1731_v28 = vpop.f32.mrb[25].mxu0 }
 0x49e   : > { %v1732_v29 = vadd.f32 %v5179_v0, %v1731_v28  ;;  %6104 = vmatprep.mubr.f32.mxu1 %v1776_v23 }
 0x49f   : > { %6105 = vmatmul.mubr.f32.gmra.mrb[28].mxu1 %v1777_v25  ;;  %v1779_v27 = vmax.f32 %v1737_v26, 0.0 }
 0x4a0   : > { %v1778_v30 = vmax.f32 %v1732_v29, 0.0  ;;  %v6056_v31 = vpop.f32.mrb[26].mxu0 }
 0x4a1   : > { %v1747_v32 = vadd.f32 %v6056_v31, %v5179_v0  ;;  %v1741_v33 = vpop.f32.mrb[27].mxu0 }
 0x4a2   : > { %v1742_v34 = vadd.f32 %v5179_v0, %v1741_v33  ;;  %6107 = vmatprep.mubr.f32.mxu1 %v1778_v30 }
 0x4a3   : > { %6108 = vmatmul.mubr.f32.gmra.mrb[30].mxu1 %v1779_v27  ;;  %v1781_v37 = vmax.f32 %v1747_v32, 0.0 }
 0x4a4   : > { %v1780_v35 = vmax.f32 %v1742_v34, 0.0  ;;  %v6059_v36 = vpop.f32.mrb[28].mxu0 }
 0x4a5   : > { %v1757_v38 = vadd.f32 %v6059_v36, %v5179_v0  ;;  %v1751_v39 = vpop.f32.mrb[29].mxu0 }
 0x4a6   : > { %v1752_v40 = vadd.f32 %v5179_v0, %v1751_v39  ;;  %6110 = vmatprep.mubr.f32.mxu1 %v1780_v35 }
 0x4a7   : > { %6111 = vmatmul.mubr.f32.gmra.mrb[32].mxu1 %v1781_v37  ;;  %v1783_v43 = vmax.f32 %v1757_v38, 0.0 }
 0x4a8   : > { %v1782_v41 = vmax.f32 %v1752_v40, 0.0  ;;  %v6062_v42 = vpop.f32.mrb[30].mxu0 }
 0x4a9   : > { %v1767_v44 = vadd.f32 %v6062_v42, %v5179_v0  ;;  %v1761_v45 = vpop.f32.mrb[31].mxu0 }
 0x4aa   : > { %v1762_v46 = vadd.f32 %v5179_v0, %v1761_v45  ;;  %6113 = vmatprep.mubr.f32.mxu1 %v1782_v41 }
 0x4ab   : > { %6114 = vmatmul.mubr.f32.gmra.mrb[34].mxu1 %v1783_v43  ;;  %v1785_v48 = vmax.f32 %v1767_v44, 0.0 }
 0x4ac   : > { %v1784_v47 = vmax.f32 %v1762_v46, 0.0 }
 0x4ae   : > { %6116 = vmatprep.mubr.f32.mxu1 %v1784_v47 }
 0x4af   : > { %6117 = vmatmul.mubr.f32.gmra.mrb[36].mxu1 %v1785_v48 }
 0x4fc   : > { %v1241_v12 = vpop.xlane.xlu0 %1240 }
 0x4fd   : > { %v1256_v23 = vmul.f32 0.0078125, %v1241_v12 }
 0x4ff   : > { %v8941_v31 = vsub.f32 %v8874_v49, %v1256_v23 }
 0x500   : > { %v1245_v10 = vpop.xlane.xlu1 %1244  ;;  %v1239_v21 = vpop.xlane.xlu0 %1238 }
 0x501   : > { %v1255_v26 = vmul.f32 0.0078125, %v1239_v21  ;;  %v1258_v27 = vmul.f32 0.0078125, %v1245_v10  ;;  %v1272_v39 = vmul.f32 %v8941_v31, %v8941_v31 }
 0x503   : > { %v8946_v35 = vsub.f32 %v8877_v52, %v1255_v26  ;;  %v8953_v38 = vsub.f32 %v8879_v53, %v1258_v27 }
 0x504   : > { %v1243_v19 = vpop.xlane.xlu1 %1242 }
 0x505   : > { %v1247_v32 = vpop.xlane.xlu0 %1246  ;;  %v1257_v36 = vmul.f32 0.0078125, %v1243_v19  ;;  %v1271_v42 = vmul.f32 %v8946_v35, %v8946_v35  ;;  %v1274_v45 = vmul.f32 %v8953_v38, %v8953_v38 }
 0x506   : > { %v1259_v41 = vmul.f32 0.0078125, %v1247_v32 }
 0x507   : > { %v8958_v40 = vsub.f32 %v8882_v55, %v1257_v36 }
 0x508   : > { %v1249_v29 = vpop.xlane.xlu1 %1248  ;;  %v8968_v46 = vsub.f32 %v8885_v58, %v1259_v41 }
 0x509   : > { %v1260_v49 = vmul.f32 0.0078125, %v1249_v29  ;;  %v1251_v43 = vpop.xlane.xlu0 %1250  ;;  %v1273_v47 = vmul.f32 %v8958_v40, %v8958_v40 }
 0x50a   : > { %v1261_v55 = vmul.f32 0.0078125, %v1251_v43 }
 0x50b   : > { %v8963_v44 = vsub.f32 %v8887_v59, %v1260_v49 }
 0x50c   : > { %v1253_v52 = vpop.xlane.xlu1 %1252 }
 0x50d   : > { %v1262_v53 = vmul.f32 0.0078125, %v1253_v52  ;;  %v1276_v59 = vmul.f32 %v8963_v44, %v8963_v44 }
 0x50f   : > { %v8973_v48 = vsub.f32 %v8893_v63, %v1262_v53 }
 0x511   : > { %v1278_v58 = vmul.f32 %v8973_v48, %v8973_v48 }
 0x566   : > { %v6097_v51 = vpop.f32.mrb[32].mxu0 }
 0x567   : > { %v8898_v54 = vadd.f32 %v6097_v51, %v5180_v50  ;;  %v1877_v56 = vpop.f32.mrb[33].mxu0  ;;  %v1275_v51 = vmul.f32 %v8968_v46, %v8968_v46 }
 0x568   : > { %v8900_v57 = vadd.f32 %v5180_v50, %v1877_v56 }
 0x569   : > { %1962 = vadd.xlane.f32.xlu1 %v8898_v54 }
 0x56a   : > { %v6100_v60 = vpop.f32.mrb[24].mxu1  ;;  %1960 = vadd.xlane.f32.xlu0 %v8900_v57 }
 0x56b   : > { %v8904_v61 = vadd.f32 %v6100_v60, %v5180_v50  ;;  %v1887_v0 = vpop.f32.mrb[25].mxu1 }
 0x56c   : > { %v8906_v1 = vadd.f32 %v5180_v50, %v1887_v0 }
 0x56d   : > { %1966 = vadd.xlane.f32.xlu1 %v8904_v61 }
 0x56e   : > { %v6103_v2 = vpop.f32.mrb[26].mxu1  ;;  %1964 = vadd.xlane.f32.xlu0 %v8906_v1 }
 0x56f   : > { %v8910_v3 = vadd.f32 %v6103_v2, %v5180_v50  ;;  %v1897_v4 = vpop.f32.mrb[27].mxu1 }
 0x570   : > { %v8912_v5 = vadd.f32 %v5180_v50, %v1897_v4 }
 0x571   : > { %1970 = vadd.xlane.f32.xlu1 %v8910_v3 }
 0x572   : > { %v6106_v6 = vpop.f32.mrb[28].mxu1  ;;  %1968 = vadd.xlane.f32.xlu0 %v8912_v5 }
 0x573   : > { %v8916_v7 = vadd.f32 %v6106_v6, %v5180_v50  ;;  %v1907_v8 = vpop.f32.mrb[29].mxu1 }
 0x574   : > { %v8918_v9 = vadd.f32 %v5180_v50, %v1907_v8 }
 0x575   : > { %1974 = vadd.xlane.f32.xlu1 %v8916_v7 }
 0x576   : > { %v6109_v11 = vpop.f32.mrb[30].mxu1  ;;  %1972 = vadd.xlane.f32.xlu0 %v8918_v9 }
 0x577   : > { %v8922_v13 = vadd.f32 %v6109_v11, %v5180_v50  ;;  %v1917_v14 = vpop.f32.mrb[31].mxu1 }
 0x578   : > { %v8924_v15 = vadd.f32 %v5180_v50, %v1917_v14 }
 0x579   : > { %1978 = vadd.xlane.f32.xlu1 %v8922_v13 }
 0x57a   : > { %v6112_v16 = vpop.f32.mrb[32].mxu1  ;;  %1976 = vadd.xlane.f32.xlu0 %v8924_v15 }
 0x57b   : > { %v8928_v17 = vadd.f32 %v6112_v16, %v5180_v50  ;;  %v1927_v18 = vpop.f32.mrb[33].mxu1 }
 0x57c   : > { %v8930_v20 = vadd.f32 %v5180_v50, %v1927_v18 }
 0x57d   : > { %1982 = vadd.xlane.f32.xlu1 %v8928_v17 }
 0x57e   : > { %v6115_v22 = vpop.f32.mrb[34].mxu1  ;;  %1980 = vadd.xlane.f32.xlu0 %v8930_v20 }
 0x57f   : > { %v8934_v24 = vadd.f32 %v6115_v22, %v5180_v50  ;;  %v1937_v25 = vpop.f32.mrb[35].mxu1 }
 0x580   : > { %v8936_v28 = vadd.f32 %v5180_v50, %v1937_v25 }
 0x581   : > { %1986 = vadd.xlane.f32.xlu1 %v8934_v24 }
 0x582   : > { %v6118_v30 = vpop.f32.mrb[36].mxu1  ;;  %1984 = vadd.xlane.f32.xlu0 %v8936_v28 }
 0x583   : > { %v8943_v33 = vadd.f32 %v6118_v30, %v5180_v50  ;;  %v1947_v34 = vpop.f32.mrb[37].mxu1 }
 0x584   : > { %v8948_v37 = vadd.f32 %v5180_v50, %v1947_v34  ;;  %v8978_v50 = vsub.f32 %v8891_v62, %v1261_v55 }
 0x585   : > { %1990 = vadd.xlane.f32.xlu1 %v8943_v33 }
 0x586   : > { %1988 = vadd.xlane.f32.xlu0 %v8948_v37  ;;  %v1277_v56 = vmul.f32 %v8978_v50, %v8978_v50 }
 0x589   : > { %1281 = vadd.xlane.f32.xlu1 %v1272_v39 }
 0x58a   : > { %1279 = vadd.xlane.f32.xlu0 %v1271_v42 }
 0x58d   : > { %1285 = vadd.xlane.f32.xlu1 %v1274_v45 }
 0x58e   : > { %1283 = vadd.xlane.f32.xlu0 %v1273_v47 }
 0x591   : > { %1289 = vadd.xlane.f32.xlu1 %v1276_v59 }
 0x592   : > { %1287 = vadd.xlane.f32.xlu0 %v1275_v51 }
 0x595   : > { %1293 = vadd.xlane.f32.xlu1 %v1278_v58 }
 0x596   : > { %1291 = vadd.xlane.f32.xlu0 %v1277_v56 }
 0x5f6   : > { %v1963_v63 = vpop.xlane.xlu1 %1962 }
 0x5f7   : > { %v1993_v60 = vmul.f32 0.0078125, %v1963_v63  ;;  %v1961_v0 = vpop.xlane.xlu0 %1960 }
 0x5f8   : > { %v1992_v2 = vmul.f32 0.0078125, %v1961_v0 }
 0x5f9   : > { %v8987_v62 = vsub.f32 %v8898_v54, %v1993_v60 }
 0x5fa   : > { %v8990_v4 = vsub.f32 %v8900_v57, %v1992_v2  ;;  %v1967_v6 = vpop.xlane.xlu1 %1966 }
 0x5fb   : > { %v1995_v8 = vmul.f32 0.0078125, %v1967_v6  ;;  %v1965_v10 = vpop.xlane.xlu0 %1964  ;;  %v2025_v11 = vmul.f32 %v8987_v62, %v8987_v62 }
 0x5fc   : > { %v1994_v12 = vmul.f32 0.0078125, %v1965_v10  ;;  %v2024_v14 = vmul.f32 %v8990_v4, %v8990_v4 }
 0x5fd   : > { %v8997_v16 = vsub.f32 %v8904_v61, %v1995_v8  ;;  %2042 = vadd.xlane.f32.xlu1 %v2025_v11 }
 0x5fe   : > { %v9000_v54 = vsub.f32 %v8906_v1, %v1994_v12  ;;  %v1971_v18 = vpop.xlane.xlu1 %1970  ;;  %2040 = vadd.xlane.f32.xlu0 %v2024_v14 }
 0x5ff   : > { %v1997_v57 = vmul.f32 0.0078125, %v1971_v18  ;;  %v1969_v19 = vpop.xlane.xlu0 %1968  ;;  %v2027_v21 = vmul.f32 %v8997_v16, %v8997_v16 }
 0x600   : > { %v1996_v22 = vmul.f32 0.0078125, %v1969_v19  ;;  %v2026_v23 = vmul.f32 %v9000_v54, %v9000_v54 }
 0x601   : > { %v9007_v25 = vsub.f32 %v8910_v3, %v1997_v57  ;;  %2046 = vadd.xlane.f32.xlu1 %v2027_v21 }
 0x602   : > { %v9010_v61 = vsub.f32 %v8912_v5, %v1996_v22  ;;  %v1975_v1 = vpop.xlane.xlu1 %1974  ;;  %2044 = vadd.xlane.f32.xlu0 %v2026_v23 }
 0x603   : > { %v1999_v26 = vmul.f32 0.0078125, %v1975_v1  ;;  %v1973_v29 = vpop.xlane.xlu0 %1972  ;;  %v2029_v30 = vmul.f32 %v9007_v25, %v9007_v25 }
 0x604   : > { %v1998_v27 = vmul.f32 0.0078125, %v1973_v29  ;;  %v2028_v32 = vmul.f32 %v9010_v61, %v9010_v61 }
 0x605   : > { %v9017_v34 = vsub.f32 %v8916_v7, %v1999_v26  ;;  %2050 = vadd.xlane.f32.xlu1 %v2029_v30 }
 0x606   : > { %v9020_v3 = vsub.f32 %v8918_v9, %v1998_v27  ;;  %v1979_v5 = vpop.xlane.xlu1 %1978  ;;  %2048 = vadd.xlane.f32.xlu0 %v2028_v32 }
 0x607   : > { %v2001_v36 = vmul.f32 0.0078125, %v1979_v5  ;;  %v1977_v49 = vpop.xlane.xlu0 %1976  ;;  %v2031_v39 = vmul.f32 %v9017_v34, %v9017_v34 }
 0x608   : > { %v2000_v41 = vmul.f32 0.0078125, %v1977_v49  ;;  %v2030_v52 = vmul.f32 %v9020_v3, %v9020_v3 }
 0x609   : > { %v9027_v42 = vsub.f32 %v8922_v13, %v2001_v36  ;;  %2054 = vadd.xlane.f32.xlu1 %v2031_v39 }
 0x60a   : > { %v9030_v7 = vsub.f32 %v8924_v15, %v2000_v41  ;;  %v1983_v9 = vpop.xlane.xlu1 %1982  ;;  %2052 = vadd.xlane.f32.xlu0 %v2030_v52 }
 0x60b   : > { %v2003_v43 = vmul.f32 0.0078125, %v1983_v9  ;;  %v1981_v53 = vpop.xlane.xlu0 %1980  ;;  %v2033_v45 = vmul.f32 %v9027_v42, %v9027_v42 }
 0x60c   : > { %v2002_v55 = vmul.f32 0.0078125, %v1981_v53  ;;  %v2032_v47 = vmul.f32 %v9030_v7, %v9030_v7 }
 0x60d   : > { %v9037_v59 = vsub.f32 %v8928_v17, %v2003_v43  ;;  %2058 = vadd.xlane.f32.xlu1 %v2033_v45  ;;  %v5159_v45 = vld [vmem:[#allocation12 + $0x3] ss:$0 sm:$0xff] }
 0x60e   : > { %v9040_v13 = vsub.f32 %v8930_v20, %v2002_v55  ;;  %v1987_v15 = vpop.xlane.xlu1 %1986  ;;  %2056 = vadd.xlane.f32.xlu0 %v2032_v47 }
 0x60f   : > { %v2005_v51 = vmul.f32 0.0078125, %v1987_v15  ;;  %v1985_v58 = vpop.xlane.xlu0 %1984  ;;  %v2035_v56 = vmul.f32 %v9037_v59, %v9037_v59 }
 0x610   : > { %v2004_v63 = vmul.f32 0.0078125, %v1985_v58  ;;  %v2034_v60 = vmul.f32 %v9040_v13, %v9040_v13  ;;  %v5160_v58 = vld [vmem:[#allocation12 + $0x4] ss:$0 sm:$0xff] }
 0x611   : > { %v9047_v0 = vsub.f32 %v8934_v24, %v2005_v51  ;;  %2062 = vadd.xlane.f32.xlu1 %v2035_v56 }
 0x612   : > { %v9050_v17 = vsub.f32 %v8936_v28, %v2004_v63  ;;  %v1991_v20 = vpop.xlane.xlu1 %1990  ;;  %2060 = vadd.xlane.f32.xlu0 %v2034_v60 }
 0x613   : > { %v2007_v2 = vmul.f32 0.0078125, %v1991_v20  ;;  %v1989_v6 = vpop.xlane.xlu0 %1988  ;;  %v2037_v8 = vmul.f32 %v9047_v0, %v9047_v0 }
 0x614   : > { %v2006_v10 = vmul.f32 0.0078125, %v1989_v6  ;;  %v2036_v11 = vmul.f32 %v9050_v17, %v9050_v17 }
 0x615   : > { %v9057_v12 = vsub.f32 %v8943_v33, %v2007_v2  ;;  %2066 = vadd.xlane.f32.xlu1 %v2037_v8 }
 0x616   : > { %v9060_v24 = vsub.f32 %v8948_v37, %v2006_v10  ;;  %v1282_v28 = vpop.xlane.xlu1 %1281  ;;  %2064 = vadd.xlane.f32.xlu0 %v2036_v11 }
 0x617   : > { %v1296_v14 = vmul.f32 0.0078125, %v1282_v28  ;;  %v1280_v18 = vpop.xlane.xlu0 %1279  ;;  %v2039_v57 = vmul.f32 %v9057_v12, %v9057_v12 }
 0x618   : > { %v1295_v19 = vmul.f32 0.0078125, %v1280_v18  ;;  %v2038_v21 = vmul.f32 %v9060_v24, %v9060_v24 }
 0x619   : > { %v1304_v22 = vadd.f32 1e-05, %v1296_v14  ;;  %2070 = vadd.xlane.f32.xlu1 %v2039_v57 }
 0x61a   : > { %v1303_v23 = vadd.f32 1e-05, %v1295_v19  ;;  %v1286_v33 = vpop.xlane.xlu1 %1285  ;;  %2068 = vadd.xlane.f32.xlu0 %v2038_v21 }
 0x61b   : > { %7556 = vrsqrt.f32 %v1304_v22  ;;  %v1298_v1 = vmul.f32 0.0078125, %v1286_v33  ;;  %v1284_v37 = vpop.xlane.xlu0 %1283 }
 0x61c   : > { %7558 = vrsqrt.f32 %v1303_v23  ;;  %v1297_v26 = vmul.f32 0.0078125, %v1284_v37 }
 0x61d   : > { %v1306_v29 = vadd.f32 1e-05, %v1298_v1 }
 0x61e   : > { %v1305_v30 = vadd.f32 1e-05, %v1297_v26  ;;  %v1290_v27 = vpop.xlane.xlu1 %1289 }
 0x61f   : > { %7560 = vrsqrt.f32 %v1306_v29  ;;  %v1300_v32 = vmul.f32 0.0078125, %v1290_v27  ;;  %v1288_v5 = vpop.xlane.xlu0 %1287 }
 0x620   : > { %7562 = vrsqrt.f32 %v1305_v30  ;;  %v1299_v36 = vmul.f32 0.0078125, %v1288_v5 }
 0x621   : > { %v1308_v49 = vadd.f32 1e-05, %v1300_v32 }
 0x622   : > { %v1307_v39 = vadd.f32 1e-05, %v1299_v36  ;;  %v1294_v41 = vpop.xlane.xlu1 %1293 }
 0x623   : > { %7564 = vrsqrt.f32 %v1308_v49  ;;  %v1302_v52 = vmul.f32 0.0078125, %v1294_v41  ;;  %v1292_v9 = vpop.xlane.xlu0 %1291 }
 0x624   : > { %7566 = vrsqrt.f32 %v1307_v39  ;;  %v1301_v43 = vmul.f32 0.0078125, %v1292_v9 }
 0x625   : > { %v7557_v53 = vpop.eup %7556  ;;  %v1310_v55 = vadd.f32 1e-05, %v1302_v52 }
 0x626   : > { %v7559_v47 = vpop.eup %7558  ;;  %v1320_v15 = vmul.f32 %v7557_v53, %v8941_v31  ;;  %v1309_v51 = vadd.f32 1e-05, %v1301_v43 }
 0x627   : > { %v1319_v56 = vmul.f32 %v7559_v47, %v8946_v35  ;;  %7568 = vrsqrt.f32 %v1310_v55 }
 0x628   : > { %v1334_v63 = vmul.f32 %v5159_v45, %v1320_v15  ;;  %7570 = vrsqrt.f32 %v1309_v51 }
 0x629   : > { %v7561_v60 = vpop.eup %7560  ;;  %v1333_v20 = vmul.f32 %v5159_v45, %v1319_v56 }
 0x62a   : > { %v7563_v2 = vpop.eup %7562  ;;  %v1348_v6 = vadd.f32 %v5160_v58, %v1334_v63  ;;  %v1322_v8 = vmul.f32 %v7561_v60, %v8953_v38 }
 0x62b   : > { %v1347_v10 = vadd.f32 %v5160_v58, %v1333_v20  ;;  %v1321_v11 = vmul.f32 %v7563_v2, %v8958_v40  ;;  %v9074_v2 = vld [vmem:[#allocation16 + $0x3] ss:$0 sm:$0xff] }
 0x62c   : > { %1356 = vst [vmem:[#allocation2 + $0x8] sm:$0xff] %v1348_v6  ;;  %v1336_v28 = vmul.f32 %v5159_v45, %v1322_v8 }
 0x62d   : > { %v7565_v14 = vpop.eup %7564  ;;  %1355 = vst [vmem:[#allocation2] sm:$0xff] %v1347_v10  ;;  %v1335_v31 = vmul.f32 %v5159_v45, %v1321_v11 }
 0x62e   : > { %v7567_v18 = vpop.eup %7566  ;;  %v1350_v57 = vadd.f32 %v5160_v58, %v1336_v28  ;;  %v1324_v35 = vmul.f32 %v7565_v14, %v8963_v44  ;;  %v9077_v14 = vld [vmem:[#allocation16 + $0x4] ss:$0 sm:$0xff] }
 0x62f   : > { %v1349_v19 = vadd.f32 %v5160_v58, %v1335_v31  ;;  %v1323_v21 = vmul.f32 %v7567_v18, %v8968_v46 }
 0x630   : > { %1358 = vst [vmem:[#allocation2 + $0x18] sm:$0xff] %v1350_v57  ;;  %v1338_v22 = vmul.f32 %v5159_v45, %v1324_v35 }
 0x631   : > { %v7569_v23 = vpop.eup %7568  ;;  %1357 = vst [vmem:[#allocation2 + $0x10] sm:$0xff] %v1349_v19  ;;  %v1337_v38 = vmul.f32 %v5159_v45, %v1323_v21 }
 0x632   : > { %v7571_v33 = vpop.eup %7570  ;;  %v1352_v1 = vadd.f32 %v5160_v58, %v1338_v22  ;;  %v1326_v40 = vmul.f32 %v7569_v23, %v8973_v48 }
 0x633   : > { %v1351_v37 = vadd.f32 %v5160_v58, %v1337_v38  ;;  %v1325_v26 = vmul.f32 %v7571_v33, %v8978_v50 }
 0x634   : > { %1360 = vst [vmem:[#allocation2 + $0x28] sm:$0xff] %v1352_v1  ;;  %v1340_v29 = vmul.f32 %v5159_v45, %v1326_v40 }
 0x635   : > { %1359 = vst [vmem:[#allocation2 + $0x20] sm:$0xff] %v1351_v37  ;;  %v1339_v30 = vmul.f32 %v5159_v45, %v1325_v26 }
 0x636   : > { %v1354_v44 = vadd.f32 %v5160_v58, %v1340_v29 }
 0x637   : > { %v1353_v27 = vadd.f32 %v5160_v58, %v1339_v30 }
 0x638   : > { %1362 = vst [vmem:[#allocation2 + $0x38] sm:$0xff] %v1354_v44 }
 0x639   : > { %1361 = vst [vmem:[#allocation2 + $0x30] sm:$0xff] %v1353_v27 }
 0x68a   : > { %v2043_v46 = vpop.xlane.xlu1 %2042 }
 0x68b   : > { %v2073_v32 = vmul.f32 0.0078125, %v2043_v46  ;;  %v2041_v5 = vpop.xlane.xlu0 %2040 }
 0x68c   : > { %v2072_v36 = vmul.f32 0.0078125, %v2041_v5 }
 0x68d   : > { %v2089_v49 = vadd.f32 1e-05, %v2073_v32 }
 0x68e   : > { %v2088_v39 = vadd.f32 1e-05, %v2072_v36  ;;  %v2047_v41 = vpop.xlane.xlu1 %2046 }
 0x68f   : > { %7572 = vrsqrt.f32 %v2089_v49  ;;  %v2075_v48 = vmul.f32 0.0078125, %v2047_v41  ;;  %v2045_v52 = vpop.xlane.xlu0 %2044 }
 0x690   : > { %7574 = vrsqrt.f32 %v2088_v39  ;;  %v2074_v50 = vmul.f32 0.0078125, %v2045_v52 }
 0x691   : > { %v2091_v9 = vadd.f32 1e-05, %v2075_v48 }
 0x692   : > { %v2090_v43 = vadd.f32 1e-05, %v2074_v50  ;;  %v2051_v53 = vpop.xlane.xlu1 %2050 }
 0x693   : > { %7576 = vrsqrt.f32 %v2091_v9  ;;  %v2077_v45 = vmul.f32 0.0078125, %v2051_v53  ;;  %v2049_v55 = vpop.xlane.xlu0 %2048 }
 0x694   : > { %7578 = vrsqrt.f32 %v2090_v43  ;;  %v2076_v47 = vmul.f32 0.0078125, %v2049_v55 }
 0x695   : > { %v2093_v15 = vadd.f32 1e-05, %v2077_v45 }
 0x696   : > { %v2092_v51 = vadd.f32 1e-05, %v2076_v47  ;;  %v2055_v58 = vpop.xlane.xlu1 %2054 }
 0x697   : > { %7580 = vrsqrt.f32 %v2093_v15  ;;  %v2079_v56 = vmul.f32 0.0078125, %v2055_v58  ;;  %v2053_v63 = vpop.xlane.xlu0 %2052 }
 0x698   : > { %7582 = vrsqrt.f32 %v2092_v51  ;;  %v2078_v60 = vmul.f32 0.0078125, %v2053_v63 }
 0x699   : > { %v7573_v20 = vpop.eup %7572  ;;  %v2095_v6 = vadd.f32 1e-05, %v2079_v56 }
 0x69a   : > { %v7575_v8 = vpop.eup %7574  ;;  %v2121_v10 = vmul.f32 %v7573_v20, %v8987_v62  ;;  %v2094_v11 = vadd.f32 1e-05, %v2078_v60  ;;  %v2059_v28 = vpop.xlane.xlu1 %2058 }
 0x69b   : > { %v2120_v31 = vmul.f32 %v7575_v8, %v8990_v4  ;;  %7584 = vrsqrt.f32 %v2095_v6  ;;  %v2081_v18 = vmul.f32 0.0078125, %v2059_v28  ;;  %v2057_v57 = vpop.xlane.xlu0 %2056 }
 0x69c   : > { %v2143_v35 = vmul.f32 %v9074_v2, %v2121_v10  ;;  %7586 = vrsqrt.f32 %v2094_v11  ;;  %v2080_v19 = vmul.f32 0.0078125, %v2057_v57 }
 0x69d   : > { %v7577_v21 = vpop.eup %7576  ;;  %v2142_v22 = vmul.f32 %v9074_v2, %v2120_v31  ;;  %v2097_v23 = vadd.f32 1e-05, %v2081_v18 }
 0x69e   : > { %v7579_v38 = vpop.eup %7578  ;;  %v2165_v62 = vadd.f32 %v9077_v14, %v2143_v35  ;;  %v2123_v33 = vmul.f32 %v7577_v21, %v8997_v16  ;;  %v2096_v1 = vadd.f32 1e-05, %v2080_v19  ;;  %v2063_v40 = vpop.xlane.xlu1 %2062 }
 0x69f   : > { %v2164_v4 = vadd.f32 %v9077_v14, %v2142_v22  ;;  %v2122_v37 = vmul.f32 %v7579_v38, %v9000_v54  ;;  %7588 = vrsqrt.f32 %v2097_v23  ;;  %v2083_v26 = vmul.f32 0.0078125, %v2063_v40  ;;  %v2061_v29 = vpop.xlane.xlu0 %2060 }
 0x6a0   : > { %2181 = vst [vmem:[#allocation3 + $0x8] sm:$0xff] %v2165_v62  ;;  %v2145_v30 = vmul.f32 %v9074_v2, %v2123_v33  ;;  %7590 = vrsqrt.f32 %v2096_v1  ;;  %v2082_v44 = vmul.f32 0.0078125, %v2061_v29 }
 0x6a1   : > { %v7581_v27 = vpop.eup %7580  ;;  %2180 = vst [vmem:[#allocation3] sm:$0xff] %v2164_v4  ;;  %v2144_v46 = vmul.f32 %v9074_v2, %v2122_v37  ;;  %v2099_v32 = vadd.f32 1e-05, %v2083_v26 }
 0x6a2   : > { %v7583_v16 = vpop.eup %7582  ;;  %v2167_v5 = vadd.f32 %v9077_v14, %v2145_v30  ;;  %v2125_v36 = vmul.f32 %v7581_v27, %v9007_v25  ;;  %v2098_v49 = vadd.f32 1e-05, %v2082_v44  ;;  %v2067_v54 = vpop.xlane.xlu1 %2066 }
 0x6a3   : > { %v2166_v39 = vadd.f32 %v9077_v14, %v2144_v46  ;;  %v2124_v41 = vmul.f32 %v7583_v16, %v9010_v61  ;;  %7592 = vrsqrt.f32 %v2099_v32  ;;  %v2085_v48 = vmul.f32 0.0078125, %v2067_v54  ;;  %v2065_v52 = vpop.xlane.xlu0 %2064 }
 0x6a4   : > { %2183 = vst [vmem:[#allocation3 + $0x18] sm:$0xff] %v2167_v5  ;;  %v2147_v50 = vmul.f32 %v9074_v2, %v2125_v36  ;;  %7594 = vrsqrt.f32 %v2098_v49  ;;  %v2084_v9 = vmul.f32 0.0078125, %v2065_v52 }
 0x6a5   : > { %v7585_v43 = vpop.eup %7584  ;;  %2182 = vst [vmem:[#allocation3 + $0x10] sm:$0xff] %v2166_v39  ;;  %v2146_v53 = vmul.f32 %v9074_v2, %v2124_v41  ;;  %v2101_v45 = vadd.f32 1e-05, %v2085_v48 }
 0x6a6   : > { %v7587_v25 = vpop.eup %7586  ;;  %v2169_v55 = vadd.f32 %v9077_v14, %v2147_v50  ;;  %v2127_v47 = vmul.f32 %v7585_v43, %v9017_v34  ;;  %v2100_v15 = vadd.f32 1e-05, %v2084_v9  ;;  %v2071_v61 = vpop.xlane.xlu1 %2070 }
 0x6a7   : > { %v2168_v51 = vadd.f32 %v9077_v14, %v2146_v53  ;;  %v2126_v58 = vmul.f32 %v7587_v25, %v9020_v3  ;;  %7596 = vrsqrt.f32 %v2101_v45  ;;  %v2087_v56 = vmul.f32 0.0078125, %v2071_v61  ;;  %v2069_v63 = vpop.xlane.xlu0 %2068 }
 0x6a8   : > { %2185 = vst [vmem:[#allocation3 + $0x28] sm:$0xff] %v2169_v55  ;;  %v2149_v60 = vmul.f32 %v9074_v2, %v2127_v47  ;;  %7598 = vrsqrt.f32 %v2100_v15  ;;  %v2086_v20 = vmul.f32 0.0078125, %v2069_v63 }
 0x6a9   : > { %v7589_v6 = vpop.eup %7588  ;;  %2184 = vst [vmem:[#allocation3 + $0x20] sm:$0xff] %v2168_v51  ;;  %v2148_v8 = vmul.f32 %v9074_v2, %v2126_v58  ;;  %v2103_v10 = vadd.f32 1e-05, %v2087_v56 }
 0x6aa   : > { %v7591_v34 = vpop.eup %7590  ;;  %v2171_v11 = vadd.f32 %v9077_v14, %v2149_v60  ;;  %v2129_v28 = vmul.f32 %v7589_v6, %v9027_v42  ;;  %v2102_v31 = vadd.f32 1e-05, %v2086_v20 }
 0x6ab   : > { %v2170_v3 = vadd.f32 %v9077_v14, %v2148_v8  ;;  %v2128_v18 = vmul.f32 %v7591_v34, %v9030_v7  ;;  %7600 = vrsqrt.f32 %v2103_v10 }
 0x6ac   : > { %2187 = vst [vmem:[#allocation3 + $0x38] sm:$0xff] %v2171_v11  ;;  %v2151_v57 = vmul.f32 %v9074_v2, %v2129_v28  ;;  %7602 = vrsqrt.f32 %v2102_v31 }
 0x6ad   : > { %v7593_v35 = vpop.eup %7592  ;;  %2186 = vst [vmem:[#allocation3 + $0x30] sm:$0xff] %v2170_v3  ;;  %v2150_v19 = vmul.f32 %v9074_v2, %v2128_v18 }
 0x6ae   : > { %v7595_v21 = vpop.eup %7594  ;;  %v2173_v22 = vadd.f32 %v9077_v14, %v2151_v57  ;;  %v2131_v23 = vmul.f32 %v7593_v35, %v9037_v59 }
 0x6af   : > { %v2172_v42 = vadd.f32 %v9077_v14, %v2150_v19  ;;  %v2130_v38 = vmul.f32 %v7595_v21, %v9040_v13 }
 0x6b0   : > { %2189 = vst [vmem:[#allocation3 + $0x48] sm:$0xff] %v2173_v22  ;;  %v2153_v7 = vmul.f32 %v9074_v2, %v2131_v23 }
 0x6b1   : > { %v7597_v62 = vpop.eup %7596  ;;  %2188 = vst [vmem:[#allocation3 + $0x40] sm:$0xff] %v2172_v42  ;;  %v2152_v33 = vmul.f32 %v9074_v2, %v2130_v38 }
 0x6b2   : > { %v7599_v1 = vpop.eup %7598  ;;  %v2175_v40 = vadd.f32 %v9077_v14, %v2153_v7  ;;  %v2133_v4 = vmul.f32 %v7597_v62, %v9047_v0 }
 0x6b3   : > { %v2174_v37 = vadd.f32 %v9077_v14, %v2152_v33  ;;  %v2132_v59 = vmul.f32 %v7599_v1, %v9050_v17 }
 0x6b4   : > { %2191 = vst [vmem:[#allocation3 + $0x58] sm:$0xff] %v2175_v40  ;;  %v2155_v26 = vmul.f32 %v9074_v2, %v2133_v4 }
 0x6b5   : > { %v7601_v13 = vpop.eup %7600  ;;  %2190 = vst [vmem:[#allocation3 + $0x50] sm:$0xff] %v2174_v37  ;;  %v2154_v29 = vmul.f32 %v9074_v2, %v2132_v59 }
 0x6b6   : > { %v7603_v30 = vpop.eup %7602  ;;  %v2177_v44 = vadd.f32 %v9077_v14, %v2155_v26  ;;  %v2135_v27 = vmul.f32 %v7601_v13, %v9057_v12 }
 0x6b7   : > { %v2176_v46 = vadd.f32 %v9077_v14, %v2154_v29  ;;  %v2134_v0 = vmul.f32 %v7603_v30, %v9060_v24 }
 0x6b8   : > { %2193 = vst [vmem:[#allocation3 + $0x68] sm:$0xff] %v2177_v44  ;;  %v2157_v32 = vmul.f32 %v9074_v2, %v2135_v27 }
 0x6b9   : > { %2192 = vst [vmem:[#allocation3 + $0x60] sm:$0xff] %v2176_v46  ;;  %v2156_v17 = vmul.f32 %v9074_v2, %v2134_v0 }
 0x6ba   : > { %v2179_v16 = vadd.f32 %v9077_v14, %v2157_v32 }
 0x6bb   : > { %v2178_v5 = vadd.f32 %v9077_v14, %v2156_v17 }
 0x6bc   : > { %2195 = vst [vmem:[#allocation3 + $0x78] sm:$0xff] %v2179_v16 }
 0x6bd   : > { %2194 = vst [vmem:[#allocation3 + $0x70] sm:$0xff] %v2178_v5 }
 0x6be PF: > { %v2196_v36 = vld [vmem:[#allocation2] sm:$0xff]  ;;  %v2197_v49 = vld [vmem:[#allocation2 + $0x8] sm:$0xff]  ;;  %v2198_v12 = vld [vmem:[#allocation2 + $0x10] sm:$0xff]  ;;  %vm2280_vm6 = vcmask 523264   ;;  %s9841_s26 = sld [smem:[#allocation40_spill]]  ;;  %s9842_s7 = sld [smem:[#allocation41_spill]] }
 0x6bf   : > { %v2220_v54 = vpack.c.bf16 %v2197_v49, %v2196_v36  ;;  %v2199_v39 = vld [vmem:[#allocation2 + $0x18] sm:$0xff]  ;;  %v2200_v24 = vld [vmem:[#allocation2 + $0x20] sm:$0xff]  ;;  %v2201_v48 = vld [vmem:[#allocation2 + $0x28] sm:$0xff]  ;;  %p5366_p9 = scmp.ne.s32.totalorder %s8316_s1, 1 }
 0x6c0   : > { %v2221_v41 = vpack.c.bf16 %v2199_v39, %v2198_v12  ;;  %v2222_v14 = vpack.c.bf16 %v2201_v48, %v2200_v24  ;;  %v2202_v52 = vld [vmem:[#allocation2 + $0x30] sm:$0xff]  ;;  %v2203_v50 = vld [vmem:[#allocation2 + $0x38] sm:$0xff]  ;;  %v5215_v47 = vld [vmem:[%s8744_s3 + $0x80] sm:$0xff] }
 0x6c1   : > { %6119 = vmatprep.subr.bf16.mxu0 %v2220_v54  ;;  %6143 = vmatprep.subr.bf16.mxu1 %v2220_v54  ;;  %v2223_v9 = vpack.c.bf16 %v2203_v50, %v2202_v52  ;;  %v5216_v15 = vld [vmem:[%s8744_s3 + $0x88] sm:$0xff]  ;;  %v5217_v61 = vld [vmem:[%s8744_s3 + $0x90] sm:$0xff]  ;;  %v5218_v51 = vld [vmem:[%s8744_s3 + $0x98] sm:$0xff] }
 0x6c2   : > { %6120 = vmatpush3.bf16.msra.mxu0 %v2220_v54  ;;  %6144 = vmatpush3.bf16.msra.mxu1 %v2220_v54  ;;  %v6913_v58 = vpack.c.bf16 %v5216_v15, %v5215_v47  ;;  %v6917_v56 = vpack.c.bf16 %v5218_v51, %v5217_v61  ;;  %v5219_v8 = vld [vmem:[%s8744_s3 + $0xa0] sm:$0xff]  ;;  %v5220_v10 = vld [vmem:[%s8744_s3 + $0xa8] sm:$0xff]  ;;  %v5221_v11 = vld [vmem:[%s8744_s3 + $0xb0] sm:$0xff] }
 0x6c3   : > { %6121 = vmatprep.subr.bf16.mxu0 %v2221_v41  ;;  %6145 = vmatprep.subr.bf16.mxu1 %v2221_v41  ;;  %v6921_v34 = vpack.c.bf16 %v5220_v10, %v5219_v8  ;;  %v5222_v28 = vld [vmem:[%s8744_s3 + $0xb8] sm:$0xff]  ;;  %v5223_v57 = vld [vmem:[%s8744_s3 + $0xc0] sm:$0xff]  ;;  %v5224_v35 = vld [vmem:[%s8744_s3 + $0xc8] sm:$0xff] }
 0x6c4   : > { %v7604_v2 = vld [vmem:[%s9841_s26] sm:$0xff]   ;;  %v7605_v53 = vld [vmem:[%s9841_s26 + $0x8] sm:$0xff]   ;;  %v7606_v45 = vld [vmem:[%s9841_s26 + $0x10] sm:$0xff]   ;;  %v6925_v3 = vpack.c.bf16 %v5222_v28, %v5221_v11  ;;  %v6929_v22 = vpack.c.bf16 %v5224_v35, %v5223_v57 }
 0x6c5   : > { %6127 = vmatprep.mubr.msk.bf16.mxu0 %vm2280_vm6, %v7604_v2  ;;  %v7612_v43 = vld [vmem:[%s9842_s7] sm:$0xff]   ;;  %v7613_v25 = vld [vmem:[%s9842_s7 + $0x8] sm:$0xff]   ;;  %v7614_v55 = vld [vmem:[%s9842_s7 + $0x10] sm:$0xff]  }
 0x6c6   : > { %6122 = vmatpush3.bf16.msra.mxu0 %v2221_v41  ;;  %6146 = vmatpush3.bf16.msra.mxu1 %v2221_v41  ;;  %v7607_v63 = vld [vmem:[%s9841_s26 + $0x18] sm:$0xff]   ;;  %v7608_v60 = vld [vmem:[%s9841_s26 + $0x20] sm:$0xff]   ;;  %v7609_v31 = vld [vmem:[%s9841_s26 + $0x28] sm:$0xff]  }
 0x6c7   : > { %6123 = vmatprep.subr.bf16.mxu0 %v2222_v14  ;;  %6147 = vmatprep.subr.bf16.mxu1 %v2222_v14  ;;  %v7615_v20 = vld [vmem:[%s9842_s7 + $0x18] sm:$0xff]   ;;  %v7616_v6 = vld [vmem:[%s9842_s7 + $0x20] sm:$0xff]   ;;  %v7617_v18 = vld [vmem:[%s9842_s7 + $0x28] sm:$0xff]  }
 0x6c8   : > { %6151 = vmatprep.mubr.msk.bf16.mxu1 %vm2280_vm6, %v7612_v43  ;;  %v7610_v19 = vld [vmem:[%s9841_s26 + $0x30] sm:$0xff]   ;;  %v5226_v42 = vld [vmem:[%s8744_s3 + $0xd8] sm:$0xff]  ;;  %v5227_v33 = vld [vmem:[%s8744_s3 + $0xe0] sm:$0xff] }
 0x6c9   : > { %v7618_v21 = vld [vmem:[%s9842_s7 + $0x30] sm:$0xff]   ;;  %v7611_v38 = vld [vmem:[%s9841_s26 + $0x38] sm:$0xff]   ;;  %v2579_v26 = vld [vmem:[%s8744_s3] sm:$0xff] }
 0x6ca   : > { %6124 = vmatpush3.bf16.msra.mxu0 %v2222_v14  ;;  %6148 = vmatpush3.bf16.msra.mxu1 %v2222_v14  ;;  %v5225_v23 = vld [vmem:[%s8744_s3 + $0xd0] sm:$0xff]  ;;  %v5228_v1 = vld [vmem:[%s8744_s3 + $0xe8] sm:$0xff]  ;;  %v5230_v37 = vld [vmem:[%s8744_s3 + $0xf8] sm:$0xff] }
 0x6cb   : > { %6125 = vmatprep.subr.bf16.mxu0 %v2223_v9  ;;  %6149 = vmatprep.subr.bf16.mxu1 %v2223_v9  ;;  %v6933_v7 = vpack.c.bf16 %v5226_v42, %v5225_v23  ;;  %v7619_v62 = vld [vmem:[%s9842_s7 + $0x38] sm:$0xff]   ;;  %v6937_v40 = vpack.c.bf16 %v5228_v1, %v5227_v33  ;;  %v2580_v13 = vld [vmem:[%s8744_s3 + $0x8] sm:$0xff]  ;;  %v5248_v30 = vld [vmem:[%s8744_s3 + $0x180] sm:$0xff] }
 0x6cc   : > { %v5229_v4 = vld [vmem:[%s8744_s3 + $0xf0] sm:$0xff]  ;;  %v6945_v29 = vpack.c.bf16 %v2580_v13, %v2579_v26  ;;  %v5249_v44 = vld [vmem:[%s8744_s3 + $0x188] sm:$0xff]  ;;  %v5251_v0 = vld [vmem:[%s8744_s3 + $0x198] sm:$0xff] }
 0x6cd   : > { %v6941_v59 = vpack.c.bf16 %v5230_v37, %v5229_v4  ;;  %v5250_v27 = vld [vmem:[%s8744_s3 + $0x190] sm:$0xff]  ;;  %v7009_v46 = vpack.c.bf16 %v5249_v44, %v5248_v30  ;;  %v5252_v17 = vld [vmem:[%s8744_s3 + $0x1a0] sm:$0xff]  ;;  %v5253_v16 = vld [vmem:[%s8744_s3 + $0x1a8] sm:$0xff] }
 0x6ce   : > { %6126 = vmatpush3.bf16.msra.mxu0 %v2223_v9  ;;  %6150 = vmatpush3.bf16.msra.mxu1 %v2223_v9  ;;  %v7013_v32 = vpack.c.bf16 %v5251_v0, %v5250_v27  ;;  %v7017_v5 = vpack.c.bf16 %v5253_v16, %v5252_v17  ;;  %v5254_v36 = vld [vmem:[%s8744_s3 + $0x1b0] sm:$0xff]  ;;  %v5255_v49 = vld [vmem:[%s8744_s3 + $0x1b8] sm:$0xff]  ;;  %v5256_v54 = vld [vmem:[%s8744_s3 + $0x1c0] sm:$0xff] }
 0x6cf   : > { %6914 = vmatprep.subr.bf16.mxu0 %v6913_v58  ;;  %7010 = vmatprep.subr.bf16.mxu1 %v7009_v46  ;;  %v7021_v12 = vpack.c.bf16 %v5255_v49, %v5254_v36  ;;  %v5257_v39 = vld [vmem:[%s8744_s3 + $0x1c8] sm:$0xff]  ;;  %v5258_v24 = vld [vmem:[%s8744_s3 + $0x1d0] sm:$0xff]  ;;  %v5259_v48 = vld [vmem:[%s8744_s3 + $0x1d8] sm:$0xff] }
 0x6d0   : > { %v7025_v41 = vpack.c.bf16 %v5257_v39, %v5256_v54  ;;  %v7029_v2 = vpack.c.bf16 %v5259_v48, %v5258_v24  ;;  %v5260_v14 = vld [vmem:[%s8744_s3 + $0x1e0] sm:$0xff]  ;;  %v5261_v52 = vld [vmem:[%s8744_s3 + $0x1e8] sm:$0xff]  ;;  %v2581_v9 = vld [vmem:[%s8744_s3 + $0x10] sm:$0xff] }
 0x6d1   : > { %6128 = vmatmul.mubr.msk.bf16.vlgmr.msra.gmra.mrb[0].mxu0 %vm2280_vm6, %v7605_v53  ;;  %6152 = vmatmul.mubr.msk.bf16.vlgmr.msra.gmra.mrb[0].mxu1 %vm2280_vm6, %v7613_v25  ;;  %v7033_v50 = vpack.c.bf16 %v5261_v52, %v5260_v14  ;;  %v2582_v43 = vld [vmem:[%s8744_s3 + $0x18] sm:$0xff]  ;;  %v2587_v57 = vld [vmem:[%s8744_s3 + $0x40] sm:$0xff]  ;;  %v2588_v35 = vld [vmem:[%s8744_s3 + $0x48] sm:$0xff] }
 0x6d2   : > { %6131 = vmatprep.mubr.msk.bf16.mxu0 %vm2280_vm6, %v7606_v45  ;;  %6155 = vmatprep.mubr.msk.bf16.mxu1 %vm2280_vm6, %v7614_v55  ;;  %v6949_v15 = vpack.c.bf16 %v2582_v43, %v2581_v9  ;;  %v2590_v23 = vld [vmem:[%s8744_s3 + $0x58] sm:$0xff]  ;;  %v2591_v37 = vld [vmem:[%s8744_s3 + $0x60] sm:$0xff]  ;;  %v5232_v49 = vld [vmem:[%s8744_s3 + $0x108] sm:$0xff] }
 0x6d3   : > { %6916 = vmatpush3.bf16.msra.mxu0 %v6913_v58  ;;  %7012 = vmatpush3.bf16.msra.mxu1 %v7009_v46  ;;  %v2583_v58 = vld [vmem:[%s8744_s3 + $0x20] sm:$0xff]  ;;  %v2594_v30 = vld [vmem:[%s8744_s3 + $0x78] sm:$0xff]  ;;  %v5233_v39 = vld [vmem:[%s8744_s3 + $0x110] sm:$0xff] }
 0x6d4   : > { %6918 = vmatprep.subr.bf16.mxu0 %v6917_v56  ;;  %7014 = vmatprep.subr.bf16.mxu1 %v7013_v32  ;;  %v5231_v36 = vld [vmem:[%s8744_s3 + $0x100] sm:$0xff]  ;;  %v5237_v52 = vld [vmem:[%s8744_s3 + $0x130] sm:$0xff] }
 0x6d5   : > { %v6977_v54 = vpack.c.bf16 %v5232_v49, %v5231_v36  ;;  %v5235_v48 = vld [vmem:[%s8744_s3 + $0x120] sm:$0xff] }
 0x6d6   : > { %v5239_v43 = vld [vmem:[%s8744_s3 + $0x140] sm:$0xff] }
 0x6d7   : > { %6920 = vmatpush3.bf16.msra.mxu0 %v6917_v56  ;;  %7016 = vmatpush3.bf16.msra.mxu1 %v7013_v32  ;;  %v2584_v56 = vld [vmem:[%s8744_s3 + $0x28] sm:$0xff] }
 0x6d8   : > { %6922 = vmatprep.subr.bf16.mxu0 %v6921_v34  ;;  %7018 = vmatprep.subr.bf16.mxu1 %v7017_v5 }
 0x6d9   : > { %6132 = vmatmul.mubr.msk.bf16.gmra.mrb[4].mxu0 %vm2280_vm6, %v7607_v63  ;;  %6156 = vmatmul.mubr.msk.bf16.gmra.mrb[4].mxu1 %vm2280_vm6, %v7615_v20  ;;  %v2585_v20 = vld [vmem:[%s8744_s3 + $0x30] sm:$0xff] }
 0x6da   : > { %6135 = vmatprep.mubr.msk.bf16.mxu0 %vm2280_vm6, %v7608_v60  ;;  %6159 = vmatprep.mubr.msk.bf16.mxu1 %vm2280_vm6, %v7616_v6  ;;  %v6953_v60 = vpack.c.bf16 %v2584_v56, %v2583_v58  ;;  %v2586_v6 = vld [vmem:[%s8744_s3 + $0x38] sm:$0xff]  ;;  %v5245_v58 = vld [vmem:[%s8744_s3 + $0x170] sm:$0xff] }
 0x6db   : > { %6924 = vmatpush3.bf16.msra.mxu0 %v6921_v34  ;;  %7020 = vmatpush3.bf16.msra.mxu1 %v7017_v5  ;;  %v5246_v56 = vld [vmem:[%s8744_s3 + $0x178] sm:$0xff] }
 0x6dc   : > { %6926 = vmatprep.subr.bf16.mxu0 %v6925_v3  ;;  %7022 = vmatprep.subr.bf16.mxu1 %v7021_v12 }
 0x6df   : > { %6928 = vmatpush3.bf16.msra.mxu0 %v6925_v3  ;;  %7024 = vmatpush3.bf16.msra.mxu1 %v7021_v12 }
 0x6e0   : > { %6930 = vmatprep.subr.bf16.mxu0 %v6929_v22  ;;  %7026 = vmatprep.subr.bf16.mxu1 %v7025_v41 }
 0x6e1   : > { %6136 = vmatmul.mubr.msk.bf16.gmra.mrb[8].mxu0 %vm2280_vm6, %v7609_v31  ;;  %6160 = vmatmul.mubr.msk.bf16.gmra.mrb[8].mxu1 %vm2280_vm6, %v7617_v18  ;;  %v6957_v31 = vpack.c.bf16 %v2586_v6, %v2585_v20  ;;  %v9297_v20 = vld [vmem:[#allocation3 + $0x8] sm:$0xff]  ;;  %v9299_v6 = vld [vmem:[#allocation3 + $0x10] sm:$0xff] }
 0x6e2   : > { %6139 = vmatprep.mubr.msk.bf16.mxu0 %vm2280_vm6, %v7610_v19  ;;  %6163 = vmatprep.mubr.msk.bf16.mxu1 %vm2280_vm6, %v7618_v21  ;;  %v6961_v21 = vpack.c.bf16 %v2588_v35, %v2587_v57  ;;  %v2215_v57 = vld [vmem:[#allocation3 + $0x58] sm:$0xff]  ;;  %v2216_v35 = vld [vmem:[#allocation3 + $0x60] sm:$0xff] }
 0x6e3   : > { %6932 = vmatpush3.bf16.msra.mxu0 %v6929_v22  ;;  %7028 = vmatpush3.bf16.msra.mxu1 %v7025_v41  ;;  %v2589_v22 = vld [vmem:[%s8744_s3 + $0x50] sm:$0xff]  ;;  %v5234_v41 = vld [vmem:[%s8744_s3 + $0x118] sm:$0xff] }
 0x6e4   : > { %6934 = vmatprep.subr.bf16.mxu0 %v6933_v7  ;;  %7030 = vmatprep.subr.bf16.mxu1 %v7029_v2  ;;  %v6965_v1 = vpack.c.bf16 %v2590_v23, %v2589_v22  ;;  %v6981_v24 = vpack.c.bf16 %v5234_v41, %v5233_v39  ;;  %v2219_v22 = vld [vmem:[#allocation3 + $0x78] sm:$0xff] }
 0x6e5   : > { %v5262_v23 = vld [vmem:[%s8744_s3 + $0x1f0] sm:$0xff] }
 0x6e7   : > { %6936 = vmatpush3.bf16.msra.mxu0 %v6933_v7  ;;  %7032 = vmatpush3.bf16.msra.mxu1 %v7029_v2  ;;  %v5236_v2 = vld [vmem:[%s8744_s3 + $0x128] sm:$0xff] }
 0x6e8   : > { %6938 = vmatprep.subr.bf16.mxu0 %v6937_v40  ;;  %7034 = vmatprep.subr.bf16.mxu1 %v7033_v50  ;;  %v6985_v14 = vpack.c.bf16 %v5236_v2, %v5235_v48  ;;  %v5273_v48 = vld [vmem:[%s8744_s3 + $0x238] sm:$0xff] }
 0x6e9   : > { %6140 = vmatmul.mubr.msk.bf16.gmra.mrb[12].mxu0 %vm2280_vm6, %v7611_v38  ;;  %6164 = vmatmul.mubr.msk.bf16.gmra.mrb[12].mxu1 %vm2280_vm6, %v7619_v62 }
 0x6eb   : > { %6940 = vmatpush3.bf16.msra.mxu0 %v6937_v40  ;;  %7036 = vmatpush3.bf16.msra.mxu1 %v7033_v50  ;;  %v5238_v50 = vld [vmem:[%s8744_s3 + $0x138] sm:$0xff] }
 0x6ec   : > { %6942 = vmatprep.subr.bf16.mxu0 %v6941_v59  ;;  %v6989_v9 = vpack.c.bf16 %v5238_v50, %v5237_v52 }
 0x6ef   : > { %6944 = vmatpush3.bf16.msra.mxu0 %v6941_v59  ;;  %v2592_v59 = vld [vmem:[%s8744_s3 + $0x68] sm:$0xff] }
 0x6f0   : > { %6946 = vmatprep.subr.bf16.mxu0 %v6945_v29  ;;  %v6969_v13 = vpack.c.bf16 %v2592_v59, %v2591_v37 }
 0x7a4   : > { %v6129_v53 = vpop.f32.mrb[0].mxu0  ;;  %v9224_v45 = vpop.f32.mrb[0].mxu1 }
 0x7a5   : > { %v2339_v25 = vpop.f32.mrb[1].mxu0  ;;  %v9226_v55 = vpop.f32.mrb[1].mxu1 }
 0x7a6   : > { %v6130_v47 = vpop.f32.mrb[2].mxu0  ;;  %6199 = vmatprep.mubr.f32.mxu0 %v2339_v25  ;;  %v9228_v61 = vpop.f32.mrb[2].mxu1  ;;  %v5241_v25 = vld [vmem:[%s8744_s3 + $0x150] sm:$0xff] }
 0x7a7   : > { %v2342_v51 = vpop.f32.mrb[3].mxu0  ;;  %v9232_v63 = vpop.f32.mrb[3].mxu1 }
 0x7a8   : > { %6200 = vmatmul.mubr.f32.vlgmr.msra.gmra.mrb[16].mxu0 %v2342_v51 }
 0x7a9   : > { %6202 = vmatprep.mubr.f32.mxu0 %v6129_v53  ;;  %6948 = vmatpush3.bf16.msra.mxu0 %v6945_v29  ;;  %v2593_v29 = vld [vmem:[%s8744_s3 + $0x70] sm:$0xff]  ;;  %v5240_v53 = vld [vmem:[%s8744_s3 + $0x148] sm:$0xff] }
 0x7aa   : > { %6950 = vmatprep.subr.bf16.mxu0 %v6949_v15  ;;  %v6973_v17 = vpack.c.bf16 %v2594_v30, %v2593_v29 }
 0x7ac   : > { %v6133_v8 = vpop.f32.mrb[4].mxu0  ;;  %6203 = vmatmul.mubr.f32.gmra.mrb[18].mxu0 %v6130_v47  ;;  %v9236_v10 = vpop.f32.mrb[4].mxu1 }
 0x7ad   : > { %v2355_v34 = vpop.f32.mrb[5].mxu0  ;;  %6952 = vmatpush3.bf16.msra.mxu0 %v6949_v15  ;;  %v9238_v11 = vpop.f32.mrb[5].mxu1  ;;  %v5243_v15 = vld [vmem:[%s8744_s3 + $0x160] sm:$0xff] }
 0x7ae   : > { %v6134_v28 = vpop.f32.mrb[6].mxu0  ;;  %6205 = vmatprep.mubr.f32.mxu0 %v2355_v34  ;;  %6954 = vmatprep.subr.bf16.mxu0 %v6953_v60  ;;  %v9240_v3 = vpop.f32.mrb[6].mxu1  ;;  %v9309_v34 = vld [vmem:[#allocation3 + $0x28] sm:$0xff] }
 0x7af   : > { %v2358_v18 = vpop.f32.mrb[7].mxu0  ;;  %v9244_v19 = vpop.f32.mrb[7].mxu1 }
 0x7b0   : > { %6206 = vmatmul.mubr.f32.gmra.mrb[20].mxu0 %v2358_v18  ;;  %v2214_v18 = vld [vmem:[#allocation3 + $0x50] sm:$0xff] }
 0x7b1   : > { %6208 = vmatprep.mubr.f32.mxu0 %v6133_v8  ;;  %6956 = vmatpush3.bf16.msra.mxu0 %v6953_v60  ;;  %v9293_v60 = vld [vmem:[#allocation3] sm:$0xff]  ;;  %v9303_v8 = vld [vmem:[#allocation3 + $0x18] sm:$0xff] }
 0x7b2   : > { %6958 = vmatprep.subr.bf16.mxu0 %v6957_v31 }
 0x7b4   : > { %v6137_v42 = vpop.f32.mrb[8].mxu0  ;;  %6209 = vmatmul.mubr.f32.gmra.mrb[22].mxu0 %v6134_v28  ;;  %v9248_v38 = vpop.f32.mrb[8].mxu1  ;;  %v9315_v28 = vld [vmem:[#allocation3 + $0x38] sm:$0xff] }
 0x7b5   : > { %v2371_v7 = vpop.f32.mrb[9].mxu0  ;;  %6960 = vmatpush3.bf16.msra.mxu0 %v6957_v31  ;;  %v9250_v62 = vpop.f32.mrb[9].mxu1  ;;  %v9317_v31 = vld [vmem:[#allocation3 + $0x40] sm:$0xff] }
 0x7b6   : > { %v6138_v33 = vpop.f32.mrb[10].mxu0  ;;  %6211 = vmatprep.mubr.f32.mxu0 %v2371_v7  ;;  %6962 = vmatprep.subr.bf16.mxu0 %v6961_v21  ;;  %v9252_v40 = vpop.f32.mrb[10].mxu1  ;;  %v5266_v7 = vld [vmem:[%s8744_s3 + $0x200] sm:$0xff] }
 0x7b7   : > { %v2374_v4 = vpop.f32.mrb[11].mxu0  ;;  %v9256_v26 = vpop.f32.mrb[11].mxu1 }
 0x7b8   : > { %6212 = vmatmul.mubr.f32.gmra.mrb[24].mxu0 %v2374_v4 }
 0x7b9   : > { %6214 = vmatprep.mubr.f32.mxu0 %v6137_v42  ;;  %6964 = vmatpush3.bf16.msra.mxu0 %v6961_v21  ;;  %v2218_v21 = vld [vmem:[#allocation3 + $0x70] sm:$0xff]  ;;  %v5263_v42 = vld [vmem:[%s8744_s3 + $0x1f8] sm:$0xff] }
 0x7ba   : > { %6966 = vmatprep.subr.bf16.mxu0 %v6965_v1 }
 0x7bc   : > { %v6141_v44 = vpop.f32.mrb[12].mxu0  ;;  %6215 = vmatmul.mubr.f32.gmra.mrb[26].mxu0 %v6138_v33  ;;  %v9260_v27 = vpop.f32.mrb[12].mxu1 }
 0x7bd   : > { %v2387_v46 = vpop.f32.mrb[13].mxu0  ;;  %6968 = vmatpush3.bf16.msra.mxu0 %v6965_v1  ;;  %v2564_v0 = vpop.f32.mrb[13].mxu1  ;;  %v9329_v1 = vld [vmem:[%s8750_s6] ss:$0 sm:$0xff] }
 0x7be   : > { %v6142_v32 = vpop.f32.mrb[14].mxu0  ;;  %6217 = vmatprep.mubr.f32.mxu0 %v2387_v46  ;;  %6970 = vmatprep.subr.bf16.mxu0 %v6969_v13  ;;  %v9262_v16 = vpop.f32.mrb[14].mxu1 }
 0x7bf   : > { %v2390_v5 = vpop.f32.mrb[15].mxu0  ;;  %v2567_v12 = vpop.f32.mrb[15].mxu1 }
 0x7c0   : > { %6218 = vmatmul.mubr.f32.gmra.mrb[28].mxu0 %v2390_v5 }
 0x7c1   : > { %6220 = vmatprep.mubr.f32.mxu0 %v6141_v44  ;;  %6972 = vmatpush3.bf16.msra.mxu0 %v6969_v13  ;;  %v5269_v13 = vld [vmem:[%s8744_s3 + $0x218] sm:$0xff] }
 0x7c2   : > { %6974 = vmatprep.subr.bf16.mxu0 %v6973_v17 }
 0x7c4   : > { %6221 = vmatmul.mubr.f32.gmra.mrb[30].mxu0 %v6142_v32 }
 0x7c5   : > { %6976 = vmatpush3.bf16.msra.mxu0 %v6973_v17  ;;  %6255 = vmatprep.mubr.f32.mxu0 %v9226_v55  ;;  %v5242_v55 = vld [vmem:[%s8744_s3 + $0x158] sm:$0xff]  ;;  %v5270_v17 = vld [vmem:[%s8744_s3 + $0x220] sm:$0xff] }
 0x7c6   : > { %6978 = vmatprep.subr.bf16.mxu0 %v6977_v54  ;;  %v6997_v47 = vpack.c.bf16 %v5242_v55, %v5241_v25  ;;  %v5275_v25 = vld [vmem:[%s8744_s3 + $0x248] sm:$0xff] }
 0x7c8   : > { %6256 = vmatmul.mubr.f32.vlgmr.msra.gmra.mrb[16].mxu0 %v9232_v63  ;;  %v7005_v63 = vpack.c.bf16 %v5246_v56, %v5245_v58 }
 0x7c9   : > { %6258 = vmatprep.mubr.f32.mxu0 %v9224_v45  ;;  %6980 = vmatpush3.bf16.msra.mxu0 %v6977_v54  ;;  %v6993_v45 = vpack.c.bf16 %v5240_v53, %v5239_v43 }
 0x7ca   : > { %6982 = vmatprep.subr.bf16.mxu0 %v6981_v24 }
 0x7cc   : > { %6259 = vmatmul.mubr.f32.gmra.mrb[18].mxu0 %v9228_v61  ;;  %v5244_v61 = vld [vmem:[%s8744_s3 + $0x168] sm:$0xff] }
 0x7cd   : > { %6261 = vmatprep.mubr.f32.mxu0 %v9238_v11  ;;  %6984 = vmatpush3.bf16.msra.mxu0 %v6981_v24  ;;  %v7001_v51 = vpack.c.bf16 %v5244_v61, %v5243_v15  ;;  %v9311_v11 = vld [vmem:[#allocation3 + $0x30] sm:$0xff] }
 0x7ce   : > { %6986 = vmatprep.subr.bf16.mxu0 %v6985_v14  ;;  %v5272_v24 = vld [vmem:[%s8744_s3 + $0x230] sm:$0xff] }
 0x7cf   : > { %v7053_v43 = vpack.c.bf16 %v5273_v48, %v5272_v24 }
 0x7d0   : > { %6262 = vmatmul.mubr.f32.gmra.mrb[20].mxu0 %v9244_v19  ;;  %v2217_v19 = vld [vmem:[#allocation3 + $0x68] sm:$0xff] }
 0x7d1   : > { %6264 = vmatprep.mubr.f32.mxu0 %v9236_v10  ;;  %6988 = vmatpush3.bf16.msra.mxu0 %v6985_v14  ;;  %v9305_v10 = vld [vmem:[#allocation3 + $0x20] sm:$0xff] }
 0x7d2   : > { %6990 = vmatprep.subr.bf16.mxu0 %v6989_v9 }
 0x7d4   : > { %6265 = vmatmul.mubr.f32.gmra.mrb[22].mxu0 %v9240_v3  ;;  %v9321_v3 = vld [vmem:[#allocation3 + $0x48] sm:$0xff] }
 0x7d5   : > { %6267 = vmatprep.mubr.f32.mxu0 %v9250_v62  ;;  %6992 = vmatpush3.bf16.msra.mxu0 %v6989_v9  ;;  %v5267_v62 = vld [vmem:[%s8744_s3 + $0x208] sm:$0xff] }
 0x7d6   : > { %6994 = vmatprep.subr.bf16.mxu0 %v6993_v45  ;;  %v7041_v33 = vpack.c.bf16 %v5267_v62, %v5266_v7  ;;  %v5279_v7 = vld [vmem:[%s8744_s3 + $0x268] sm:$0xff] }
 0x7d8   : > { %6268 = vmatmul.mubr.f32.gmra.mrb[24].mxu0 %v9256_v26  ;;  %v5268_v26 = vld [vmem:[%s8744_s3 + $0x210] sm:$0xff] }
 0x7d9   : > { %6270 = vmatprep.mubr.f32.mxu0 %v9248_v38  ;;  %6996 = vmatpush3.bf16.msra.mxu0 %v6993_v45  ;;  %v7037_v38 = vpack.c.bf16 %v5263_v42, %v5262_v23  ;;  %v5274_v45 = vld [vmem:[%s8744_s3 + $0x240] sm:$0xff] }
 0x7da   : > { %6998 = vmatprep.subr.bf16.mxu0 %v6997_v47  ;;  %v7057_v58 = vpack.c.bf16 %v5275_v25, %v5274_v45 }
 0x7db   : > { %7038 = vmatprep.subr.bf16.mxu1 %v7037_v38 }
 0x7dc   : > { %6271 = vmatmul.mubr.f32.gmra.mrb[26].mxu0 %v9252_v40  ;;  %7040 = vmatpush3.bf16.msra.mxu1 %v7037_v38  ;;  %v5278_v38 = vld [vmem:[%s8744_s3 + $0x260] sm:$0xff] }
 0x7dd   : > { %6273 = vmatprep.mubr.f32.mxu0 %v2564_v0  ;;  %7000 = vmatpush3.bf16.msra.mxu0 %v6997_v47  ;;  %v7045_v0 = vpack.c.bf16 %v5269_v13, %v5268_v26 }
 0x7de   : > { %7002 = vmatprep.subr.bf16.mxu0 %v7001_v51  ;;  %7042 = vmatprep.subr.bf16.mxu1 %v7041_v33 }
 0x7e0   : > { %6274 = vmatmul.mubr.f32.gmra.mrb[28].mxu0 %v2567_v12 }
 0x7e1   : > { %6276 = vmatprep.mubr.f32.mxu0 %v9260_v27  ;;  %7004 = vmatpush3.bf16.msra.mxu0 %v7001_v51 }
 0x7e2   : > { %7006 = vmatprep.subr.bf16.mxu0 %v7005_v63 }
 0x7e4   : > { %6277 = vmatmul.mubr.f32.gmra.mrb[30].mxu0 %v9262_v16  ;;  %v5271_v16 = vld [vmem:[%s8744_s3 + $0x228] sm:$0xff] }
 0x7e5   : > { %7008 = vmatpush3.bf16.msra.mxu0 %v7005_v63  ;;  %6311 = vmatprep.mubr.f32.mxu0 %v9293_v60  ;;  %v7049_v39 = vpack.c.bf16 %v5271_v16, %v5270_v17  ;;  %v5276_v63 = vld [vmem:[%s8744_s3 + $0x250] sm:$0xff]  ;;  %v5281_v16 = vld [vmem:[%s8744_s3 + $0x278] sm:$0xff] }
 0x7e6   : > { %v5280_v17 = vld [vmem:[%s8744_s3 + $0x270] sm:$0xff] }
 0x7e8   : > { %6312 = vmatmul.mubr.f32.vlgmr.msra.gmra.mrb[16].mxu0 %v9297_v20 }
 0x7e9   : > { %6314 = vmatprep.mubr.f32.mxu0 %v9299_v6 }
 0x7ec   : > { %6315 = vmatmul.mubr.f32.gmra.mrb[18].mxu0 %v9303_v8 }
 0x7ed   : > { %6317 = vmatprep.mubr.f32.mxu0 %v9305_v10 }
 0x7f0   : > { %6318 = vmatmul.mubr.f32.gmra.mrb[20].mxu0 %v9309_v34 }
 0x7f1   : > { %6320 = vmatprep.mubr.f32.mxu0 %v9311_v11 }
 0x7f4   : > { %6321 = vmatmul.mubr.f32.gmra.mrb[22].mxu0 %v9315_v28 }
 0x7f5   : > { %6323 = vmatprep.mubr.f32.mxu0 %v9317_v31 }
 0x7f8   : > { %6324 = vmatmul.mubr.f32.gmra.mrb[24].mxu0 %v9321_v3 }
 0x7f9   : > { %6326 = vmatprep.mubr.f32.mxu0 %v2214_v18  ;;  %v5277_v18 = vld [vmem:[%s8744_s3 + $0x258] sm:$0xff] }
 0x7fa   : > { %v7061_v23 = vpack.c.bf16 %v5277_v18, %v5276_v63 }
 0x7fc   : > { %6327 = vmatmul.mubr.f32.gmra.mrb[26].mxu0 %v2215_v57 }
 0x7fd   : > { %6329 = vmatprep.mubr.f32.mxu0 %v2216_v35 }
 0x800   : > { %6330 = vmatmul.mubr.f32.gmra.mrb[28].mxu0 %v2217_v19 }
 0x801   : > { %6332 = vmatprep.mubr.f32.mxu0 %v2218_v21 }
 0x804   : > { %6333 = vmatmul.mubr.f32.gmra.mrb[30].mxu0 %v2219_v22 }
 0x8bb   : > { %v6313_v40 = vpop.f32.mrb[16].mxu0 }
 0x8bc   : > { %v3088_v4 = vadd.f32 %v6313_v40, %v9329_v1  ;;  %v2985_v37 = vpop.f32.mrb[17].mxu0 }
 0x8bd   : > { %v3087_v59 = vadd.f32 %v9329_v1, %v2985_v37 }
 0x8be   : > { %v3104_v44 = vmax.f32 %v3088_v4, 0.0 }
 0x8bf   : > { %v3103_v29 = vmax.f32 %v3087_v59, 0.0  ;;  %v6316_v30 = vpop.f32.mrb[18].mxu0  ;;  %v7065_v59 = vpack.c.bf16 %v5279_v7, %v5278_v38 }
 0x8c0   : > { %v3090_v27 = vadd.f32 %v6316_v30, %v9329_v1  ;;  %v2995_v46 = vpop.f32.mrb[19].mxu0 }
 0x8c1   : > { %v3089_v32 = vadd.f32 %v9329_v1, %v2995_v46  ;;  %6367 = vmatprep.mubr.f32.mxu1 %v3103_v29 }
 0x8c2   : > { %6368 = vmatmul.mubr.f32.vlgmr.msra.gmra.mrb[16].mxu1 %v3104_v44  ;;  %v3106_v49 = vmax.f32 %v3090_v27, 0.0 }
 0x8c3   : > { %v3105_v5 = vmax.f32 %v3089_v32, 0.0  ;;  %v6319_v36 = vpop.f32.mrb[20].mxu0  ;;  %7044 = vmatpush3.bf16.msra.mxu1 %v7041_v33 }
 0x8c4   : > { %v3092_v12 = vadd.f32 %v6319_v36, %v9329_v1  ;;  %v3005_v54 = vpop.f32.mrb[21].mxu0  ;;  %7046 = vmatprep.subr.bf16.mxu1 %v7045_v0  ;;  %v5265_v36 = vld [vmem:[%s8750_s6 + $0x1] ss:$0 sm:$0xff] }
 0x8c5   : > { %v3091_v41 = vadd.f32 %v9329_v1, %v3005_v54  ;;  %6370 = vmatprep.mubr.f32.mxu1 %v3105_v5  ;;  %v7069_v5 = vpack.c.bf16 %v5281_v16, %v5280_v17 }
 0x8c6   : > { %6371 = vmatmul.mubr.f32.gmra.mrb[18].mxu1 %v3106_v49  ;;  %v3108_v52 = vmax.f32 %v3092_v12, 0.0 }
 0x8c7   : > { %v3107_v2 = vmax.f32 %v3091_v41, 0.0  ;;  %v6322_v14 = vpop.f32.mrb[22].mxu0  ;;  %7048 = vmatpush3.bf16.msra.mxu1 %v7045_v0 }
 0x8c8   : > { %v3094_v50 = vadd.f32 %v6322_v14, %v9329_v1  ;;  %v3015_v9 = vpop.f32.mrb[23].mxu0  ;;  %7050 = vmatprep.subr.bf16.mxu1 %v7049_v39 }
 0x8c9   : > { %v3093_v53 = vadd.f32 %v9329_v1, %v3015_v9  ;;  %6373 = vmatprep.mubr.f32.mxu1 %v3107_v2 }
 0x8ca   : > { %6374 = vmatmul.mubr.f32.gmra.mrb[20].mxu1 %v3108_v52  ;;  %v3110_v15 = vmax.f32 %v3094_v50, 0.0 }
 0x8cb   : > { %v3109_v55 = vmax.f32 %v3093_v53, 0.0  ;;  %v6325_v47 = vpop.f32.mrb[24].mxu0  ;;  %7052 = vmatpush3.bf16.msra.mxu1 %v7049_v39 }
 0x8cc   : > { %v3096_v61 = vadd.f32 %v6325_v47, %v9329_v1  ;;  %v3025_v51 = vpop.f32.mrb[25].mxu0  ;;  %7054 = vmatprep.subr.bf16.mxu1 %v7053_v43 }
 0x8cd   : > { %v3095_v56 = vadd.f32 %v9329_v1, %v3025_v51  ;;  %6376 = vmatprep.mubr.f32.mxu1 %v3109_v55 }
 0x8ce   : > { %6377 = vmatmul.mubr.f32.gmra.mrb[22].mxu1 %v3110_v15  ;;  %v3112_v19 = vmax.f32 %v3096_v61, 0.0 }
 0x8cf   : > { %v3111_v57 = vmax.f32 %v3095_v56, 0.0  ;;  %v6328_v35 = vpop.f32.mrb[26].mxu0  ;;  %7056 = vmatpush3.bf16.msra.mxu1 %v7053_v43 }
 0x8d0   : > { %v3098_v21 = vadd.f32 %v6328_v35, %v9329_v1  ;;  %v3035_v22 = vpop.f32.mrb[27].mxu0  ;;  %7058 = vmatprep.subr.bf16.mxu1 %v7057_v58 }
 0x8d1   : > { %v3097_v42 = vadd.f32 %v9329_v1, %v3035_v22  ;;  %6379 = vmatprep.mubr.f32.mxu1 %v3111_v57 }
 0x8d2   : > { %6380 = vmatmul.mubr.f32.gmra.mrb[24].mxu1 %v3112_v19  ;;  %v3114_v40 = vmax.f32 %v3098_v21, 0.0 }
 0x8d3   : > { %v3113_v62 = vmax.f32 %v3097_v42, 0.0  ;;  %v6331_v33 = vpop.f32.mrb[28].mxu0  ;;  %7060 = vmatpush3.bf16.msra.mxu1 %v7057_v58 }
 0x8d4   : > { %v3100_v4 = vadd.f32 %v6331_v33, %v9329_v1  ;;  %v3045_v37 = vpop.f32.mrb[29].mxu0  ;;  %7062 = vmatprep.subr.bf16.mxu1 %v7061_v23 }
 0x8d5   : > { %v3099_v26 = vadd.f32 %v9329_v1, %v3045_v37  ;;  %6382 = vmatprep.mubr.f32.mxu1 %v3113_v62 }
 0x8d6   : > { %6383 = vmatmul.mubr.f32.gmra.mrb[26].mxu1 %v3114_v40  ;;  %v3116_v30 = vmax.f32 %v3100_v4, 0.0 }
 0x8d7   : > { %v3115_v13 = vmax.f32 %v3099_v26, 0.0  ;;  %v6334_v29 = vpop.f32.mrb[30].mxu0  ;;  %7064 = vmatpush3.bf16.msra.mxu1 %v7061_v23 }
 0x8d8   : > { %v3102_v44 = vadd.f32 %v6334_v29, %v9329_v1  ;;  %v3055_v27 = vpop.f32.mrb[31].mxu0  ;;  %7066 = vmatprep.subr.bf16.mxu1 %v7065_v59 }
 0x8d9   : > { %v3101_v46 = vadd.f32 %v9329_v1, %v3055_v27  ;;  %6385 = vmatprep.mubr.f32.mxu1 %v3115_v13 }
 0x8da   : > { %6386 = vmatmul.mubr.f32.gmra.mrb[28].mxu1 %v3116_v30  ;;  %v3118_v32 = vmax.f32 %v3102_v44, 0.0 }
 0x8db   : > { %v3117_v0 = vmax.f32 %v3101_v46, 0.0  ;;  %7068 = vmatpush3.bf16.msra.mxu1 %v7065_v59 }
 0x8dc   : > { %7070 = vmatprep.subr.bf16.mxu1 %v7069_v5 }
 0x8dd   : > { %6388 = vmatprep.mubr.f32.mxu1 %v3117_v0  ;;  %v5283_v0 = vld [vmem:[%s8750_s6 + $0x2] ss:$0 sm:$0xff] }
 0x8de   : > { %6389 = vmatmul.mubr.f32.gmra.mrb[30].mxu1 %v3118_v32 }
 0x8df   : > { %7072 = vmatpush3.bf16.msra.mxu1 %v7069_v5 }
 0x995   : > { %v6369_v49 = vpop.f32.mrb[16].mxu1 }
 0x996   : > { %v3216_v12 = vadd.f32 %v6369_v49, %v5265_v36  ;;  %v3210_v54 = vpop.f32.mrb[17].mxu1 }
 0x997   : > { %v3211_v39 = vadd.f32 %v5265_v36, %v3210_v54 }
 0x998   : > { %v3290_v1 = vmax.f32 %v3216_v12, 0.0 }
 0x999   : > { %v3289_v41 = vmax.f32 %v3211_v39, 0.0  ;;  %v6372_v24 = vpop.f32.mrb[18].mxu1 }
 0x99a   : > { %v3226_v48 = vadd.f32 %v6372_v24, %v5265_v36  ;;  %v3220_v2 = vpop.f32.mrb[19].mxu1 }
 0x99b   : > { %v3221_v14 = vadd.f32 %v5265_v36, %v3220_v2  ;;  %6423 = vmatprep.mubr.f32.mxu1 %v3289_v41 }
 0x99c   : > { %6424 = vmatmul.mubr.f32.vlgmr.msra.gmra.mrb[32].mxu1 %v3290_v1  ;;  %v3292_v9 = vmax.f32 %v3226_v48, 0.0 }
 0x99d   : > { %v3291_v52 = vmax.f32 %v3221_v14, 0.0  ;;  %v6375_v50 = vpop.f32.mrb[20].mxu1 }
 0x99e   : > { %v3236_v43 = vadd.f32 %v6375_v50, %v5265_v36  ;;  %v3230_v53 = vpop.f32.mrb[21].mxu1 }
 0x99f   : > { %v3231_v45 = vadd.f32 %v5265_v36, %v3230_v53  ;;  %6426 = vmatprep.mubr.f32.mxu1 %v3291_v52 }
 0x9a0   : > { %6427 = vmatmul.mubr.f32.gmra.mrb[34].mxu1 %v3292_v9  ;;  %v3294_v47 = vmax.f32 %v3236_v43, 0.0 }
 0x9a1   : > { %v3293_v25 = vmax.f32 %v3231_v45, 0.0  ;;  %v6378_v55 = vpop.f32.mrb[22].mxu1 }
 0x9a2   : > { %v3246_v15 = vadd.f32 %v6378_v55, %v5265_v36  ;;  %v3240_v61 = vpop.f32.mrb[23].mxu1 }
 0x9a3   : > { %v3241_v51 = vadd.f32 %v5265_v36, %v3240_v61  ;;  %6429 = vmatprep.mubr.f32.mxu1 %v3293_v25 }
 0x9a4   : > { %6430 = vmatmul.mubr.f32.gmra.mrb[36].mxu1 %v3294_v47  ;;  %v3296_v63 = vmax.f32 %v3246_v15, 0.0 }
 0x9a5   : > { %v3295_v58 = vmax.f32 %v3241_v51, 0.0  ;;  %v6381_v56 = vpop.f32.mrb[24].mxu1 }
 0x9a6   : > { %v3256_v18 = vadd.f32 %v6381_v56, %v5265_v36  ;;  %v3250_v57 = vpop.f32.mrb[25].mxu1 }
 0x9a7   : > { %v3251_v35 = vadd.f32 %v5265_v36, %v3250_v57  ;;  %6432 = vmatprep.mubr.f32.mxu1 %v3295_v58 }
 0x9a8   : > { %6433 = vmatmul.mubr.f32.gmra.mrb[38].mxu1 %v3296_v63  ;;  %v3298_v22 = vmax.f32 %v3256_v18, 0.0 }
 0x9a9   : > { %v3297_v19 = vmax.f32 %v3251_v35, 0.0  ;;  %v6384_v21 = vpop.f32.mrb[26].mxu1 }
 0x9aa   : > { %v3266_v23 = vadd.f32 %v6384_v21, %v5265_v36  ;;  %v3260_v42 = vpop.f32.mrb[27].mxu1 }
 0x9ab   : > { %v3261_v38 = vadd.f32 %v5265_v36, %v3260_v42  ;;  %6435 = vmatprep.mubr.f32.mxu1 %v3297_v19 }
 0x9ac   : > { %6436 = vmatmul.mubr.f32.gmra.mrb[40].mxu1 %v3298_v22  ;;  %v3300_v33 = vmax.f32 %v3266_v23, 0.0 }
 0x9ad   : > { %v3299_v7 = vmax.f32 %v3261_v38, 0.0  ;;  %v6387_v62 = vpop.f32.mrb[28].mxu1 }
 0x9ae   : > { %v3276_v40 = vadd.f32 %v6387_v62, %v5265_v36  ;;  %v3270_v4 = vpop.f32.mrb[29].mxu1 }
 0x9af   : > { %v3271_v37 = vadd.f32 %v5265_v36, %v3270_v4  ;;  %6438 = vmatprep.mubr.f32.mxu1 %v3299_v7 }
 0x9b0   : > { %6439 = vmatmul.mubr.f32.gmra.mrb[42].mxu1 %v3300_v33  ;;  %v3302_v13 = vmax.f32 %v3276_v40, 0.0 }
 0x9b1   : > { %v3301_v59 = vmax.f32 %v3271_v37, 0.0  ;;  %v6390_v26 = vpop.f32.mrb[30].mxu1 }
 0x9b2   : > { %v3286_v29 = vadd.f32 %v6390_v26, %v5265_v36  ;;  %v3280_v30 = vpop.f32.mrb[31].mxu1 }
 0x9b3   : > { %v3281_v44 = vadd.f32 %v5265_v36, %v3280_v30  ;;  %6441 = vmatprep.mubr.f32.mxu1 %v3301_v59 }
 0x9b4   : > { %6442 = vmatmul.mubr.f32.gmra.mrb[44].mxu1 %v3302_v13  ;;  %v3304_v46 = vmax.f32 %v3286_v29, 0.0 }
 0x9b5   : > { %v3303_v27 = vmax.f32 %v3281_v44, 0.0 }
 0x9b7   : > { %6444 = vmatprep.mubr.f32.mxu1 %v3303_v27 }
 0x9b8   : > { %6445 = vmatmul.mubr.f32.gmra.mrb[46].mxu1 %v3304_v46 }
 0xa6f   : > { %v6425_v32 = vpop.f32.mrb[32].mxu1 }
 0xa70   : > { %v3396_v17 = vpop.f32.mrb[33].mxu1  ;;  %v3402_v54 = vadd.f32 %v6425_v32, %v5283_v0 }
 0xa71   : > { %v3397_v16 = vadd.f32 %v5283_v0, %v3396_v17 }
 0xa73   : > { %v6428_v5 = vpop.f32.mrb[34].mxu1  ;;  %3479 = vadd.xlane.f32.xlu0 %v3397_v16 }
 0xa74   : > { %v3412_v49 = vadd.f32 %v6428_v5, %v5283_v0  ;;  %v3406_v12 = vpop.f32.mrb[35].mxu1 }
 0xa75   : > { %v3407_v41 = vadd.f32 %v5283_v0, %v3406_v12 }
 0xa76   : > { %3485 = vadd.xlane.f32.xlu1 %v3412_v49 }
 0xa77   : > { %v6431_v39 = vpop.f32.mrb[36].mxu1  ;;  %3481 = vadd.xlane.f32.xlu0 %v3402_v54 }
 0xa78   : > { %v3416_v36 = vpop.f32.mrb[37].mxu1  ;;  %v3422_v48 = vadd.f32 %v6431_v39, %v5283_v0 }
 0xa79   : > { %v3417_v24 = vadd.f32 %v5283_v0, %v3416_v36 }
 0xa7a   : > { %3483 = vadd.xlane.f32.xlu1 %v3407_v41 }
 0xa7b   : > { %v6434_v1 = vpop.f32.mrb[38].mxu1  ;;  %3487 = vadd.xlane.f32.xlu0 %v3417_v24 }
 0xa7c   : > { %v3426_v2 = vpop.f32.mrb[39].mxu1  ;;  %v3432_v50 = vadd.f32 %v6434_v1, %v5283_v0 }
 0xa7d   : > { %v3427_v14 = vadd.f32 %v5283_v0, %v3426_v2 }
 0xa7e   : > { %3489 = vadd.xlane.f32.xlu1 %v3422_v48 }
 0xa7f   : > { %v6437_v52 = vpop.f32.mrb[40].mxu1  ;;  %3491 = vadd.xlane.f32.xlu0 %v3427_v14 }
 0xa80   : > { %v3436_v9 = vpop.f32.mrb[41].mxu1  ;;  %v9363_v45 = vadd.f32 %v6437_v52, %v5283_v0 }
 0xa81   : > { %v3437_v43 = vadd.f32 %v5283_v0, %v3436_v9 }
 0xa82   : > { %3493 = vadd.xlane.f32.xlu1 %v3432_v50 }
 0xa83   : > { %v6440_v53 = vpop.f32.mrb[42].mxu1  ;;  %3495 = vadd.xlane.f32.xlu0 %v3437_v43 }
 0xa84   : > { %v3446_v25 = vpop.f32.mrb[43].mxu1  ;;  %v9369_v15 = vadd.f32 %v6440_v53, %v5283_v0 }
 0xa85   : > { %v9365_v55 = vadd.f32 %v5283_v0, %v3446_v25 }
 0xa86   : > { %3497 = vadd.xlane.f32.xlu1 %v9363_v45 }
 0xa87   : > { %v6443_v47 = vpop.f32.mrb[44].mxu1  ;;  %3499 = vadd.xlane.f32.xlu0 %v9365_v55 }
 0xa88   : > { %v3456_v61 = vpop.f32.mrb[45].mxu1  ;;  %v9375_v56 = vadd.f32 %v6443_v47, %v5283_v0 }
 0xa89   : > { %v9371_v51 = vadd.f32 %v5283_v0, %v3456_v61 }
 0xa8a   : > { %3501 = vadd.xlane.f32.xlu1 %v9369_v15 }
 0xa8b   : > { %3503 = vadd.xlane.f32.xlu0 %v9371_v51  ;;  %v6446_v58 = vpop.f32.mrb[46].mxu1 }
 0xa8c   : > { %v3466_v63 = vpop.f32.mrb[47].mxu1  ;;  %v9381_v57 = vadd.f32 %v6446_v58, %v5283_v0 }
 0xa8d   : > { %v9377_v18 = vadd.f32 %v5283_v0, %v3466_v63 }
 0xa8e   : > { %3505 = vadd.xlane.f32.xlu1 %v9375_v56 }
 0xa8f   : > { %3507 = vadd.xlane.f32.xlu0 %v9377_v18 }
 0xa92   : > { %3509 = vadd.xlane.f32.xlu1 %v9381_v57 }
 0xb00   : > { %v3480_v35 = vpop.xlane.xlu0 %3479 }
 0xb01   : > { %v3512_v19 = vmul.f32 0.0078125, %v3480_v35 }
 0xb03   : > { %v9384_v21 = vsub.f32 %v3397_v16, %v3512_v19  ;;  %v3486_v22 = vpop.xlane.xlu1 %3485 }
 0xb04   : > { %v3482_v23 = vpop.xlane.xlu0 %3481  ;;  %v3515_v42 = vmul.f32 0.0078125, %v3486_v22 }
 0xb05   : > { %v3513_v38 = vmul.f32 0.0078125, %v3482_v23  ;;  %v3544_v7 = vmul.f32 %v9384_v21, %v9384_v21 }
 0xb06   : > { %v9390_v37 = vsub.f32 %v3412_v49, %v3515_v42 }
 0xb07   : > { %v9388_v62 = vsub.f32 %v3402_v54, %v3513_v38  ;;  %v3484_v33 = vpop.xlane.xlu1 %3483  ;;  %3560 = vadd.xlane.f32.xlu0 %v3544_v7 }
 0xb08   : > { %v3514_v40 = vmul.f32 0.0078125, %v3484_v33  ;;  %v3488_v4 = vpop.xlane.xlu0 %3487  ;;  %v3547_v32 = vmul.f32 %v9390_v37, %v9390_v37 }
 0xb09   : > { %v3516_v59 = vmul.f32 0.0078125, %v3488_v4  ;;  %v3545_v26 = vmul.f32 %v9388_v62, %v9388_v62 }
 0xb0a   : > { %v9394_v13 = vsub.f32 %v3407_v41, %v3514_v40 }
 0xb0b   : > { %v3490_v29 = vpop.xlane.xlu1 %3489  ;;  %3562 = vadd.xlane.f32.xlu1 %v3545_v26  ;;  %v9396_v30 = vsub.f32 %v3417_v24, %v3516_v59  ;;  %v7620_v26 = vld [vmem:[#allocation7] sm:$0xff]  }
 0xb0c   : > { %v3517_v44 = vmul.f32 0.0078125, %v3490_v29  ;;  %v3492_v27 = vpop.xlane.xlu0 %3491  ;;  %v3546_v46 = vmul.f32 %v9394_v13, %v9394_v13  ;;  %6463 = vmatprep.mubr.bf16.mxu1 %v7620_v26  ;;  %v5308_v29 = vld [vmem:[%s8744_s3 + $0x300] sm:$0xff] }
 0xb0d   : > { %v3518_v0 = vmul.f32 0.0078125, %v3492_v27  ;;  %v3548_v54 = vmul.f32 %v9396_v30, %v9396_v30 }
 0xb0e   : > { %v9402_v17 = vsub.f32 %v3422_v48, %v3517_v44  ;;  %3564 = vadd.xlane.f32.xlu0 %v3546_v46  ;;  %v5309_v44 = vld [vmem:[%s8744_s3 + $0x308] sm:$0xff]  ;;  %v5311_v46 = vld [vmem:[%s8744_s3 + $0x318] sm:$0xff] }
 0xb0f   : > { %v3494_v16 = vpop.xlane.xlu1 %3493  ;;  %3566 = vadd.xlane.f32.xlu1 %v3547_v32  ;;  %v9404_v5 = vsub.f32 %v3427_v14, %v3518_v0  ;;  %v7073_v27 = vpack.c.bf16 %v5309_v44, %v5308_v29  ;;  %v5312_v32 = vld [vmem:[%s8744_s3 + $0x320] sm:$0xff] }
 0xb10   : > { %v3519_v49 = vmul.f32 0.0078125, %v3494_v16  ;;  %v3496_v12 = vpop.xlane.xlu0 %3495  ;;  %v3549_v39 = vmul.f32 %v9402_v17, %v9402_v17  ;;  %v5313_v16 = vld [vmem:[%s8744_s3 + $0x328] sm:$0xff] }
 0xb11   : > { %v3520_v41 = vmul.f32 0.0078125, %v3496_v12  ;;  %v3550_v14 = vmul.f32 %v9404_v5, %v9404_v5  ;;  %7074 = vmatprep.subr.bf16.mxu0 %v7073_v27  ;;  %v5314_v12 = vld [vmem:[%s8744_s3 + $0x330] sm:$0xff] }
 0xb12   : > { %v9410_v36 = vsub.f32 %v3432_v50, %v3519_v49  ;;  %3568 = vadd.xlane.f32.xlu0 %v3548_v54  ;;  %7076 = vmatpush3.bf16.msra.mxu0 %v7073_v27  ;;  %v7081_v49 = vpack.c.bf16 %v5313_v16, %v5312_v32  ;;  %v5315_v54 = vld [vmem:[%s8744_s3 + $0x338] sm:$0xff]  ;;  %v9472_v32 = vld [vmem:[%s8750_s6 + $0x3] ss:$0 sm:$0xff] }
 0xb13   : > { %v3498_v24 = vpop.xlane.xlu1 %3497  ;;  %3570 = vadd.xlane.f32.xlu1 %v3549_v39  ;;  %v9412_v1 = vsub.f32 %v3437_v43, %v3520_v41  ;;  %v7085_v39 = vpack.c.bf16 %v5315_v54, %v5314_v12  ;;  %v5316_v41 = vld [vmem:[%s8744_s3 + $0x340] sm:$0xff] }
 0xb14   : > { %v3521_v48 = vmul.f32 0.0078125, %v3498_v24  ;;  %v3500_v2 = vpop.xlane.xlu0 %3499  ;;  %v3551_v52 = vmul.f32 %v9410_v36, %v9410_v36  ;;  %v5317_v24 = vld [vmem:[%s8744_s3 + $0x348] sm:$0xff] }
 0xb15   : > { %v3522_v9 = vmul.f32 0.0078125, %v3500_v2  ;;  %v3552_v61 = vmul.f32 %v9412_v1, %v9412_v1  ;;  %v5318_v2 = vld [vmem:[%s8744_s3 + $0x350] sm:$0xff] }
 0xb16   : > { %v9419_v53 = vsub.f32 %v9363_v45, %v3521_v48  ;;  %3572 = vadd.xlane.f32.xlu0 %v3550_v14  ;;  %v7089_v48 = vpack.c.bf16 %v5317_v24, %v5316_v41  ;;  %v5319_v14 = vld [vmem:[%s8744_s3 + $0x358] sm:$0xff] }
 0xb17   : > { %v3502_v50 = vpop.xlane.xlu1 %3501  ;;  %3574 = vadd.xlane.f32.xlu1 %v3551_v52  ;;  %v9422_v25 = vsub.f32 %v9365_v55, %v3522_v9  ;;  %v7093_v52 = vpack.c.bf16 %v5319_v14, %v5318_v2  ;;  %v5320_v9 = vld [vmem:[%s8744_s3 + $0x360] sm:$0xff] }
 0xb18   : > { %v3523_v43 = vmul.f32 0.0078125, %v3502_v50  ;;  %v3504_v47 = vpop.xlane.xlu0 %3503  ;;  %v3553_v58 = vmul.f32 %v9419_v53, %v9419_v53  ;;  %v5321_v50 = vld [vmem:[%s8744_s3 + $0x368] sm:$0xff] }
 0xb19   : > { %v3524_v63 = vmul.f32 0.0078125, %v3504_v47  ;;  %v3554_v23 = vmul.f32 %v9422_v25, %v9422_v25  ;;  %v5322_v47 = vld [vmem:[%s8744_s3 + $0x370] sm:$0xff] }
 0xb1a   : > { %v9429_v35 = vsub.f32 %v9369_v15, %v3523_v43  ;;  %3576 = vadd.xlane.f32.xlu0 %v3552_v61  ;;  %v7097_v43 = vpack.c.bf16 %v5321_v50, %v5320_v9  ;;  %v5323_v61 = vld [vmem:[%s8744_s3 + $0x378] sm:$0xff] }
 0xb1b   : > { %v3506_v45 = vpop.xlane.xlu1 %3505  ;;  %3578 = vadd.xlane.f32.xlu1 %v3553_v58  ;;  %v9432_v19 = vsub.f32 %v9371_v51, %v3524_v63  ;;  %v7101_v58 = vpack.c.bf16 %v5323_v61, %v5322_v47 }
 0xb1c   : > { %v3525_v55 = vmul.f32 0.0078125, %v3506_v45  ;;  %v3508_v22 = vpop.xlane.xlu0 %3507  ;;  %v3555_v42 = vmul.f32 %v9429_v35, %v9429_v35 }
 0xb1d   : > { %v3526_v38 = vmul.f32 0.0078125, %v3508_v22  ;;  %v3556_v40 = vmul.f32 %v9432_v19, %v9432_v19 }
 0xb1e   : > { %v9439_v7 = vsub.f32 %v9375_v56, %v3525_v55  ;;  %3580 = vadd.xlane.f32.xlu0 %v3554_v23 }
 0xb1f   : > { %3582 = vadd.xlane.f32.xlu1 %v3555_v42  ;;  %v3510_v15 = vpop.xlane.xlu1 %3509  ;;  %v9442_v51 = vsub.f32 %v9377_v18, %v3526_v38 }
 0xb20   : > { %v3527_v33 = vmul.f32 0.0078125, %v3510_v15  ;;  %v3557_v4 = vmul.f32 %v9439_v7, %v9439_v7 }
 0xb21   : > { %v3558_v59 = vmul.f32 %v9442_v51, %v9442_v51 }
 0xb22   : > { %v9449_v56 = vsub.f32 %v9381_v57, %v3527_v33  ;;  %3584 = vadd.xlane.f32.xlu0 %v3556_v40  ;;  %v5310_v57 = vld [vmem:[%s8744_s3 + $0x310] sm:$0xff] }
 0xb23   : > { %3586 = vadd.xlane.f32.xlu1 %v3557_v4  ;;  %v7077_v0 = vpack.c.bf16 %v5311_v46, %v5310_v57 }
 0xb24   : > { %v3559_v18 = vmul.f32 %v9449_v56, %v9449_v56 }
 0xb25   : > { %7078 = vmatprep.subr.bf16.mxu0 %v7077_v0 }
 0xb26   : > { %3588 = vadd.xlane.f32.xlu0 %v3558_v59  ;;  %7080 = vmatpush3.bf16.msra.mxu0 %v7077_v0 }
 0xb27   : > { %3590 = vadd.xlane.f32.xlu1 %v3559_v18  ;;  %7082 = vmatprep.subr.bf16.mxu0 %v7081_v49 }
 0xb2a   : > { %7084 = vmatpush3.bf16.msra.mxu0 %v7081_v49 }
 0xb2b   : > { %7086 = vmatprep.subr.bf16.mxu0 %v7085_v39 }
 0xb2e   : > { %7088 = vmatpush3.bf16.msra.mxu0 %v7085_v39  ;;  %v9476_v39 = vld [vmem:[%s8750_s6 + $0x4] ss:$0 sm:$0xff] }
 0xb2f   : > { %7090 = vmatprep.subr.bf16.mxu0 %v7089_v48 }
 0xb32   : > { %7092 = vmatpush3.bf16.msra.mxu0 %v7089_v48 }
 0xb33   : > { %7094 = vmatprep.subr.bf16.mxu0 %v7093_v52 }
 0xb36   : > { %7096 = vmatpush3.bf16.msra.mxu0 %v7093_v52 }
 0xb37   : > { %7098 = vmatprep.subr.bf16.mxu0 %v7097_v43 }
 0xb3a   : > { %7100 = vmatpush3.bf16.msra.mxu0 %v7097_v43 }
 0xb3b   : > { %7102 = vmatprep.subr.bf16.mxu0 %v7101_v58 }
 0xb3e   : > { %7104 = vmatpush3.bf16.msra.mxu0 %v7101_v58 }
 0xb94   : > { %v3561_v63 = vpop.xlane.xlu0 %3560 }
 0xb95   : > { %v3592_v45 = vmul.f32 0.0078125, %v3561_v63 }
 0xb97   : > { %v3608_v55 = vadd.f32 1e-05, %v3592_v45 }
 0xb98   : > { %v3563_v22 = vpop.xlane.xlu1 %3562 }
 0xb99   : > { %7624 = vrsqrt.f32 %v3608_v55  ;;  %v3593_v23 = vmul.f32 0.0078125, %v3563_v22 }
 0xb9b   : > { %v3609_v42 = vadd.f32 1e-05, %v3593_v23  ;;  %v3565_v38 = vpop.xlane.xlu0 %3564 }
 0xb9c   : > { %v3594_v15 = vmul.f32 0.0078125, %v3565_v38  ;;  %v3567_v33 = vpop.xlane.xlu1 %3566 }
 0xb9d   : > { %7626 = vrsqrt.f32 %v3609_v42  ;;  %v3595_v40 = vmul.f32 0.0078125, %v3567_v33 }
 0xb9e   : > { %v3610_v4 = vadd.f32 1e-05, %v3594_v15 }
 0xb9f   : > { %v3611_v59 = vadd.f32 1e-05, %v3595_v40  ;;  %v3569_v18 = vpop.xlane.xlu0 %3568 }
 0xba0   : > { %7628 = vrsqrt.f32 %v3610_v4  ;;  %v3596_v26 = vmul.f32 0.0078125, %v3569_v18  ;;  %v3571_v29 = vpop.xlane.xlu1 %3570 }
 0xba1   : > { %7630 = vrsqrt.f32 %v3611_v59  ;;  %v3597_v44 = vmul.f32 0.0078125, %v3571_v29 }
 0xba2   : > { %v3612_v57 = vadd.f32 1e-05, %v3596_v26 }
 0xba3   : > { %v7625_v27 = vpop.eup %7624  ;;  %v3613_v46 = vadd.f32 1e-05, %v3597_v44  ;;  %v3573_v0 = vpop.xlane.xlu0 %3572 }
 0xba4   : > { %7632 = vrsqrt.f32 %v3612_v57  ;;  %v3598_v16 = vmul.f32 0.0078125, %v3573_v0  ;;  %v3575_v49 = vpop.xlane.xlu1 %3574  ;;  %v3640_v12 = vmul.f32 %v7625_v27, %v9384_v21 }
 0xba5   : > { %7634 = vrsqrt.f32 %v3613_v46  ;;  %v3599_v54 = vmul.f32 0.0078125, %v3575_v49 }
 0xba6   : > { %v3614_v41 = vadd.f32 1e-05, %v3598_v16  ;;  %v3662_v24 = vmul.f32 %v9472_v32, %v3640_v12 }
 0xba7   : > { %v7627_v48 = vpop.eup %7626  ;;  %v3615_v2 = vadd.f32 1e-05, %v3599_v54  ;;  %v3577_v14 = vpop.xlane.xlu0 %3576 }
 0xba8   : > { %7636 = vrsqrt.f32 %v3614_v41  ;;  %v3600_v52 = vmul.f32 0.0078125, %v3577_v14  ;;  %v3579_v9 = vpop.xlane.xlu1 %3578  ;;  %v3641_v50 = vmul.f32 %v7627_v48, %v9388_v62  ;;  %v3684_v43 = vadd.f32 %v9476_v39, %v3662_v24 }
 0xba9   : > { %7638 = vrsqrt.f32 %v3615_v2  ;;  %v3601_v47 = vmul.f32 0.0078125, %v3579_v9 }
 0xbaa   : > { %v7629_v21 = vpop.eup %7628  ;;  %v3616_v61 = vadd.f32 1e-05, %v3600_v52  ;;  %v3663_v58 = vmul.f32 %v9472_v32, %v3641_v50  ;;  %v4477_v63 = vadd.f32 %v3684_v43, %v9293_v60 }
 0xbab   : > { %v7631_v45 = vpop.eup %7630  ;;  %v3617_v55 = vadd.f32 1e-05, %v3601_v47  ;;  %v3581_v22 = vpop.xlane.xlu0 %3580  ;;  %v3642_v23 = vmul.f32 %v7629_v21, %v9394_v13 }
 0xbac   : > { %7640 = vrsqrt.f32 %v3616_v61  ;;  %v3602_v42 = vmul.f32 0.0078125, %v3581_v22  ;;  %v3583_v38 = vpop.xlane.xlu1 %3582  ;;  %v3685_v62 = vadd.f32 %v9476_v39, %v3663_v58  ;;  %4493 = vst [vmem:[#allocation3] sm:$0xff] %v4477_v63  ;;  %v3643_v15 = vmul.f32 %v7631_v45, %v9390_v37 }
 0xbad   : > { %7642 = vrsqrt.f32 %v3617_v55  ;;  %v3603_v33 = vmul.f32 0.0078125, %v3583_v38  ;;  %v3664_v40 = vmul.f32 %v9472_v32, %v3642_v23 }
 0xbae   : > { %v7633_v4 = vpop.eup %7632  ;;  %v3618_v59 = vadd.f32 1e-05, %v3602_v42  ;;  %v3708_v60 = vpack.c.bf16 %v3685_v62, %v3684_v43  ;;  %v4478_v18 = vadd.f32 %v3685_v62, %v9297_v20  ;;  %v3665_v26 = vmul.f32 %v9472_v32, %v3643_v15 }
 0xbaf   : > { %v7635_v13 = vpop.eup %7634  ;;  %v3619_v29 = vadd.f32 1e-05, %v3603_v33  ;;  %v3585_v44 = vpop.xlane.xlu0 %3584  ;;  %v3686_v57 = vadd.f32 %v9476_v39, %v3664_v40  ;;  %v3644_v27 = vmul.f32 %v7633_v4, %v9396_v30 }
 0xbb0   : > { %7644 = vrsqrt.f32 %v3618_v59  ;;  %v3604_v37 = vmul.f32 0.0078125, %v3585_v44  ;;  %v3587_v46 = vpop.xlane.xlu1 %3586  ;;  %6447 = vmatprep.subr.bf16.mxu1 %v3708_v60  ;;  %4494 = vst [vmem:[#allocation3 + $0x8] sm:$0xff] %v4478_v18  ;;  %v3687_v0 = vadd.f32 %v9476_v39, %v3665_v26  ;;  %v3645_v16 = vmul.f32 %v7635_v13, %v9402_v17 }
 0xbb1   : > { %7646 = vrsqrt.f32 %v3619_v29  ;;  %v3605_v20 = vmul.f32 0.0078125, %v3587_v46  ;;  %6448 = vmatpush3.bf16.msra.mxu1 %v3708_v60  ;;  %v4479_v49 = vadd.f32 %v3686_v57, %v9299_v6  ;;  %v3666_v12 = vmul.f32 %v9472_v32, %v3644_v27 }
 0xbb2   : > { %v7637_v54 = vpop.eup %7636  ;;  %v3620_v41 = vadd.f32 1e-05, %v3604_v37  ;;  %v3709_v24 = vpack.c.bf16 %v3687_v0, %v3686_v57  ;;  %v4480_v30 = vadd.f32 %v3687_v0, %v9303_v8  ;;  %v3667_v48 = vmul.f32 %v9472_v32, %v3645_v16  ;;  %v7672_v37 = vld [vmem:[#allocation3 + $0x50] sm:$0xff] }
 0xbb3   : > { %v7639_v2 = vpop.eup %7638  ;;  %v3621_v14 = vadd.f32 1e-05, %v3605_v20  ;;  %v3589_v52 = vpop.xlane.xlu0 %3588  ;;  %4495 = vst [vmem:[#allocation3 + $0x10] sm:$0xff] %v4479_v49  ;;  %v3688_v17 = vadd.f32 %v9476_v39, %v3666_v12  ;;  %v3646_v9 = vmul.f32 %v7637_v54, %v9404_v5  ;;  %v7673_v20 = vld [vmem:[#allocation3 + $0x58] sm:$0xff] }
 0xbb4   : > { %7648 = vrsqrt.f32 %v3620_v41  ;;  %v3606_v50 = vmul.f32 0.0078125, %v3589_v52  ;;  %v3591_v6 = vpop.xlane.xlu1 %3590  ;;  %6449 = vmatprep.subr.bf16.mxu1 %v3709_v24  ;;  %4496 = vst [vmem:[#allocation3 + $0x18] sm:$0xff] %v4480_v30  ;;  %v3689_v43 = vadd.f32 %v9476_v39, %v3667_v48  ;;  %v3647_v47 = vmul.f32 %v7639_v2, %v9410_v36  ;;  %v7674_v30 = vld [vmem:[#allocation3 + $0x60] sm:$0xff]  ;;  %v7675_v52 = vld [vmem:[#allocation3 + $0x68] sm:$0xff] }
 0xbb5   : > { %7650 = vrsqrt.f32 %v3621_v14  ;;  %v3607_v8 = vmul.f32 0.0078125, %v3591_v6  ;;  %6450 = vmatpush3.bf16.msra.mxu1 %v3709_v24  ;;  %v4481_v21 = vadd.f32 %v3688_v17, %v9305_v10  ;;  %v3668_v61 = vmul.f32 %v9472_v32, %v3646_v9 }
 0xbb6   : > { %v7641_v58 = vpop.eup %7640  ;;  %v3622_v63 = vadd.f32 1e-05, %v3606_v50  ;;  %v3710_v45 = vpack.c.bf16 %v3689_v43, %v3688_v17  ;;  %v4482_v5 = vadd.f32 %v3689_v43, %v9309_v34  ;;  %v3669_v55 = vmul.f32 %v9472_v32, %v3647_v47  ;;  %v7677_v47 = vld [vmem:[#allocation3 + $0x78] sm:$0xff] }
 0xbb7   : > { %v7643_v22 = vpop.eup %7642  ;;  %v3623_v23 = vadd.f32 1e-05, %v3607_v8  ;;  %4497 = vst [vmem:[#allocation3 + $0x20] sm:$0xff] %v4481_v21  ;;  %v3690_v42 = vadd.f32 %v9476_v39, %v3668_v61  ;;  %v3648_v36 = vmul.f32 %v7641_v58, %v9412_v1  ;;  %v7622_v21 = vld [vmem:[#allocation7 + $0x10] sm:$0xff]   ;;  %v5292_v61 = vld [vmem:[%s8744_s3 + $0x280] sm:$0xff] }
 0xbb8   : > { %7652 = vrsqrt.f32 %v3622_v63  ;;  %6451 = vmatprep.subr.bf16.mxu1 %v3710_v45  ;;  %4498 = vst [vmem:[#allocation3 + $0x28] sm:$0xff] %v4482_v5  ;;  %v3691_v10 = vadd.f32 %v9476_v39, %v3669_v55  ;;  %v3649_v38 = vmul.f32 %v7643_v22, %v9419_v53  ;;  %v5293_v58 = vld [vmem:[%s8744_s3 + $0x288] sm:$0xff]  ;;  %v5328_v55 = vld [vmem:[%s8744_s3 + $0x390] sm:$0xff] }
 0xbb9   : > { %7654 = vrsqrt.f32 %v3623_v23  ;;  %6452 = vmatpush3.bf16.msra.mxu1 %v3710_v45  ;;  %v4483_v34 = vadd.f32 %v3690_v42, %v9311_v11  ;;  %v3670_v62 = vmul.f32 %v9472_v32, %v3648_v36  ;;  %v7105_v63 = vpack.c.bf16 %v5293_v58, %v5292_v61  ;;  %v5326_v45 = vld [vmem:[%s8744_s3 + $0x380] sm:$0xff]  ;;  %v5327_v5 = vld [vmem:[%s8744_s3 + $0x388] sm:$0xff]  ;;  %v5329_v23 = vld [vmem:[%s8744_s3 + $0x398] sm:$0xff] }
 0xbba   : > { %v7645_v15 = vpop.eup %7644  ;;  %v3711_v33 = vpack.c.bf16 %v3691_v10, %v3690_v42  ;;  %v4484_v40 = vadd.f32 %v3691_v10, %v9315_v28  ;;  %v3671_v4 = vmul.f32 %v9472_v32, %v3649_v38  ;;  %v7137_v22 = vpack.c.bf16 %v5327_v5, %v5326_v45  ;;  %v5330_v36 = vld [vmem:[%s8744_s3 + $0x3a0] sm:$0xff]  ;;  %v5331_v10 = vld [vmem:[%s8744_s3 + $0x3a8] sm:$0xff] }
 0xbbb   : > { %v7647_v1 = vpop.eup %7646  ;;  %4499 = vst [vmem:[#allocation3 + $0x30] sm:$0xff] %v4483_v34  ;;  %v3692_v59 = vadd.f32 %v9476_v39, %v3670_v62  ;;  %v3650_v60 = vmul.f32 %v7645_v15, %v9422_v25  ;;  %7106 = vmatprep.subr.bf16.mxu0 %v7105_v63  ;;  %v7141_v42 = vpack.c.bf16 %v5329_v23, %v5328_v55  ;;  %v5332_v34 = vld [vmem:[%s8744_s3 + $0x3b0] sm:$0xff]  ;;  %v5333_v62 = vld [vmem:[%s8744_s3 + $0x3b8] sm:$0xff]  ;;  %v5344_v61 = vld [vmem:[%s8744_s3 + $0x400] sm:$0xff] }
 0xbbc   : > { %6453 = vmatprep.subr.bf16.mxu1 %v3711_v33  ;;  %4500 = vst [vmem:[#allocation3 + $0x38] sm:$0xff] %v4484_v40  ;;  %v3693_v53 = vadd.f32 %v9476_v39, %v3671_v4  ;;  %v3651_v11 = vmul.f32 %v7647_v1, %v9429_v35  ;;  %v7145_v38 = vpack.c.bf16 %v5331_v10, %v5330_v36  ;;  %v5335_v40 = vld [vmem:[%s8744_s3 + $0x3c8] sm:$0xff]  ;;  %v5336_v1 = vld [vmem:[%s8744_s3 + $0x3d0] sm:$0xff]  ;;  %v5347_v36 = vld [vmem:[%s8744_s3 + $0x418] sm:$0xff] }
 0xbbd   : > { %6454 = vmatpush3.bf16.msra.mxu1 %v3711_v33  ;;  %v4485_v18 = vadd.f32 %v3692_v59, %v9317_v31  ;;  %v3672_v26 = vmul.f32 %v9472_v32, %v3650_v60  ;;  %v7149_v15 = vpack.c.bf16 %v5333_v62, %v5332_v34  ;;  %v5334_v33 = vld [vmem:[%s8744_s3 + $0x3c0] sm:$0xff]  ;;  %v5345_v58 = vld [vmem:[%s8744_s3 + $0x408] sm:$0xff] }
 0xbbe   : > { %v7649_v28 = vpop.eup %7648  ;;  %v3712_v13 = vpack.c.bf16 %v3693_v53, %v3692_v59  ;;  %v4486_v29 = vadd.f32 %v3693_v53, %v9321_v3  ;;  %v3673_v44 = vmul.f32 %v9472_v32, %v3651_v11  ;;  %v7153_v4 = vpack.c.bf16 %v5335_v40, %v5334_v33  ;;  %v5337_v59 = vld [vmem:[%s8744_s3 + $0x3d8] sm:$0xff]  ;;  %v5338_v53 = vld [vmem:[%s8744_s3 + $0x3e0] sm:$0xff]  ;;  %v5339_v11 = vld [vmem:[%s8744_s3 + $0x3e8] sm:$0xff] }
 0xbbf   : > { %v7651_v57 = vpop.eup %7650  ;;  %4501 = vst [vmem:[#allocation3 + $0x40] sm:$0xff] %v4485_v18  ;;  %v3694_v25 = vadd.f32 %v9476_v39, %v3672_v26  ;;  %v3652_v27 = vmul.f32 %v7649_v28, %v9432_v19  ;;  %v7157_v60 = vpack.c.bf16 %v5337_v59, %v5336_v1  ;;  %v7161_v18 = vpack.c.bf16 %v5339_v11, %v5338_v53  ;;  %v5294_v26 = vld [vmem:[%s8744_s3 + $0x290] sm:$0xff]  ;;  %v5295_v28 = vld [vmem:[%s8744_s3 + $0x298] sm:$0xff]  ;;  %v5325_v45 = vld [vmem:[%s8750_s6 + $0x5] ss:$0 sm:$0xff] }
 0xbc0   : > { %6455 = vmatprep.subr.bf16.mxu1 %v3712_v13  ;;  %4502 = vst [vmem:[#allocation3 + $0x48] sm:$0xff] %v4486_v29  ;;  %v3695_v35 = vadd.f32 %v9476_v39, %v3673_v44  ;;  %v3653_v31 = vmul.f32 %v7651_v57, %v9439_v7  ;;  %v7109_v57 = vpack.c.bf16 %v5295_v28, %v5294_v26  ;;  %v5349_v1 = vld [vmem:[%s8744_s3 + $0x428] sm:$0xff] }
 0xbc1   : > { %6456 = vmatpush3.bf16.msra.mxu1 %v3712_v13  ;;  %v4487_v46 = vadd.f32 %v7672_v37, %v3694_v25  ;;  %v3674_v0 = vmul.f32 %v9472_v32, %v3652_v27  ;;  %v5296_v27 = vld [vmem:[%s8744_s3 + $0x2a0] sm:$0xff]  ;;  %v5298_v37 = vld [vmem:[%s8744_s3 + $0x2b0] sm:$0xff] }
 0xbc2   : > { %v7653_v3 = vpop.eup %7652  ;;  %v3713_v16 = vpack.c.bf16 %v3695_v35, %v3694_v25  ;;  %v4488_v49 = vadd.f32 %v7673_v20, %v3695_v35  ;;  %v3675_v12 = vmul.f32 %v9472_v32, %v3653_v31  ;;  %v5297_v35 = vld [vmem:[%s8744_s3 + $0x2a8] sm:$0xff] }
 0xbc3   : > { %v7655_v54 = vpop.eup %7654  ;;  %4503 = vst [vmem:[#allocation3 + $0x50] sm:$0xff] %v4487_v46  ;;  %v3696_v19 = vadd.f32 %v9476_v39, %v3674_v0  ;;  %v3654_v41 = vmul.f32 %v7653_v3, %v9442_v51  ;;  %v7113_v31 = vpack.c.bf16 %v5297_v35, %v5296_v27  ;;  %v5299_v46 = vld [vmem:[%s8744_s3 + $0x2b8] sm:$0xff] }
 0xbc4   : > { %6457 = vmatprep.subr.bf16.mxu1 %v3713_v16  ;;  %4504 = vst [vmem:[#allocation3 + $0x58] sm:$0xff] %v4488_v49  ;;  %v3697_v7 = vadd.f32 %v9476_v39, %v3675_v12  ;;  %v3655_v24 = vmul.f32 %v7655_v54, %v9449_v56  ;;  %v7676_v56 = vld [vmem:[#allocation3 + $0x70] sm:$0xff]  ;;  %v5300_v49 = vld [vmem:[%s8744_s3 + $0x2c0] sm:$0xff] }
 0xbc5   : > { %6458 = vmatpush3.bf16.msra.mxu1 %v3713_v16  ;;  %v4489_v48 = vadd.f32 %v7674_v30, %v3696_v19  ;;  %v3676_v2 = vmul.f32 %v9472_v32, %v3654_v41  ;;  %v7117_v16 = vpack.c.bf16 %v5299_v46, %v5298_v37  ;;  %v5301_v12 = vld [vmem:[%s8744_s3 + $0x2c8] sm:$0xff]  ;;  %v5302_v41 = vld [vmem:[%s8744_s3 + $0x2d0] sm:$0xff]  ;;  %v5352_v46 = vld [vmem:[%s8744_s3 + $0x440] sm:$0xff] }
 0xbc6   : > { %v3714_v14 = vpack.c.bf16 %v3697_v7, %v3696_v19  ;;  %v4490_v17 = vadd.f32 %v7675_v52, %v3697_v7  ;;  %v3677_v9 = vmul.f32 %v9472_v32, %v3655_v24  ;;  %v7621_v32 = vld [vmem:[#allocation7 + $0x8] sm:$0xff]   ;;  %v7121_v19 = vpack.c.bf16 %v5301_v12, %v5300_v49  ;;  %v5303_v7 = vld [vmem:[%s8744_s3 + $0x2d8] sm:$0xff]  ;;  %v5306_v52 = vld [vmem:[%s8744_s3 + $0x2f0] sm:$0xff] }
 0xbc7   : > { %4505 = vst [vmem:[#allocation3 + $0x60] sm:$0xff] %v4489_v48  ;;  %v3698_v50 = vadd.f32 %v9476_v39, %v3676_v2  ;;  %v9561_v24 = vld [vmem:[#allocation2] sm:$0xff]  ;;  %v7125_v30 = vpack.c.bf16 %v5303_v7, %v5302_v41  ;;  %v5305_v2 = vld [vmem:[%s8744_s3 + $0x2e8] sm:$0xff]  ;;  %v5354_v49 = vld [vmem:[%s8744_s3 + $0x450] sm:$0xff] }
 0xbc8   : > { %6459 = vmatprep.subr.bf16.mxu1 %v3714_v14  ;;  %4506 = vst [vmem:[#allocation3 + $0x68] sm:$0xff] %v4490_v17  ;;  %v3699_v51 = vadd.f32 %v9476_v39, %v3677_v9  ;;  %v7623_v39 = vld [vmem:[#allocation7 + $0x18] sm:$0xff]   ;;  %v5304_v48 = vld [vmem:[%s8744_s3 + $0x2e0] sm:$0xff]  ;;  %v5357_v41 = vld [vmem:[%s8744_s3 + $0x468] sm:$0xff] }
 0xbc9   : > { %6460 = vmatpush3.bf16.msra.mxu1 %v3714_v14  ;;  %v4491_v6 = vadd.f32 %v7676_v56, %v3698_v50  ;;  %v7129_v14 = vpack.c.bf16 %v5305_v2, %v5304_v48  ;;  %v5307_v17 = vld [vmem:[%s8744_s3 + $0x2f8] sm:$0xff] }
 0xbca   : > { %v3715_v43 = vpack.c.bf16 %v3699_v51, %v3698_v50  ;;  %v4492_v8 = vadd.f32 %v7677_v47, %v3699_v51  ;;  %v7133_v9 = vpack.c.bf16 %v5307_v17, %v5306_v52  ;;  %v9568_v50 = vld [vmem:[#allocation2 + $0x8] sm:$0xff]  ;;  %v9571_v51 = vld [vmem:[#allocation2 + $0x10] sm:$0xff]  ;;  %v9574_v56 = vld [vmem:[#allocation2 + $0x18] sm:$0xff] }
 0xbcb   : > { %4507 = vst [vmem:[#allocation3 + $0x70] sm:$0xff] %v4491_v6  ;;  %v9577_v6 = vld [vmem:[#allocation2 + $0x20] sm:$0xff]  ;;  %v9583_v47 = vld [vmem:[#allocation2 + $0x30] sm:$0xff] }
 0xbcc   : > { %6461 = vmatprep.subr.bf16.mxu1 %v3715_v43  ;;  %4508 = vst [vmem:[#allocation3 + $0x78] sm:$0xff] %v4492_v8  ;;  %v9586_v8 = vld [vmem:[#allocation2 + $0x38] sm:$0xff] }
 0xbcd   : > { %6462 = vmatpush3.bf16.msra.mxu1 %v3715_v43  ;;  %v9580_v43 = vld [vmem:[#allocation2 + $0x28] sm:$0xff]  ;;  %v5355_v12 = vld [vmem:[%s8744_s3 + $0x458] sm:$0xff] }
 0xbce   : > { %7138 = vmatprep.subr.bf16.mxu1 %v7137_v22  ;;  %v5359_v48 = vld [vmem:[%s8744_s3 + $0x478] sm:$0xff] }
 0xbd0   : > { %6464 = vmatmul.mubr.bf16.vlgmr.msra.gmra.mrb[48].mxu1 %v7621_v32  ;;  %v5340_v32 = vld [vmem:[%s8744_s3 + $0x3f0] sm:$0xff] }
 0xbd1   : > { %6467 = vmatprep.mubr.bf16.mxu1 %v7622_v21  ;;  %7140 = vmatpush3.bf16.msra.mxu1 %v7137_v22  ;;  %v5341_v21 = vld [vmem:[%s8744_s3 + $0x3f8] sm:$0xff] }
 0xbd2   : > { %7142 = vmatprep.subr.bf16.mxu1 %v7141_v42 }
 0xbd5   : > { %7144 = vmatpush3.bf16.msra.mxu1 %v7141_v42  ;;  %v5346_v42 = vld [vmem:[%s8744_s3 + $0x410] sm:$0xff] }
 0xbd6   : > { %7146 = vmatprep.subr.bf16.mxu1 %v7145_v38  ;;  %v7173_v33 = vpack.c.bf16 %v5347_v36, %v5346_v42 }
 0xbd8   : > { %6468 = vmatmul.mubr.bf16.gmra.mrb[52].mxu1 %v7623_v39  ;;  %v7165_v39 = vpack.c.bf16 %v5341_v21, %v5340_v32 }
 0xbd9   : > { %7148 = vmatpush3.bf16.msra.mxu1 %v7145_v38 }
 0xbda   : > { %7150 = vmatprep.subr.bf16.mxu1 %v7149_v15 }
 0xbdd   : > { %7152 = vmatpush3.bf16.msra.mxu1 %v7149_v15 }
 0xbde   : > { %7154 = vmatprep.subr.bf16.mxu1 %v7153_v4 }
 0xbe1   : > { %7156 = vmatpush3.bf16.msra.mxu1 %v7153_v4  ;;  %v5348_v4 = vld [vmem:[%s8744_s3 + $0x420] sm:$0xff] }
 0xbe2   : > { %7158 = vmatprep.subr.bf16.mxu1 %v7157_v60  ;;  %v7177_v26 = vpack.c.bf16 %v5349_v1, %v5348_v4  ;;  %v5361_v1 = vld [vmem:[%s8750_s6 + $0x7] ss:$0 sm:$0xff] }
 0xbe5   : > { %7160 = vmatpush3.bf16.msra.mxu1 %v7157_v60 }
 0xbe6   : > { %7162 = vmatprep.subr.bf16.mxu1 %v7161_v18 }
 0xbe9   : > { %7164 = vmatpush3.bf16.msra.mxu1 %v7161_v18 }
 0xbea   : > { %7166 = vmatprep.subr.bf16.mxu1 %v7165_v39 }
 0xbed   : > { %7168 = vmatpush3.bf16.msra.mxu1 %v7165_v39 }
 0xca3   : > { %v6465_v13 = vpop.f32.mrb[48].mxu1 }
 0xca4   : > { %v3774_v29 = vpop.f32.mrb[49].mxu1 }
 0xca5   : > { %v6466_v44 = vpop.f32.mrb[50].mxu1  ;;  %6503 = vmatprep.mubr.f32.mxu0 %v3774_v29  ;;  %v5351_v29 = vld [vmem:[%s8744_s3 + $0x438] sm:$0xff] }
 0xca6   : > { %v3777_v25 = vpop.f32.mrb[51].mxu1 }
 0xca7   : > { %6504 = vmatmul.mubr.f32.vlgmr.msra.gmra.mrb[32].mxu0 %v3777_v25 }
 0xca8   : > { %7108 = vmatpush3.bf16.msra.mxu0 %v7105_v63  ;;  %6506 = vmatprep.mubr.f32.mxu0 %v6465_v13  ;;  %v7169_v63 = vpack.c.bf16 %v5345_v58, %v5344_v61  ;;  %v5350_v13 = vld [vmem:[%s8744_s3 + $0x430] sm:$0xff] }
 0xca9   : > { %7110 = vmatprep.subr.bf16.mxu0 %v7109_v57 }
 0xcaa   : > { %7170 = vmatprep.subr.bf16.mxu1 %v7169_v63 }
 0xcab   : > { %6507 = vmatmul.mubr.f32.gmra.mrb[34].mxu0 %v6466_v44  ;;  %v6469_v0 = vpop.f32.mrb[52].mxu1 }
 0xcac   : > { %7112 = vmatpush3.bf16.msra.mxu0 %v7109_v57  ;;  %v3790_v3 = vpop.f32.mrb[53].mxu1 }
 0xcad   : > { %7114 = vmatprep.subr.bf16.mxu0 %v7113_v31  ;;  %v6470_v20 = vpop.f32.mrb[54].mxu1  ;;  %6509 = vmatprep.mubr.f32.mxu0 %v3790_v3 }
 0xcae   : > { %v3793_v54 = vpop.f32.mrb[55].mxu1 }
 0xcaf   : > { %6510 = vmatmul.mubr.f32.gmra.mrb[36].mxu0 %v3793_v54  ;;  %v7189_v54 = vpack.c.bf16 %v5355_v12, %v5354_v49 }
 0xcb0   : > { %7116 = vmatpush3.bf16.msra.mxu0 %v7113_v31  ;;  %6512 = vmatprep.mubr.f32.mxu0 %v6469_v0  ;;  %v7181_v31 = vpack.c.bf16 %v5351_v29, %v5350_v13  ;;  %v5353_v0 = vld [vmem:[%s8744_s3 + $0x448] sm:$0xff] }
 0xcb1   : > { %7118 = vmatprep.subr.bf16.mxu0 %v7117_v16 }
 0xcb3   : > { %6513 = vmatmul.mubr.f32.gmra.mrb[38].mxu0 %v6470_v20  ;;  %v7185_v20 = vpack.c.bf16 %v5353_v0, %v5352_v46 }
 0xcb4   : > { %7120 = vmatpush3.bf16.msra.mxu0 %v7117_v16  ;;  %6547 = vmatprep.mubr.f32.mxu0 %v9561_v24 }
 0xcb5   : > { %7122 = vmatprep.subr.bf16.mxu0 %v7121_v19 }
 0xcb8   : > { %7124 = vmatpush3.bf16.msra.mxu0 %v7121_v19  ;;  %v5356_v19 = vld [vmem:[%s8744_s3 + $0x460] sm:$0xff] }
 0xcb9   : > { %7126 = vmatprep.subr.bf16.mxu0 %v7125_v30  ;;  %v7193_v7 = vpack.c.bf16 %v5357_v41, %v5356_v19 }
 0xcbc   : > { %7128 = vmatpush3.bf16.msra.mxu0 %v7125_v30  ;;  %v5358_v30 = vld [vmem:[%s8744_s3 + $0x470] sm:$0xff] }
 0xcbd   : > { %7130 = vmatprep.subr.bf16.mxu0 %v7129_v14  ;;  %v7197_v2 = vpack.c.bf16 %v5359_v48, %v5358_v30 }
 0xcc0   : > { %7132 = vmatpush3.bf16.msra.mxu0 %v7129_v14  ;;  %v5343_v14 = vld [vmem:[%s8750_s6 + $0x6] ss:$0 sm:$0xff] }
 0xcc1   : > { %7134 = vmatprep.subr.bf16.mxu0 %v7133_v9 }
 0xcc4   : > { %7136 = vmatpush3.bf16.msra.mxu0 %v7133_v9 }
 0xcc7   : > { %6548 = vmatmul.mubr.f32.vlgmr.msra.gmra.mrb[32].mxu0 %v9568_v50 }
 0xcc8   : > { %6550 = vmatprep.mubr.f32.mxu0 %v9571_v51 }
 0xccb   : > { %6551 = vmatmul.mubr.f32.gmra.mrb[34].mxu0 %v9574_v56 }
 0xccc   : > { %6553 = vmatprep.mubr.f32.mxu0 %v9577_v6 }
 0xccf   : > { %6554 = vmatmul.mubr.f32.gmra.mrb[36].mxu0 %v9580_v43 }
 0xcd0   : > { %6556 = vmatprep.mubr.f32.mxu0 %v9583_v47 }
 0xcd3   : > { %6557 = vmatmul.mubr.f32.gmra.mrb[38].mxu0 %v9586_v8 }
 0xd9a   : > { %v6549_v5 = vpop.f32.mrb[32].mxu0 }
 0xd9b   : > { %v4058_v55 = vadd.f32 %v6549_v5, %v5325_v45  ;;  %v4010_v22 = vpop.f32.mrb[33].mxu0 }
 0xd9c   : > { %v4057_v23 = vadd.f32 %v5325_v45, %v4010_v22 }
 0xd9d   : > { %v4066_v34 = vmax.f32 %v4058_v55, 0.0 }
 0xd9e   : > { %v4065_v10 = vmax.f32 %v4057_v23, 0.0  ;;  %v6552_v38 = vpop.f32.mrb[34].mxu0 }
 0xd9f   : > { %v4060_v62 = vadd.f32 %v6552_v38, %v5325_v45  ;;  %v4020_v15 = vpop.f32.mrb[35].mxu0 }
 0xda0   : > { %v4059_v40 = vadd.f32 %v5325_v45, %v4020_v15  ;;  %6591 = vmatprep.mubr.f32.mxu1 %v4065_v10 }
 0xda1   : > { %6592 = vmatmul.mubr.f32.vlgmr.msra.gmra.mrb[56].mxu1 %v4066_v34  ;;  %v4068_v53 = vmax.f32 %v4060_v62, 0.0 }
 0xda2   : > { %v4067_v59 = vmax.f32 %v4059_v40, 0.0  ;;  %v6555_v60 = vpop.f32.mrb[36].mxu0  ;;  %7172 = vmatpush3.bf16.msra.mxu1 %v7169_v63 }
 0xda3   : > { %v4062_v11 = vadd.f32 %v6555_v60, %v5325_v45  ;;  %v4030_v18 = vpop.f32.mrb[37].mxu0  ;;  %7174 = vmatprep.subr.bf16.mxu1 %v7173_v33 }
 0xda4   : > { %v4061_v28 = vadd.f32 %v5325_v45, %v4030_v18  ;;  %6594 = vmatprep.mubr.f32.mxu1 %v4067_v59 }
 0xda5   : > { %6595 = vmatmul.mubr.f32.gmra.mrb[58].mxu1 %v4068_v53  ;;  %v4070_v25 = vmax.f32 %v4062_v11, 0.0 }
 0xda6   : > { %v4069_v44 = vmax.f32 %v4061_v28, 0.0  ;;  %v6558_v57 = vpop.f32.mrb[38].mxu0  ;;  %7176 = vmatpush3.bf16.msra.mxu1 %v7173_v33 }
 0xda7   : > { %v4064_v27 = vadd.f32 %v6558_v57, %v5325_v45  ;;  %v4040_v35 = vpop.f32.mrb[39].mxu0  ;;  %7178 = vmatprep.subr.bf16.mxu1 %v7177_v26 }
 0xda8   : > { %v4063_v37 = vadd.f32 %v5325_v45, %v4040_v35  ;;  %6597 = vmatprep.mubr.f32.mxu1 %v4069_v44 }
 0xda9   : > { %6598 = vmatmul.mubr.f32.gmra.mrb[60].mxu1 %v4070_v25  ;;  %v4072_v16 = vmax.f32 %v4064_v27, 0.0 }
 0xdaa   : > { %v4071_v3 = vmax.f32 %v4063_v37, 0.0  ;;  %7180 = vmatpush3.bf16.msra.mxu1 %v7177_v26 }
 0xdab   : > { %7182 = vmatprep.subr.bf16.mxu1 %v7181_v31 }
 0xdac   : > { %6600 = vmatprep.mubr.f32.mxu1 %v4071_v3 }
 0xdad   : > { %6601 = vmatmul.mubr.f32.gmra.mrb[62].mxu1 %v4072_v16 }
 0xdae   : > { %7184 = vmatpush3.bf16.msra.mxu1 %v7181_v31 }
 0xdaf   : > { %7186 = vmatprep.subr.bf16.mxu1 %v7185_v20 }
 0xdb2   : > { %7188 = vmatpush3.bf16.msra.mxu1 %v7185_v20 }
 0xdb3   : > { %7190 = vmatprep.subr.bf16.mxu1 %v7189_v54 }
 0xdb6   : > { %7192 = vmatpush3.bf16.msra.mxu1 %v7189_v54 }
 0xdb7   : > { %7194 = vmatprep.subr.bf16.mxu1 %v7193_v7 }
 0xdba   : > { %7196 = vmatpush3.bf16.msra.mxu1 %v7193_v7 }
 0xdbb   : > { %7198 = vmatprep.subr.bf16.mxu1 %v7197_v2 }
 0xdbe   : > { %7200 = vmatpush3.bf16.msra.mxu1 %v7197_v2 }
 0xe74   : > { %v6593_v52 = vpop.f32.mrb[56].mxu1 }
 0xe75   : > { %v4170_v17 = vadd.f32 %v6593_v52, %v5343_v14  ;;  %v4164_v9 = vpop.f32.mrb[57].mxu1 }
 0xe76   : > { %v4165_v32 = vadd.f32 %v5343_v14, %v4164_v9 }
 0xe77   : > { %v4204_v61 = vmax.f32 %v4170_v17, 0.0 }
 0xe78   : > { %v4203_v21 = vmax.f32 %v4165_v32, 0.0  ;;  %v6596_v39 = vpop.f32.mrb[58].mxu1 }
 0xe79   : > { %v4180_v58 = vadd.f32 %v6596_v39, %v5343_v14  ;;  %v4174_v63 = vpop.f32.mrb[59].mxu1 }
 0xe7a   : > { %v4175_v45 = vadd.f32 %v5343_v14, %v4174_v63  ;;  %6635 = vmatprep.mubr.f32.mxu1 %v4203_v21 }
 0xe7b   : > { %6636 = vmatmul.mubr.f32.vlgmr.msra.gmra.mrb[64].mxu1 %v4204_v61  ;;  %v4206_v22 = vmax.f32 %v4180_v58, 0.0 }
 0xe7c   : > { %v4205_v5 = vmax.f32 %v4175_v45, 0.0  ;;  %v6599_v55 = vpop.f32.mrb[60].mxu1 }
 0xe7d   : > { %v4190_v23 = vadd.f32 %v6599_v55, %v5343_v14  ;;  %v4184_v42 = vpop.f32.mrb[61].mxu1 }
 0xe7e   : > { %v4185_v36 = vadd.f32 %v5343_v14, %v4184_v42  ;;  %6638 = vmatprep.mubr.f32.mxu1 %v4205_v5 }
 0xe7f   : > { %6639 = vmatmul.mubr.f32.gmra.mrb[66].mxu1 %v4206_v22  ;;  %v4208_v34 = vmax.f32 %v4190_v23, 0.0 }
 0xe80   : > { %v4207_v10 = vmax.f32 %v4185_v36, 0.0  ;;  %v6602_v38 = vpop.f32.mrb[62].mxu1 }
 0xe81   : > { %v4200_v62 = vadd.f32 %v6602_v38, %v5343_v14  ;;  %v4194_v15 = vpop.f32.mrb[63].mxu1 }
 0xe82   : > { %v4195_v33 = vadd.f32 %v5343_v14, %v4194_v15  ;;  %6641 = vmatprep.mubr.f32.mxu1 %v4207_v10 }
 0xe83   : > { %6642 = vmatmul.mubr.f32.gmra.mrb[68].mxu1 %v4208_v34  ;;  %v4210_v4 = vmax.f32 %v4200_v62, 0.0 }
 0xe84   : > { %v4209_v40 = vmax.f32 %v4195_v33, 0.0 }
 0xe86   : > { %6644 = vmatprep.mubr.f32.mxu1 %v4209_v40 }
 0xe87   : > { %6645 = vmatmul.mubr.f32.gmra.mrb[70].mxu1 %v4210_v4 }
 0xf4e   : > { %v6637_v59 = vpop.f32.mrb[64].mxu1 }
 0xf4f   : > { %v4308_v60 = vadd.f32 %v6637_v59, %v5361_v1  ;;  %v4302_v53 = vpop.f32.mrb[65].mxu1 }
 0xf50   : > { %v4303_v11 = vadd.f32 %v5361_v1, %v4302_v53 }
 0xf51   : > { %4347 = vadd.xlane.f32.xlu1 %v4308_v60 }
 0xf52   : > { %v6640_v18 = vpop.f32.mrb[66].mxu1  ;;  %4345 = vadd.xlane.f32.xlu0 %v4303_v11 }
 0xf53   : > { %v4318_v26 = vadd.f32 %v6640_v18, %v5361_v1  ;;  %v4312_v28 = vpop.f32.mrb[67].mxu1 }
 0xf54   : > { %v4313_v13 = vadd.f32 %v5361_v1, %v4312_v28 }
 0xf55   : > { %4351 = vadd.xlane.f32.xlu1 %v4318_v26 }
 0xf56   : > { %v6643_v29 = vpop.f32.mrb[68].mxu1  ;;  %4349 = vadd.xlane.f32.xlu0 %v4313_v13 }
 0xf57   : > { %v4328_v44 = vadd.f32 %v6643_v29, %v5361_v1  ;;  %v4322_v57 = vpop.f32.mrb[69].mxu1 }
 0xf58   : > { %v4323_v25 = vadd.f32 %v5361_v1, %v4322_v57 }
 0xf59   : > { %4355 = vadd.xlane.f32.xlu1 %v4328_v44 }
 0xf5a   : > { %4353 = vadd.xlane.f32.xlu0 %v4323_v25  ;;  %v6646_v27 = vpop.f32.mrb[70].mxu1 }
 0xf5b   : > { %v4338_v35 = vadd.f32 %v6646_v27, %v5361_v1  ;;  %v4332_v31 = vpop.f32.mrb[71].mxu1 }
 0xf5c   : > { %v4333_v37 = vadd.f32 %v5361_v1, %v4332_v31 }
 0xf5d   : > { %4359 = vadd.xlane.f32.xlu1 %v4338_v35 }
 0xf5e   : > { %4357 = vadd.xlane.f32.xlu0 %v4333_v37 }
 0xfde   : > { %v4348_v46 = vpop.xlane.xlu1 %4347 }
 0xfdf   : > { %v4362_v0 = vmul.f32 0.0078125, %v4348_v46  ;;  %v4346_v3 = vpop.xlane.xlu0 %4345 }
 0xfe0   : > { %v4361_v16 = vmul.f32 0.0078125, %v4346_v3 }
 0xfe1   : > { %v9610_v20 = vsub.f32 %v4308_v60, %v4362_v0 }
 0xfe2   : > { %v9612_v49 = vsub.f32 %v4303_v11, %v4361_v16  ;;  %v4352_v12 = vpop.xlane.xlu1 %4351 }
 0xfe3   : > { %v4364_v54 = vmul.f32 0.0078125, %v4352_v12  ;;  %v4350_v19 = vpop.xlane.xlu0 %4349  ;;  %v4378_v41 = vmul.f32 %v9610_v20, %v9610_v20  ;;  %v5365_v12 = vld [vmem:[%s8750_s6 + $0x9] ss:$0 sm:$0xff] }
 0xfe4   : > { %v4363_v7 = vmul.f32 0.0078125, %v4350_v19  ;;  %v4377_v30 = vmul.f32 %v9612_v49, %v9612_v49 }
 0xfe5   : > { %v9618_v48 = vsub.f32 %v4318_v26, %v4364_v54  ;;  %4387 = vadd.xlane.f32.xlu1 %v4378_v41 }
 0xfe6   : > { %v9620_v2 = vsub.f32 %v4313_v13, %v4363_v7  ;;  %v4356_v14 = vpop.xlane.xlu1 %4355  ;;  %4385 = vadd.xlane.f32.xlu0 %v4377_v30 }
 0xfe7   : > { %v4366_v52 = vmul.f32 0.0078125, %v4356_v14  ;;  %v4354_v17 = vpop.xlane.xlu0 %4353  ;;  %v4380_v9 = vmul.f32 %v9618_v48, %v9618_v48 }
 0xfe8   : > { %v4365_v32 = vmul.f32 0.0078125, %v4354_v17  ;;  %v4379_v21 = vmul.f32 %v9620_v2, %v9620_v2 }
 0xfe9   : > { %v9626_v39 = vsub.f32 %v4328_v44, %v4366_v52  ;;  %4391 = vadd.xlane.f32.xlu1 %v4380_v9 }
 0xfea   : > { %v9628_v61 = vsub.f32 %v4323_v25, %v4365_v32  ;;  %v4360_v58 = vpop.xlane.xlu1 %4359  ;;  %4389 = vadd.xlane.f32.xlu0 %v4379_v21 }
 0xfeb   : > { %v4368_v63 = vmul.f32 0.0078125, %v4360_v58  ;;  %v4358_v45 = vpop.xlane.xlu0 %4357  ;;  %v4382_v5 = vmul.f32 %v9626_v39, %v9626_v39 }
 0xfec   : > { %v4367_v55 = vmul.f32 0.0078125, %v4358_v45  ;;  %v4381_v22 = vmul.f32 %v9628_v61, %v9628_v61 }
 0xfed   : > { %v9634_v23 = vsub.f32 %v4338_v35, %v4368_v63  ;;  %4395 = vadd.xlane.f32.xlu1 %v4382_v5 }
 0xfee   : > { %v9636_v42 = vsub.f32 %v4333_v37, %v4367_v55  ;;  %4393 = vadd.xlane.f32.xlu0 %v4381_v22  ;;  %v5364_v37 = vld [vmem:[%s8750_s6 + $0x8] ss:$0 sm:$0xff] }
 0xfef   : > { %v4384_v36 = vmul.f32 %v9634_v23, %v9634_v23 }
 0xff0   : > { %v4383_v10 = vmul.f32 %v9636_v42, %v9636_v42 }
 0xff1   : > { %4399 = vadd.xlane.f32.xlu1 %v4384_v36 }
 0xff2   : > { %4397 = vadd.xlane.f32.xlu0 %v4383_v10 }
0x1072   : > { %v4388_v38 = vpop.xlane.xlu1 %4387 }
0x1073   : > { %v4402_v34 = vmul.f32 0.0078125, %v4388_v38  ;;  %v4386_v62 = vpop.xlane.xlu0 %4385 }
0x1074   : > { %v4401_v15 = vmul.f32 0.0078125, %v4386_v62 }
0x1075   : > { %v4410_v33 = vadd.f32 1e-05, %v4402_v34 }
0x1076   : > { %v4409_v40 = vadd.f32 1e-05, %v4401_v15  ;;  %v4392_v4 = vpop.xlane.xlu1 %4391 }
0x1077   : > { %7656 = vrsqrt.f32 %v4410_v33  ;;  %v4404_v1 = vmul.f32 0.0078125, %v4392_v4  ;;  %v4390_v59 = vpop.xlane.xlu0 %4389 }
0x1078   : > { %7658 = vrsqrt.f32 %v4409_v40  ;;  %v4403_v60 = vmul.f32 0.0078125, %v4390_v59  ;;  %v4516_v59 = vld [vmem:[#allocation18 + $0x18] sm:$0xff] (!%p5366_p9) }
0x1079   : > { %v4412_v53 = vadd.f32 1e-05, %v4404_v1 }
0x107a   : > { %v4411_v11 = vadd.f32 1e-05, %v4403_v60  ;;  %v4396_v18 = vpop.xlane.xlu1 %4395 }
0x107b   : > { %7660 = vrsqrt.f32 %v4412_v53  ;;  %v4406_v26 = vmul.f32 0.0078125, %v4396_v18  ;;  %v4394_v28 = vpop.xlane.xlu0 %4393  ;;  %v4517_v53 = vld [vmem:[#allocation18 + $0x20] sm:$0xff] (!%p5366_p9) }
0x107c   : > { %7662 = vrsqrt.f32 %v4411_v11  ;;  %v4405_v13 = vmul.f32 0.0078125, %v4394_v28  ;;  %v4519_v11 = vld [vmem:[#allocation18 + $0x30] sm:$0xff] (!%p5366_p9)  ;;  %v4650_v18 = vld [vmem:[#allocation18 + $0x80] sm:$0xff] (!%p5366_p9)  ;;  %v4520_v28 = vld [vmem:[#allocation18 + $0x38] sm:$0xff] (!%p5366_p9) }
0x107d   : > { %v4414_v29 = vadd.f32 1e-05, %v4406_v26  ;;  %v4651_v26 = vld [vmem:[#allocation18 + $0x88] sm:$0xff] (!%p5366_p9) }
0x107e   : > { %v4413_v44 = vadd.f32 1e-05, %v4405_v13  ;;  %v4400_v57 = vpop.xlane.xlu1 %4399  ;;  %v7233_v13 = vpack.c.bf16 (!%p5366_p9), %v4651_v26, %v4650_v18 }
0x107f   : > { %7664 = vrsqrt.f32 %v4414_v29  ;;  %v4408_v25 = vmul.f32 0.0078125, %v4400_v57  ;;  %v4398_v27 = vpop.xlane.xlu0 %4397  ;;  %v4652_v29 = vld [vmem:[#allocation18 + $0x90] sm:$0xff] (!%p5366_p9) }
0x1080   : > { %7666 = vrsqrt.f32 %v4413_v44  ;;  %v4407_v35 = vmul.f32 0.0078125, %v4398_v27  ;;  %v4653_v44 = vld [vmem:[#allocation18 + $0x98] sm:$0xff] (!%p5366_p9)  ;;  %v4655_v27 = vld [vmem:[#allocation18 + $0xa8] sm:$0xff] (!%p5366_p9)  ;;  %7234 = vmatprep.subr.bf16.mxu1 (!%p5366_p9), %v7233_v13 }
0x1081   : > { %v7657_v31 = vpop.eup %7656  ;;  %v4416_v46 = vadd.f32 1e-05, %v4408_v25  ;;  %v7237_v57 = vpack.c.bf16 (!%p5366_p9), %v4653_v44, %v4652_v29  ;;  %v4654_v25 = vld [vmem:[#allocation18 + $0xa0] sm:$0xff] (!%p5366_p9)  ;;  %7236 = vmatpush3.bf16.msra.mxu1 (!%p5366_p9), %v7233_v13 }
0x1082   : > { %v7659_v0 = vpop.eup %7658  ;;  %v4426_v3 = vmul.f32 %v7657_v31, %v9610_v20  ;;  %v4415_v16 = vadd.f32 1e-05, %v4407_v35  ;;  %v7213_v35 = vpack.c.bf16 (!%p5366_p9), %v4520_v28, %v4519_v11  ;;  %v4521_v31 = vld [vmem:[#allocation18 + $0x40] sm:$0xff] (!%p5366_p9) }
0x1083   : > { %v4425_v54 = vmul.f32 %v7659_v0, %v9612_v49  ;;  %7668 = vrsqrt.f32 %v4416_v46  ;;  %7238 = vmatprep.subr.bf16.mxu1 (!%p5366_p9), %v7237_v57  ;;  %v7241_v46 = vpack.c.bf16 (!%p5366_p9), %v4655_v27, %v4654_v25  ;;  %v4656_v0 = vld [vmem:[#allocation18 + $0xb0] sm:$0xff] (!%p5366_p9) }
0x1084   : > { %v4440_v19 = vmul.f32 %v5364_v37, %v4426_v3  ;;  %7670 = vrsqrt.f32 %v4415_v16  ;;  %v4657_v3 = vld [vmem:[#allocation18 + $0xb8] sm:$0xff] (!%p5366_p9) }
0x1085   : > { %v7661_v41 = vpop.eup %7660  ;;  %v4439_v7 = vmul.f32 %v5364_v37, %v4425_v54  ;;  %7240 = vmatpush3.bf16.msra.mxu1 (!%p5366_p9), %v7237_v57  ;;  %v4524_v54 = vld [vmem:[#allocation18 + $0x58] sm:$0xff] (!%p5366_p9) }
0x1086   : > { %v7663_v30 = vpop.eup %7662  ;;  %v4454_v14 = vadd.f32 %v5365_v12, %v4440_v19  ;;  %v4428_v52 = vmul.f32 %v7661_v41, %v9618_v48  ;;  %7242 = vmatprep.subr.bf16.mxu1 (!%p5366_p9), %v7241_v46  ;;  %v7245_v19 = vpack.c.bf16 (!%p5366_p9), %v4657_v3, %v4656_v0  ;;  %v4658_v41 = vld [vmem:[#allocation18 + $0xc0] sm:$0xff] (!%p5366_p9) }
0x1087   : > { %v4453_v17 = vadd.f32 %v5365_v12, %v4439_v7  ;;  %v4427_v9 = vmul.f32 %v7663_v30, %v9620_v2  ;;  %v4659_v7 = vld [vmem:[#allocation18 + $0xc8] sm:$0xff] (!%p5366_p9) }
0x1088   : > { %v9649_v32 = vadd.f32 %v9568_v50, %v4454_v14  ;;  %v4442_v20 = vmul.f32 %v5364_v37, %v4428_v52  ;;  %v4525_v14 = vld [vmem:[#allocation18 + $0x60] sm:$0xff] (!%p5366_p9)  ;;  %v4526_v52 = vld [vmem:[#allocation18 + $0x68] sm:$0xff] (!%p5366_p9) }
0x1089   : > { %v7665_v21 = vpop.eup %7664  ;;  %v4461_v58 = vadd.f32 %v9561_v24, %v4453_v17  ;;  %v4441_v49 = vmul.f32 %v5364_v37, %v4427_v9  ;;  %7244 = vmatpush3.bf16.msra.mxu1 (!%p5366_p9), %v7241_v46  ;;  %v7249_v17 = vpack.c.bf16 (!%p5366_p9), %v4659_v7, %v4658_v41  ;;  %v4660_v9 = vld [vmem:[#allocation18 + $0xd0] sm:$0xff] (!%p5366_p9) }
0x108a   : > { %v7667_v63 = vpop.eup %7666  ;;  %4470 = vst [vmem:[#allocation2 + $0x8] sm:$0xff] %v9649_v32  ;;  %v4456_v45 = vadd.f32 %v5365_v12, %v4442_v20  ;;  %v4430_v5 = vmul.f32 %v7665_v21, %v9626_v39  ;;  %7246 = vmatprep.subr.bf16.mxu1 (!%p5366_p9), %v7245_v19  ;;  %v4661_v20 = vld [vmem:[#allocation18 + $0xd8] sm:$0xff] (!%p5366_p9)  ;;  %v7225_v21 = vpack.c.bf16 (!%p5366_p9), %v4526_v52, %v4525_v14  ;;  %v5368_v52 = vld [vmem:[#allocation19 + $0x1] ss:$0 sm:$0xff] (!%p5366_p9) }
0x108b   : > { %4469 = vst [vmem:[#allocation2] sm:$0xff] %v4461_v58  ;;  %v4455_v55 = vadd.f32 %v5365_v12, %v4441_v49  ;;  %v4429_v48 = vmul.f32 %v7667_v63, %v9628_v61  ;;  %6679 = vmatprep.mubr.f32.mxu0 (!%p5366_p9), %v4461_v58  ;;  %v4527_v58 = vld [vmem:[#allocation18 + $0x70] sm:$0xff] (!%p5366_p9)  ;;  %v4528_v49 = vld [vmem:[#allocation18 + $0x78] sm:$0xff] (!%p5366_p9)  ;;  %v7253_v63 = vpack.c.bf16 (!%p5366_p9), %v4661_v20, %v4660_v9 }
0x108c   : > { %v9656_v2 = vadd.f32 %v9574_v56, %v4456_v45  ;;  %v4444_v50 = vmul.f32 %v5364_v37, %v4430_v5  ;;  %v4662_v45 = vld [vmem:[#allocation18 + $0xe0] sm:$0xff] (!%p5366_p9)  ;;  %v4663_v5 = vld [vmem:[#allocation18 + $0xe8] sm:$0xff] (!%p5366_p9)  ;;  %v4801_v7 = vld [vmem:[#allocation21 + $0x70] sm:$0xff] (!%p5366_p9) }
0x108d   : > { %v7669_v22 = vpop.eup %7668  ;;  %v9659_v36 = vadd.f32 %v9571_v51, %v4455_v55  ;;  %v4443_v24 = vmul.f32 %v5364_v37, %v4429_v48  ;;  %7248 = vmatpush3.bf16.msra.mxu1 (!%p5366_p9), %v7245_v19  ;;  %v7229_v55 = vpack.c.bf16 (!%p5366_p9), %v4528_v49, %v4527_v58  ;;  %v7257_v48 = vpack.c.bf16 (!%p5366_p9), %v4663_v5, %v4662_v45 }
0x108e   : > { %v7671_v10 = vpop.eup %7670  ;;  %4472 = vst [vmem:[#allocation2 + $0x18] sm:$0xff] %v9656_v2  ;;  %v4458_v38 = vadd.f32 %v5365_v12, %v4444_v50  ;;  %v4432_v34 = vmul.f32 %v7669_v22, %v9634_v23  ;;  %7250 = vmatprep.subr.bf16.mxu1 (!%p5366_p9), %v7249_v17  ;;  %v4664_v50 = vld [vmem:[#allocation18 + $0xf0] sm:$0xff] (!%p5366_p9)  ;;  %v4665_v22 = vld [vmem:[#allocation18 + $0xf8] sm:$0xff] (!%p5366_p9) }
0x108f   : > { %4471 = vst [vmem:[#allocation2 + $0x10] sm:$0xff] %v9659_v36  ;;  %v4457_v39 = vadd.f32 %v5365_v12, %v4443_v24  ;;  %v4431_v61 = vmul.f32 %v7671_v10, %v9636_v42  ;;  %v4515_v42 = vld [vmem:[#allocation18 + $0x10] sm:$0xff] (!%p5366_p9)  ;;  %v7261_v24 = vpack.c.bf16 (!%p5366_p9), %v4665_v22, %v4664_v50  ;;  %v4787_v10 = vld [vmem:[#allocation21] sm:$0xff] (!%p5366_p9) }
0x1090   : > { %v9666_v56 = vadd.f32 %v9580_v43, %v4458_v38  ;;  %v4446_v62 = vmul.f32 %v5364_v37, %v4432_v34  ;;  %v4514_v43 = vld [vmem:[#allocation18 + $0x8] sm:$0xff] (!%p5366_p9)  ;;  %v7205_v60 = vpack.c.bf16 (!%p5366_p9), %v4516_v59, %v4515_v42 }
0x1091   : > { %v9669_v15 = vadd.f32 %v9577_v6, %v4457_v39  ;;  %v4445_v51 = vmul.f32 %v5364_v37, %v4431_v61  ;;  %4512 = sbr.rel (%p5366_p9) target bundleno = 4940 (0x134c), region = 156  ;;  %v4513_v6 = vld [vmem:[#allocation18] sm:$0xff] (!%p5366_p9)  ;;  %v4522_v37 = vld [vmem:[#allocation18 + $0x48] sm:$0xff] (!%p5366_p9)  ;;  %7252 = vmatpush3.bf16.msra.mxu1 (!%p5366_p9), %v7249_v17 }
0x1092   : > { %4474 = vst [vmem:[#allocation2 + $0x28] sm:$0xff] %v9666_v56  ;;  %v4460_v33 = vadd.f32 %v5365_v12, %v4446_v62  ;;  %v7201_v1 = vpack.c.bf16 (!%p5366_p9), %v4514_v43, %v4513_v6  ;;  %v7217_v16 = vpack.c.bf16 (!%p5366_p9), %v4522_v37, %v4521_v31  ;;  %7254 = vmatprep.subr.bf16.mxu1 (!%p5366_p9), %v7253_v63  ;;  %v4788_v38 = vld [vmem:[#allocation21 + $0x8] sm:$0xff] (!%p5366_p9)  ;;  %v4793_v62 = vld [vmem:[#allocation21 + $0x30] sm:$0xff] (!%p5366_p9)  ;;  %v4798_v6 = vld [vmem:[#allocation21 + $0x58] sm:$0xff] (!%p5366_p9) }
0x1093   : > { %4473 = vst [vmem:[#allocation2 + $0x20] sm:$0xff] %v9669_v15  ;;  %v4459_v40 = vadd.f32 %v5365_v12, %v4445_v51  ;;  %v4523_v12 = vld [vmem:[#allocation18 + $0x50] sm:$0xff] (!%p5366_p9)  ;;  %v7265_v34 = vpack.c.bf16 (!%p5366_p9), %v4788_v38, %v4787_v10  ;;  %v4799_v42 = vld [vmem:[#allocation21 + $0x60] sm:$0xff] (!%p5366_p9) }
0x1094   : > { %v9674_v23 = vadd.f32 %v9586_v8, %v4460_v33  ;;  %v4518_v8 = vld [vmem:[#allocation18 + $0x28] sm:$0xff] (!%p5366_p9)  ;;  %7202 = vmatprep.subr.bf16.mxu0 (!%p5366_p9), %v7201_v1  ;;  %v7221_v30 = vpack.c.bf16 (!%p5366_p9), %v4524_v54, %v4523_v12 }
0x1095   : > { %v9677_v4 = vadd.f32 %v9583_v47, %v4459_v40  ;;  %7204 = vmatpush3.bf16.msra.mxu0 (!%p5366_p9), %v7201_v1  ;;  %v7209_v47 = vpack.c.bf16 (!%p5366_p9), %v4518_v8, %v4517_v53  ;;  %7256 = vmatpush3.bf16.msra.mxu1 (!%p5366_p9), %v7253_v63  ;;  %v4792_v61 = vld [vmem:[#allocation21 + $0x28] sm:$0xff] (!%p5366_p9)  ;;  %v4795_v33 = vld [vmem:[#allocation21 + $0x40] sm:$0xff] (!%p5366_p9) }
0x1096   : > { %4476 = vst [vmem:[#allocation2 + $0x38] sm:$0xff] %v9674_v23  ;;  %7206 = vmatprep.subr.bf16.mxu0 (!%p5366_p9), %v7205_v60  ;;  %7258 = vmatprep.subr.bf16.mxu1 (!%p5366_p9), %v7257_v48  ;;  %v4796_v40 = vld [vmem:[#allocation21 + $0x48] sm:$0xff] (!%p5366_p9) }
0x1097   : > { %4475 = vst [vmem:[#allocation2 + $0x30] sm:$0xff] %v9677_v4  ;;  %v4800_v1 = vld [vmem:[#allocation21 + $0x68] sm:$0xff] (!%p5366_p9) }
0x1098   : > { %v7289_v59 = vpack.c.bf16 %v4800_v1, %v4799_v42 }
0x1099   : > { %7208 = vmatpush3.bf16.msra.mxu0 %v7205_v60  ;;  %7260 = vmatpush3.bf16.msra.mxu1 %v7257_v48  ;;  %v5367_v60 = vld [vmem:[#allocation19] ss:$0 sm:$0xff] }
0x109a   : > { %7210 = vmatprep.subr.bf16.mxu0 %v7209_v47  ;;  %7262 = vmatprep.subr.bf16.mxu1 %v7261_v24 }
0x109d   : > { %7212 = vmatpush3.bf16.msra.mxu0 %v7209_v47  ;;  %7264 = vmatpush3.bf16.msra.mxu1 %v7261_v24 }
0x109e   : > { %7214 = vmatprep.subr.bf16.mxu0 %v7213_v35  ;;  %7353 = vmatprep.subr.bf16.mxu1 %v7265_v34 }
0x10a1   : > { %7216 = vmatpush3.bf16.msra.mxu0 %v7213_v35 }
0x10a2   : > { %7218 = vmatprep.subr.bf16.mxu0 %v7217_v16 }
0x10a5   : > { %7220 = vmatpush3.bf16.msra.mxu0 %v7217_v16 }
0x10a6   : > { %7222 = vmatprep.subr.bf16.mxu0 %v7221_v30 }
0x10a9   : > { %7224 = vmatpush3.bf16.msra.mxu0 %v7221_v30  ;;  %v4802_v30 = vld [vmem:[#allocation21 + $0x78] sm:$0xff] }
0x10aa   : > { %7226 = vmatprep.subr.bf16.mxu0 %v7225_v21  ;;  %v7293_v14 = vpack.c.bf16 %v4802_v30, %v4801_v7 }
0x10ad   : > { %7228 = vmatpush3.bf16.msra.mxu0 %v7225_v21 }
0x10ae   : > { %7230 = vmatprep.subr.bf16.mxu0 %v7229_v55 }
0x10b1   : > { %7232 = vmatpush3.bf16.msra.mxu0 %v7229_v55 }
0x10b2   : > { %7266 = vmatprep.subr.bf16.mxu0 %v7265_v34 }
0x10b4   : > { %6680 = vmatmul.mubr.f32.vlgmr.msra.gmra.mrb[0].mxu0 %v9649_v32  ;;  %v4789_v32 = vld [vmem:[#allocation21 + $0x10] sm:$0xff] }
0x10b5   : > { %6682 = vmatprep.mubr.f32.mxu0 %v9659_v36  ;;  %v4790_v36 = vld [vmem:[#allocation21 + $0x18] sm:$0xff]  ;;  %7268 = vmatpush3.bf16.msra.mxu0 %v7265_v34 }
0x10b6   : > { %v7269_v39 = vpack.c.bf16 %v4790_v36, %v4789_v32 }
0x10b8   : > { %6683 = vmatmul.mubr.f32.gmra.mrb[2].mxu0 %v9656_v2  ;;  %v4791_v2 = vld [vmem:[#allocation21 + $0x20] sm:$0xff]  ;;  %7270 = vmatprep.subr.bf16.mxu0 %v7269_v39 }
0x10b9   : > { %6685 = vmatprep.mubr.f32.mxu0 %v9669_v15  ;;  %v4794_v15 = vld [vmem:[#allocation21 + $0x38] sm:$0xff]  ;;  %7272 = vmatpush3.bf16.msra.mxu0 %v7269_v39 }
0x10ba   : > { %v7277_v51 = vpack.c.bf16 %v4794_v15, %v4793_v62  ;;  %v5369_v15 = vld [vmem:[#allocation22] ss:$0 sm:$0xff] }
0x10bc   : > { %6686 = vmatmul.mubr.f32.gmra.mrb[4].mxu0 %v9666_v56  ;;  %v7273_v56 = vpack.c.bf16 %v4792_v61, %v4791_v2 }
0x10bd   : > { %6688 = vmatprep.mubr.f32.mxu0 %v9677_v4  ;;  %v4797_v4 = vld [vmem:[#allocation21 + $0x50] sm:$0xff] }
0x10be   : > { %7274 = vmatprep.subr.bf16.mxu0 %v7273_v56  ;;  %v7285_v43 = vpack.c.bf16 %v4798_v6, %v4797_v4 }
0x10bf   : > { %7276 = vmatpush3.bf16.msra.mxu0 %v7273_v56 }
0x10c0   : > { %6689 = vmatmul.mubr.f32.gmra.mrb[6].mxu0 %v9674_v23  ;;  %7278 = vmatprep.subr.bf16.mxu0 %v7277_v51  ;;  %v7281_v23 = vpack.c.bf16 %v4796_v40, %v4795_v33 }
0x10c3   : > { %7280 = vmatpush3.bf16.msra.mxu0 %v7277_v51 }
0x10c4   : > { %7282 = vmatprep.subr.bf16.mxu0 %v7281_v23 }
0x10c7   : > { %7284 = vmatpush3.bf16.msra.mxu0 %v7281_v23 }
0x10c8   : > { %7286 = vmatprep.subr.bf16.mxu0 %v7285_v43 }
0x10cb   : > { %7288 = vmatpush3.bf16.msra.mxu0 %v7285_v43 }
0x10cc   : > { %7290 = vmatprep.subr.bf16.mxu0 %v7289_v59 }
0x10cf   : > { %7292 = vmatpush3.bf16.msra.mxu0 %v7289_v59 }
0x10d0   : > { %7294 = vmatprep.subr.bf16.mxu0 %v7293_v14 }
0x10d3   : > { %7296 = vmatpush3.bf16.msra.mxu0 %v7293_v14 }
0x1187   : > { %v6681_v53 = vpop.f32.mrb[0].mxu0 }
0x1188   : > { %v4608_v8 = vadd.f32 %v6681_v53, %v5367_v60  ;;  %v4602_v47 = vpop.f32.mrb[1].mxu0 }
0x1189   : > { %v4603_v11 = vadd.f32 %v5367_v60, %v4602_v47 }
0x118a   : > { %v4642_v28 = vmax.f32 %v4608_v8, 0.0 }
0x118b   : > { %v6684_v18 = vpop.f32.mrb[2].mxu0  ;;  %v4641_v26 = vmax.f32 %v4603_v11, 0.0 }
0x118c   : > { %v4618_v13 = vadd.f32 %v6684_v18, %v5367_v60  ;;  %v4612_v29 = vpop.f32.mrb[3].mxu0 }
0x118d   : > { %v4613_v44 = vadd.f32 %v5367_v60, %v4612_v29  ;;  %6723 = vmatprep.mubr.f32.mxu1 %v4641_v26 }
0x118e   : > { %6724 = vmatmul.mubr.f32.vlgmr.msra.gmra.mrb[0].mxu1 %v4642_v28  ;;  %v4644_v27 = vmax.f32 %v4618_v13, 0.0 }
0x118f   : > { %v4643_v57 = vmax.f32 %v4613_v44, 0.0  ;;  %v6687_v25 = vpop.f32.mrb[4].mxu0  ;;  %7361 = vmatpush3.bf16.msra.mxu1 %v7265_v34 }
0x1190   : > { %v4628_v35 = vadd.f32 %v6687_v25, %v5367_v60  ;;  %v4622_v31 = vpop.f32.mrb[5].mxu0  ;;  %7354 = vmatprep.subr.bf16.mxu1 %v7269_v39 }
0x1191   : > { %v4623_v37 = vadd.f32 %v5367_v60, %v4622_v31  ;;  %6726 = vmatprep.mubr.f32.mxu1 %v4643_v57 }
0x1192   : > { %6727 = vmatmul.mubr.f32.gmra.mrb[2].mxu1 %v4644_v27  ;;  %v4646_v3 = vmax.f32 %v4628_v35, 0.0 }
0x1193   : > { %v4645_v46 = vmax.f32 %v4623_v37, 0.0  ;;  %v6690_v0 = vpop.f32.mrb[6].mxu0  ;;  %7362 = vmatpush3.bf16.msra.mxu1 %v7269_v39 }
0x1194   : > { %v4638_v16 = vadd.f32 %v6690_v0, %v5367_v60  ;;  %v4632_v12 = vpop.f32.mrb[7].mxu0  ;;  %7355 = vmatprep.subr.bf16.mxu1 %v7273_v56 }
0x1195   : > { %v4633_v54 = vadd.f32 %v5367_v60, %v4632_v12  ;;  %6729 = vmatprep.mubr.f32.mxu1 %v4645_v46 }
0x1196   : > { %6730 = vmatmul.mubr.f32.gmra.mrb[4].mxu1 %v4646_v3  ;;  %v4648_v41 = vmax.f32 %v4638_v16, 0.0 }
0x1197   : > { %v4647_v19 = vmax.f32 %v4633_v54, 0.0  ;;  %7363 = vmatpush3.bf16.msra.mxu1 %v7273_v56 }
0x1198   : > { %7356 = vmatprep.subr.bf16.mxu1 %v7277_v51 }
0x1199   : > { %6732 = vmatprep.mubr.f32.mxu1 %v4647_v19 }
0x119a   : > { %6733 = vmatmul.mubr.f32.gmra.mrb[6].mxu1 %v4648_v41 }
0x119b   : > { %7364 = vmatpush3.bf16.msra.mxu1 %v7277_v51 }
0x119c   : > { %7357 = vmatprep.subr.bf16.mxu1 %v7281_v23 }
0x119f   : > { %7365 = vmatpush3.bf16.msra.mxu1 %v7281_v23 }
0x11a0   : > { %7358 = vmatprep.subr.bf16.mxu1 %v7285_v43 }
0x11a3   : > { %7366 = vmatpush3.bf16.msra.mxu1 %v7285_v43 }
0x11a4   : > { %7359 = vmatprep.subr.bf16.mxu1 %v7289_v59 }
0x11a7   : > { %7367 = vmatpush3.bf16.msra.mxu1 %v7289_v59 }
0x11a8   : > { %7360 = vmatprep.subr.bf16.mxu1 %v7293_v14 }
0x11ab   : > { %7368 = vmatpush3.bf16.msra.mxu1 %v7293_v14 }
0x1261   : > { %v6725_v17 = vpop.f32.mrb[0].mxu1 }
0x1262   : > { %v4746_v9 = vadd.f32 %v6725_v17, %v5368_v52  ;;  %v4740_v20 = vpop.f32.mrb[1].mxu1 }
0x1263   : > { %v4741_v21 = vadd.f32 %v5368_v52, %v4740_v20 }
0x1264   : > { %v4780_v63 = vmax.f32 %v4746_v9, 0.0 }
0x1265   : > { %v4779_v58 = vmax.f32 %v4741_v21, 0.0  ;;  %v6728_v49 = vpop.f32.mrb[2].mxu1 }
0x1266   : > { %v4756_v45 = vadd.f32 %v6728_v49, %v5368_v52  ;;  %v4750_v5 = vpop.f32.mrb[3].mxu1 }
0x1267   : > { %v4751_v55 = vadd.f32 %v5368_v52, %v4750_v5  ;;  %6767 = vmatprep.mubr.f32.mxu0 %v4779_v58 }
0x1268   : > { %6768 = vmatmul.mubr.f32.vlgmr.msra.gmra.mrb[8].mxu0 %v4780_v63  ;;  %v4782_v22 = vmax.f32 %v4756_v45, 0.0 }
0x1269   : > { %v4781_v48 = vmax.f32 %v4751_v55, 0.0  ;;  %v6731_v50 = vpop.f32.mrb[4].mxu1 }
0x126a   : > { %v4766_v24 = vadd.f32 %v6731_v50, %v5368_v52  ;;  %v4760_v10 = vpop.f32.mrb[5].mxu1 }
0x126b   : > { %v4761_v38 = vadd.f32 %v5368_v52, %v4760_v10  ;;  %6770 = vmatprep.mubr.f32.mxu0 %v4781_v48 }
0x126c   : > { %6771 = vmatmul.mubr.f32.gmra.mrb[10].mxu0 %v4782_v22  ;;  %v4784_v36 = vmax.f32 %v4766_v24, 0.0 }
0x126d   : > { %v4783_v32 = vmax.f32 %v4761_v38, 0.0  ;;  %v6734_v34 = vpop.f32.mrb[6].mxu1 }
0x126e   : > { %v4776_v39 = vadd.f32 %v6734_v34, %v5368_v52  ;;  %v4770_v2 = vpop.f32.mrb[7].mxu1 }
0x126f   : > { %v4771_v61 = vadd.f32 %v5368_v52, %v4770_v2  ;;  %6773 = vmatprep.mubr.f32.mxu1 %v4783_v32 }
0x1270   : > { %6774 = vmatmul.mubr.f32.vlgmr.msra.gmra.mrb[8].mxu1 %v4784_v36  ;;  %v4786_v62 = vmax.f32 %v4776_v39, 0.0 }
0x1271   : > { %v4785_v56 = vmax.f32 %v4771_v61, 0.0 }
0x1273   : > { %6776 = vmatprep.mubr.f32.mxu1 %v4785_v56 }
0x1274   : > { %6777 = vmatmul.mubr.f32.gmra.mrb[10].mxu1 %v4786_v62 }
0x133b   : > { %v6769_v51 = vpop.f32.mrb[8].mxu0 }
0x133c   : > { %v4882_v33 = vadd.f32 %v6769_v51, %v5369_v15  ;;  %v4876_v40 = vpop.f32.mrb[9].mxu0 }
0x133d   : > { %v4877_v23 = vadd.f32 %v5369_v15, %v4876_v40 }
0x133e   : > { %4916 = vst [vmem:[#allocation26 + $0x8] sm:$0xff] %v4882_v33 }
0x133f   : > { %4915 = vst [vmem:[#allocation26] sm:$0xff] %v4877_v23  ;;  %v6772_v4 = vpop.f32.mrb[10].mxu0 }
0x1340   : > { %v4892_v6 = vadd.f32 %v6772_v4, %v5369_v15  ;;  %v4886_v43 = vpop.f32.mrb[11].mxu0 }
0x1341   : > { %v4887_v42 = vadd.f32 %v5369_v15, %v4886_v43 }
0x1342   : > { %4918 = vst [vmem:[#allocation26 + $0x18] sm:$0xff] %v4892_v6 }
0x1343   : > { %4917 = vst [vmem:[#allocation26 + $0x10] sm:$0xff] %v4887_v42  ;;  %v6775_v1 = vpop.f32.mrb[8].mxu1 }
0x1344   : > { %v4902_v59 = vadd.f32 %v6775_v1, %v5369_v15  ;;  %v4896_v60 = vpop.f32.mrb[9].mxu1 }
0x1345   : > { %v4897_v53 = vadd.f32 %v5369_v15, %v4896_v60 }
0x1346   : > { %4920 = vst [vmem:[#allocation26 + $0x28] sm:$0xff] %v4902_v59 }
0x1347   : > { %4919 = vst [vmem:[#allocation26 + $0x20] sm:$0xff] %v4897_v53  ;;  %v6778_v8 = vpop.f32.mrb[10].mxu1 }
0x1348   : > { %v4912_v47 = vadd.f32 %v6778_v8, %v5369_v15  ;;  %v4906_v11 = vpop.f32.mrb[11].mxu1 }
0x1349   : > { %v4907_v18 = vadd.f32 %v5369_v15, %v4906_v11 }
0x134a   : > { %4922 = vst [vmem:[#allocation26 + $0x38] sm:$0xff] %v4912_v47 }
0x134b   : > { %4921 = vst [vmem:[#allocation26 + $0x30] sm:$0xff] %v4907_v18 }
0x134c PF: > { %p7500_p10 = scmp.eq.s32.totalorder %s8316_s1, 1  ;;  %s8197_s3 = smov [#allocation26]  }
0x134d   : > { %s4929_s6 = sshll.u32 %s8197_s3, 4  ;;  %s4930_s6 = int_to_ptr.vmem [resolvable:$true] %s4929_s6 }
0x134e   : > { %s8082_s11 = scalar_lea.vmem %s4930_s6, 1024  ;;  %p8089_p12 = scmp.lt.s32.totalorder %s4930_s6, %s4930_s6 }
0x134f   : > { %p8083_p4 = scmp.ne.s32.totalorder %s4930_s6, %s8082_s11  ;;  %p8090_p8 = scmp.lt.s32.totalorder %s8082_s11, %s8082_s11 }
0x1351   : > { %p8084_p7 = pnand %p8083_p4, %p7500_p10  ;;  %p8091_p5 = por %p8090_p8, %p8089_p12 }
0x1353   : > { %p8085_p11 = pneg %p8084_p7 }
0x1355   : > { %p8092_p3 = pnand %p8091_p5, %p8085_p11 }
0x1357   : > { %8095 = shalt.err (!%p8092_p3)
}
0x1358   : > { %s9843_s25 = sld [smem:[#allocation54_spill]] }
0x135e   : > { %s8096_s21 = scalar_lea.hbm %s9843_s25, 1024 }
0x135f   : > { %p8097_p1 = scmp.ne.s32.totalorder %s9843_s25, %s8096_s21  ;;  %p8102_p0 = scmp.lt.u32.totalorder %s8096_s21, %s9843_s25 }
0x1361   : > { %p8098_p13 = pnand %p8097_p1, %p7500_p10 }
0x1363   : > { %p8099_p6 = pneg %p8098_p13 }
0x1365   : > { %p8104_p2 = pnand %p8102_p0, %p8099_p6 }
0x1367   : > { %8107 = shalt.err (!%p8104_p2)
}
0x1368   : > { %s8198_s15 = smov 128   ;;  %s8199_s13 = smov 8  }
0x1369   : > { %7428 = dma.vmem_to_hbm [thread:$0]  (%p7500_p10), %s4930_s6, 1024, %s9843_s25, [#allocation6], %s8198_s15, %s8198_s15, %s8199_s13  }
0x136a   : > { %8157 = dma.done.wait (%p7500_p10), [#allocation6], 1024  }
0x136b   : > { %8159 = vsyncadd (%p7500_p10), [#allocation6], 4294966272 }
0x136c PF: > { %p33_p9 = scmp.ge.s32.totalorder %s8485_s19, 4   ;;  %s9844_s27 = smov %s8166_s28 }
0x136d   : > { %s9845_s28 = smov %s8170_s29  ;;  %s9846_s29 = smov %s8497_s4 }
0x136e   : > { %s9847_s30 = smov %s8485_s19  ;;  %35 = sbr.rel (!%p33_p9) target bundleno = 28 (0x1c), region = 224 }
0x1375   :  { %4945 = vsyncpa [#allocation5], 1 }
0x1376   :  { %4947 = vsyncpa [#allocation5 + $0x1], 1 }
0x1377   :  { %4948 = vsyncpa [#allocation8], 1 }
0x1378   :  { %4949 = vsyncpa [#allocation11], 1 }
0x1379   :  { %4950 = vsyncpa [#allocation14], 1 }
0x137a   :  { %4951 = vsyncpa [#allocation17], 1 }
0x137b   :  { %4952 = vsyncpa [#allocation20], 1 }
0x137c   :  { %4953 = vsyncpa [#allocation23], 1 }
0x137d   :  { %4954 = vsyncpa [#allocation6], 1 }
0x137e   :  { %4956 = vsyncpa [#allocation6 + $0x1], 1 }

</bundles_post_ra>
